<compile_context>
chip_gen: v7x
topology: tpu7x:2x2x1
jax: 0.10.0
libtpu: 0.0.40
codegen_flags: <defaults>
</compile_context>

<pallas_src>
import functools

import numpy as np

import jax
import jax.numpy as jnp
from jax.experimental import pallas as pl
from jax.experimental.pallas import tpu as pltpu

# ------------------------- config (mirrors cfg.*) -------------------------
B_DEMO = 2       # demo batch size
D = 8            # cfg.data.shape
S = 16           # cfg.data.S
TIME_DIM = 32    # time_encoder.dim
HIDDEN = 32      # cfg.denoising_model.hidden_dim
NUM_HIDDEN = 2   # cfg.denoising_model.num_hidden
STACK_TIME = True
P_DROPOUT = 0.1  # dropout is identity at inference time

INPUT_DIM = D * S + (TIME_DIM if STACK_TIME else 0)   # 160
OUTPUT_DIM = D * S                                    # 128

DOT_DTYPE = jnp.bfloat16   # MXU operand dtype (f32 accumulation). jnp.float32 for exact f32.


def _round_up(x, m):
    return (x + m - 1) // m * m


BT = 128                               # batch tile (rows per grid step)
XBLK = _round_up(D * S, 128)           # one-hot lane block      -> 128
TIME_PAD = _round_up(TIME_DIM, 128)    # time-encoding lane block -> 128
HID_PAD = _round_up(HIDDEN, 128)       # 128
OUT_PAD = _round_up(OUTPUT_DIM, 128)   # 128

# ---------------- static constant rows (built once at import) ----------------
_HALF = TIME_DIM // 2
_FREQS_NP = np.exp(
    -np.log(10000.0) * np.arange(_HALF, dtype=np.float64) / _HALF
).astype(np.float32)

# lane % S over the one-hot block; padded lanes get -1 (never matches xt_exp = -2 pad).
_lane_mod_np = np.full((1, XBLK), -1, np.int32)
_lane_mod_np[0, : D * S] = np.arange(D * S, dtype=np.int32) % S
LANE_MOD_ROW = jnp.asarray(_lane_mod_np)                 # (1, XBLK) int32

# time block layout: lanes [0,HALF) -> sin(t*f), [HALF,TIME_DIM) -> cos = sin(+pi/2),
# lanes >= TIME_DIM have freq = phase = 0  ->  sin(0) = 0 exactly.
_freq_np = np.zeros((1, TIME_PAD), np.float32)
_phase_np = np.zeros((1, TIME_PAD), np.float32)
_freq_np[0, :_HALF] = _FREQS_NP
_freq_np[0, _HALF:TIME_DIM] = _FREQS_NP
_phase_np[0, _HALF:TIME_DIM] = np.float32(np.pi / 2.0)
FREQ_ROW = jnp.asarray(_freq_np)                         # (1, TIME_PAD) f32
PHASE_ROW = jnp.asarray(_phase_np)                       # (1, TIME_PAD) f32


# ------------------------------ Pallas kernel ------------------------------
def _fused_kernel(xt_exp_ref, t_ref, lane_mod_ref, freq_ref, phase_ref,
                  *wb_and_out, n_valid):
    """Refs (all VMEM):
        xt_exp_ref : (BT, XBLK) int32   — xt_exp[r, l] = xt[r, l // S]
        t_ref      : (BT, 1)    f32
        lane_mod_ref, freq_ref, phase_ref : (1, 128) constant rows
        wb         : bf16 weights + f32 biases, zero-padded to 128-lane shapes
        out_ref    : (BT, OUT_PAD) f32
    n_valid: real batch size (rows >= n_valid are zeroed in the output slab).
    """
    out_ref = wb_and_out[-1]
    wb = wb_and_out[:-1]
    bt = out_ref.shape[0]

    # --- one-hot(xt): single vectorized VPU compare (out-of-range xt -> all-zero block) ---
    onehot = (xt_exp_ref[...] == lane_mod_ref[...]).astype(jnp.float32).astype(DOT_DTYPE)

    idx = 0
    # --- first Linear, split into one-hot rows and time rows of W1 ---
    h = jnp.dot(onehot, wb[idx][...], preferred_element_type=jnp.float32)
    idx += 1
    if STACK_TIME:
        # sinusoidal encoding on a single 128-lane block (EUP sin); cos = sin(x + pi/2)
        t_block = jnp.sin(t_ref[...] * freq_ref[...] + phase_ref[...])
        h = h + jnp.dot(t_block.astype(DOT_DTYPE), wb[idx][...],
                        preferred_element_type=jnp.float32)
        idx += 1
    h = jnp.maximum(h + wb[idx][...], 0.0)
    idx += 1

    # --- remaining hidden Linear + ReLU layers (dropout == identity in eval) ---
    for _ in range(1, NUM_HIDDEN):
        w = wb[idx][...]
        b = wb[idx + 1][...]
        idx += 2
        h = jnp.maximum(
            jnp.dot(h.astype(DOT_DTYPE), w, preferred_element_type=jnp.float32) + b, 0.0)

    # --- last Linear ---
    w_last = wb[idx][...]
    b_last = wb[idx + 1][...]
    out = jnp.dot(h.astype(DOT_DTYPE), w_last, preferred_element_type=jnp.float32) + b_last

    # zero padded batch rows so the padded output slab is exact zeros
    row = jax.lax.broadcasted_iota(jnp.int32, (bt, 1), 0) + pl.program_id(0) * bt
    out_ref[...] = jnp.where(row < n_valid, out, 0.0)


# ------------------------------ host wrapper --------------------------------
@jax.jit
def denoising_forward(xt, t, kernel_params):
    """xt: (B, D) int, t: (B,) float -> logits (B, D, S) float32."""
    bn = xt.shape[0]
    b_pad = _round_up(max(bn, 1), BT)
    nb = b_pad // BT

    # index plumbing only (one-hot itself is built in-kernel):
    #   xt_exp[r, l] = xt[r, l // S]; pad rows/lanes with sentinel -2 (never matches).
    xt_exp = jnp.repeat(xt.astype(jnp.int32), S, axis=1)             # (bn, D*S)
    if XBLK > D * S:
        xt_exp = jnp.pad(xt_exp, ((0, 0), (0, XBLK - D * S)), constant_values=-2)
    xt_exp = jnp.pad(xt_exp, ((0, b_pad - bn), (0, 0)), constant_values=-2)
    t2d = jnp.pad(t.astype(jnp.float32)[:, None], ((0, b_pad - bn), (0, 0)))

    def row_spec(c):
        return pl.BlockSpec((BT, c), lambda i: (i, 0))

    def const_spec(r, c):
        # constant block index -> Pallas loads once, keeps VMEM-resident across tiles
        return pl.BlockSpec((r, c), lambda i: (0, 0))

    in_specs = [
        row_spec(XBLK),              # xt_exp
        row_spec(1),                 # t
        const_spec(1, XBLK),         # lane % S row
        const_spec(1, TIME_PAD),     # freqs
        const_spec(1, TIME_PAD),     # phases
    ] + [const_spec(*p.shape) for p in kernel_params]

    out = pl.pallas_call(
        functools.partial(_fused_kernel, n_valid=bn),
        grid=(nb,),
        in_specs=in_specs,
        out_specs=pl.BlockSpec((BT, OUT_PAD), lambda i: (i, 0)),
        out_shape=jax.ShapeDtypeStruct((b_pad, OUT_PAD), jnp.float32),
        compiler_params=pltpu.CompilerParams(dimension_semantics=("parallel",)),
    )(xt_exp, t2d, LANE_MOD_ROW, FREQ_ROW, PHASE_ROW, *kernel_params)

    # only remaining XLA glue: drop batch padding, reshape to (B, D, S)
    return out[:bn, : D * S].reshape(bn, D, S)


# ------------------------------ parameters ---------------------------------
def init_params(key):
    """torch.nn.Linear-style init (U(-k, k), k = 1/sqrt(fan_in)).

    Weights stored transposed vs. PyTorch: (in_features, out_features).
    Returns the real (unpadded, f32) parameters.
    """
    dims = [INPUT_DIM] + [HIDDEN] * NUM_HIDDEN + [OUTPUT_DIM]
    params = []
    for i in range(len(dims) - 1):
        fan_in, fan_out = dims[i], dims[i + 1]
        k = 1.0 / float(np.sqrt(fan_in))
        key, kw, kb = jax.random.split(key, 3)
        w = jax.random.uniform(kw, (fan_in, fan_out), jnp.float32, -k, k)
        b = jax.random.uniform(kb, (1, fan_out), jnp.float32, -k, k)
        params.append((w, b))
    return params


def _pad2(x, r, c, dtype):
    out = jnp.zeros((r, c), dtype)
    return out.at[: x.shape[0], : x.shape[1]].set(x.astype(dtype))


def prepare_kernel_params(params):
    """Pad once to lane-aligned shapes; weights in bf16, biases in f32.

    Layout: (W1_onehot, [W1_time], b1, [W_i, b_i for hidden 1..NUM_HIDDEN-1], W_last, b_last)
    """
    flat = []
    w1, b1 = params[0]
    flat.append(_pad2(w1[: D * S], XBLK, HID_PAD, DOT_DTYPE))
    if STACK_TIME:
        flat.append(_pad2(w1[D * S:], TIME_PAD, HID_PAD, DOT_DTYPE))
    flat.append(_pad2(b1, 1, HID_PAD, jnp.float32))
    for i in range(1, NUM_HIDDEN):
        w, b = params[i]
        flat.append(_pad2(w, HID_PAD, HID_PAD, DOT_DTYPE))
        flat.append(_pad2(b, 1, HID_PAD, jnp.float32))
    w_last, b_last = params[-1]
    flat.append(_pad2(w_last, HID_PAD, OUT_PAD, DOT_DTYPE))
    flat.append(_pad2(b_last, 1, OUT_PAD, jnp.float32))
    return tuple(flat)


# ------------------------- pure-JAX reference -------------------------------
def encode_t(t):
    """Sinusoidal time encoder, output (B, TIME_DIM)."""
    freqs = jnp.asarray(_FREQS_NP)
    args = t[:, None].astype(jnp.float32) * freqs[None, :]
    return jnp.concatenate([jnp.sin(args), jnp.cos(args)], axis=-1)


def reference_forward(xt, t, params, dot_dtype=jnp.float32):
    xt_enc = jax.nn.one_hot(xt, S, dtype=jnp.float32).reshape(xt.shape[0], D * S)
    h = jnp.concatenate([xt_enc, encode_t(t)], axis=-1) if STACK_TIME else xt_enc
    for (w, b) in params[:-1]:
        h = jnp.dot(h.astype(dot_dtype), w.astype(dot_dtype),
                    preferred_element_type=jnp.float32) + b
        h = jnp.maximum(h, 0.0)
    w, b = params[-1]
    out = jnp.dot(h.astype(dot_dtype), w.astype(dot_dtype),
                  preferred_element_type=jnp.float32) + b
    return out.reshape(xt.shape[0], D, S)


# --------------------------------- main -------------------------------------
if __name__ == "__main__":
    key = jax.random.PRNGKey(0)
    k_params, k_x, k_t, k_x2, k_t2 = jax.random.split(key, 5)

    params = init_params(k_params)
    kernel_params = prepare_kernel_params(params)

    # small shapes consistent with the module: B=2, D=8, S=16
    xt = jax.random.randint(k_x, (B_DEMO, D), 0, S, dtype=jnp.int32)
    t = jax.random.uniform(k_t, (B_DEMO,), jnp.float32)

    logits = jax.block_until_ready(denoising_forward(xt, t, kernel_params))
    assert logits.shape == (B_DEMO, D, S)

    ref_bf16 = reference_forward(xt, t, params, dot_dtype=DOT_DTYPE)
    ref_f32 = reference_forward(xt, t, params, dot_dtype=jnp.float32)
    assert jnp.allclose(logits, ref_bf16, atol=1e-2, rtol=1e-2), float(
        jnp.max(jnp.abs(logits - ref_bf16)))
    assert jnp.allclose(logits, ref_f32, atol=6e-2, rtol=6e-2), float(
        jnp.max(jnp.abs(logits - ref_f32)))

    # larger batch exercising the multi-tile grid (diffusion-sampling regime,
    # non-multiple of the batch tile to exercise row masking)
    B_BIG = 300
    xt2 = jax.random.randint(k_x2, (B_BIG, D), 0, S, dtype=jnp.int32)
    t2 = jax.random.uniform(k_t2, (B_BIG,), jnp.float32)
    logits2 = jax.block_until_ready(denoising_forward(xt2, t2, kernel_params))
    assert logits2.shape == (B_BIG, D, S)
    ref2 = reference_forward(xt2, t2, params, dot_dtype=DOT_DTYPE)
    assert jnp.allclose(logits2, ref2, atol=1e-2, rtol=1e-2), float(
        jnp.max(jnp.abs(logits2 - ref2)))

    print("KERNEL_OK")
</pallas_src>

<mosaic_0001>
module attributes {stable_mosaic.version = 11 : i64} {
  func.func @_fused_kernel(%arg0: i32, %arg1: memref<128x128xi32, #tpu.memory_space<vmem>>, %arg2: memref<128x1xf32, #tpu.memory_space<vmem>>, %arg3: memref<1x128xi32, #tpu.memory_space<vmem>>, %arg4: memref<1x128xf32, #tpu.memory_space<vmem>>, %arg5: memref<1x128xf32, #tpu.memory_space<vmem>>, %arg6: memref<128x128xbf16, #tpu.memory_space<vmem>>, %arg7: memref<128x128xbf16, #tpu.memory_space<vmem>>, %arg8: memref<1x128xf32, #tpu.memory_space<vmem>>, %arg9: memref<128x128xbf16, #tpu.memory_space<vmem>>, %arg10: memref<1x128xf32, #tpu.memory_space<vmem>>, %arg11: memref<128x128xbf16, #tpu.memory_space<vmem>>, %arg12: memref<1x128xf32, #tpu.memory_space<vmem>>, %arg13: memref<128x128xf32, #tpu.memory_space<vmem>>) attributes {dimension_semantics = [#tpu.dimension_semantics<parallel>], iteration_bounds = array<i64: 1>, scalar_prefetch = 0 : i64, scratch_operands = 0 : i64, tpu.core_type = #tpu.core_type<tc>, window_params = [{transform_indices = @transform_0, window_bounds = array<i64: 128, 128>}, {transform_indices = @transform_1, window_bounds = array<i64: 128, 1>}, {pipeline_mode = #tpu.pipeline_mode<synchronous>, transform_indices = @transform_2, window_bounds = array<i64: 1, 128>}, {pipeline_mode = #tpu.pipeline_mode<synchronous>, transform_indices = @transform_3, window_bounds = array<i64: 1, 128>}, {pipeline_mode = #tpu.pipeline_mode<synchronous>, transform_indices = @transform_4, window_bounds = array<i64: 1, 128>}, {pipeline_mode = #tpu.pipeline_mode<synchronous>, transform_indices = @transform_5, window_bounds = array<i64: 128, 128>}, {pipeline_mode = #tpu.pipeline_mode<synchronous>, transform_indices = @transform_6, window_bounds = array<i64: 128, 128>}, {pipeline_mode = #tpu.pipeline_mode<synchronous>, transform_indices = @transform_7, window_bounds = array<i64: 1, 128>}, {pipeline_mode = #tpu.pipeline_mode<synchronous>, transform_indices = @transform_8, window_bounds = array<i64: 128, 128>}, {pipeline_mode = #tpu.pipeline_mode<synchronous>, transform_indices = @transform_9, window_bounds = array<i64: 1, 128>}, {pipeline_mode = #tpu.pipeline_mode<synchronous>, transform_indices = @transform_10, window_bounds = array<i64: 128, 128>}, {pipeline_mode = #tpu.pipeline_mode<synchronous>, transform_indices = @transform_11, window_bounds = array<i64: 1, 128>}, {transform_indices = @transform_12, window_bounds = array<i64: 128, 128>}]} {
    %c0 = arith.constant 0 : index
    %c0_0 = arith.constant 0 : index
    %0 = vector.load %arg1[%c0, %c0_0] : memref<128x128xi32, #tpu.memory_space<vmem>>, vector<128x128xi32>
    %c0_1 = arith.constant 0 : index
    %c0_2 = arith.constant 0 : index
    %1 = vector.load %arg3[%c0_1, %c0_2] : memref<1x128xi32, #tpu.memory_space<vmem>>, vector<1x128xi32>
    %2 = vector.broadcast %1 : vector<1x128xi32> to vector<128x128xi32>
    %3 = arith.cmpi eq, %0, %2 : vector<128x128xi32>
    %4 = arith.extui %3 : vector<128x128xi1> to vector<128x128xi32>
    %5 = arith.sitofp %4 : vector<128x128xi32> to vector<128x128xf32>
    %6 = arith.truncf %5 : vector<128x128xf32> to vector<128x128xbf16>
    %c0_3 = arith.constant 0 : index
    %c0_4 = arith.constant 0 : index
    %7 = vector.load %arg6[%c0_3, %c0_4] : memref<128x128xbf16, #tpu.memory_space<vmem>>, vector<128x128xbf16>
    %cst = arith.constant dense<0.000000e+00> : vector<128x128xf32>
    %8 = tpu.matmul %6, %7, %cst {dimension_numbers = #tpu.dot_dimension_numbers<[1], [0], [0], [1], [0, 0, 1, 1], [], []>} : vector<128x128xbf16>, vector<128x128xbf16>, vector<128x128xf32> -> vector<128x128xf32>
    %c0_5 = arith.constant 0 : index
    %c0_6 = arith.constant 0 : index
    %9 = vector.load %arg2[%c0_5, %c0_6] : memref<128x1xf32, #tpu.memory_space<vmem>>, vector<128x1xf32>
    %c0_7 = arith.constant 0 : index
    %c0_8 = arith.constant 0 : index
    %10 = vector.load %arg4[%c0_7, %c0_8] : memref<1x128xf32, #tpu.memory_space<vmem>>, vector<1x128xf32>
    %11 = vector.broadcast %9 : vector<128x1xf32> to vector<128x128xf32>
    %12 = vector.broadcast %10 : vector<1x128xf32> to vector<128x128xf32>
    %13 = arith.mulf %11, %12 : vector<128x128xf32>
    %c0_9 = arith.constant 0 : index
    %c0_10 = arith.constant 0 : index
    %14 = vector.load %arg5[%c0_9, %c0_10] : memref<1x128xf32, #tpu.memory_space<vmem>>, vector<1x128xf32>
    %15 = vector.broadcast %14 : vector<1x128xf32> to vector<128x128xf32>
    %16 = arith.addf %13, %15 : vector<128x128xf32>
    %17 = math.sin %16 : vector<128x128xf32>
    %18 = arith.truncf %17 : vector<128x128xf32> to vector<128x128xbf16>
    %c0_11 = arith.constant 0 : index
    %c0_12 = arith.constant 0 : index
    %19 = vector.load %arg7[%c0_11, %c0_12] : memref<128x128xbf16, #tpu.memory_space<vmem>>, vector<128x128xbf16>
    %cst_13 = arith.constant dense<0.000000e+00> : vector<128x128xf32>
    %20 = tpu.matmul %18, %19, %cst_13 {dimension_numbers = #tpu.dot_dimension_numbers<[1], [0], [0], [1], [0, 0, 1, 1], [], []>} : vector<128x128xbf16>, vector<128x128xbf16>, vector<128x128xf32> -> vector<128x128xf32>
    %21 = arith.addf %8, %20 : vector<128x128xf32>
    %c0_14 = arith.constant 0 : index
    %c0_15 = arith.constant 0 : index
    %22 = vector.load %arg8[%c0_14, %c0_15] : memref<1x128xf32, #tpu.memory_space<vmem>>, vector<1x128xf32>
    %23 = vector.broadcast %22 : vector<1x128xf32> to vector<128x128xf32>
    %24 = arith.addf %21, %23 : vector<128x128xf32>
    %cst_16 = arith.constant 0.000000e+00 : f32
    %25 = vector.broadcast %cst_16 : f32 to vector<128x128xf32>
    %26 = arith.maximumf %24, %25 : vector<128x128xf32>
    %c0_17 = arith.constant 0 : index
    %c0_18 = arith.constant 0 : index
    %27 = vector.load %arg9[%c0_17, %c0_18] : memref<128x128xbf16, #tpu.memory_space<vmem>>, vector<128x128xbf16>
    %c0_19 = arith.constant 0 : index
    %c0_20 = arith.constant 0 : index
    %28 = vector.load %arg10[%c0_19, %c0_20] : memref<1x128xf32, #tpu.memory_space<vmem>>, vector<1x128xf32>
    %29 = arith.truncf %26 : vector<128x128xf32> to vector<128x128xbf16>
    %cst_21 = arith.constant dense<0.000000e+00> : vector<128x128xf32>
    %30 = tpu.matmul %29, %27, %cst_21 {dimension_numbers = #tpu.dot_dimension_numbers<[1], [0], [0], [1], [0, 0, 1, 1], [], []>} : vector<128x128xbf16>, vector<128x128xbf16>, vector<128x128xf32> -> vector<128x128xf32>
    %31 = vector.broadcast %28 : vector<1x128xf32> to vector<128x128xf32>
    %32 = arith.addf %30, %31 : vector<128x128xf32>
    %cst_22 = arith.constant 0.000000e+00 : f32
    %33 = vector.broadcast %cst_22 : f32 to vector<128x128xf32>
    %34 = arith.maximumf %32, %33 : vector<128x128xf32>
    %c0_23 = arith.constant 0 : index
    %c0_24 = arith.constant 0 : index
    %35 = vector.load %arg11[%c0_23, %c0_24] : memref<128x128xbf16, #tpu.memory_space<vmem>>, vector<128x128xbf16>
    %c0_25 = arith.constant 0 : index
    %c0_26 = arith.constant 0 : index
    %36 = vector.load %arg12[%c0_25, %c0_26] : memref<1x128xf32, #tpu.memory_space<vmem>>, vector<1x128xf32>
    %37 = arith.truncf %34 : vector<128x128xf32> to vector<128x128xbf16>
    %cst_27 = arith.constant dense<0.000000e+00> : vector<128x128xf32>
    %38 = tpu.matmul %37, %35, %cst_27 {dimension_numbers = #tpu.dot_dimension_numbers<[1], [0], [0], [1], [0, 0, 1, 1], [], []>} : vector<128x128xbf16>, vector<128x128xbf16>, vector<128x128xf32> -> vector<128x128xf32>
    %39 = vector.broadcast %36 : vector<1x128xf32> to vector<128x128xf32>
    %40 = arith.addf %38, %39 : vector<128x128xf32>
    %41 = tpu.iota {dimensions = array<i32: 0>} : vector<128x1xi32>
    %c128_i32 = arith.constant 128 : i32
    %42 = arith.muli %arg0, %c128_i32 : i32
    %43 = vector.broadcast %42 : i32 to vector<128x1xi32>
    %44 = arith.addi %41, %43 : vector<128x1xi32>
    %c2_i32 = arith.constant 2 : i32
    %45 = vector.broadcast %c2_i32 : i32 to vector<128x1xi32>
    %46 = arith.cmpi slt, %44, %45 : vector<128x1xi32>
    %cst_28 = arith.constant 0.000000e+00 : f32
    %47 = vector.shape_cast %46 : vector<128x1xi1> to vector<128x1xi1>
    %48 = vector.broadcast %47 : vector<128x1xi1> to vector<128x128xi1>
    %49 = vector.broadcast %cst_28 : f32 to vector<128x128xf32>
    %50 = arith.select %48, %40, %49 : vector<128x128xi1>, vector<128x128xf32>
    %c0_29 = arith.constant 0 : index
    %c0_30 = arith.constant 0 : index
    %51 = vector.load %arg13[%c0_29, %c0_30] : memref<128x128xf32, #tpu.memory_space<vmem>>, vector<128x128xf32>
    tpu.vector_store %arg13[%c0_29, %c0_30], %50 {strides = array<i32>} : memref<128x128xf32, #tpu.memory_space<vmem>>, vector<128x128xf32>,
    return
  }
  func.func @transform_0(%arg0: i32) -> (i32, i32) {
    %c0_i32 = arith.constant 0 : i32
    %c0_i32_0 = arith.constant 0 : i32
    return %arg0, %c0_i32 : i32, i32
  }
  func.func @transform_1(%arg0: i32) -> (i32, i32) {
    %c0_i32 = arith.constant 0 : i32
    %c0_i32_0 = arith.constant 0 : i32
    return %arg0, %c0_i32 : i32, i32
  }
  func.func @transform_2(%arg0: i32) -> (i32, i32) {
    %c0_i32 = arith.constant 0 : i32
    %c0_i32_0 = arith.constant 0 : i32
    %c0_i32_1 = arith.constant 0 : i32
    return %c0_i32, %c0_i32_0 : i32, i32
  }
  func.func @transform_3(%arg0: i32) -> (i32, i32) {
    %c0_i32 = arith.constant 0 : i32
    %c0_i32_0 = arith.constant 0 : i32
    %c0_i32_1 = arith.constant 0 : i32
    return %c0_i32, %c0_i32_0 : i32, i32
  }
  func.func @transform_4(%arg0: i32) -> (i32, i32) {
    %c0_i32 = arith.constant 0 : i32
    %c0_i32_0 = arith.constant 0 : i32
    %c0_i32_1 = arith.constant 0 : i32
    return %c0_i32, %c0_i32_0 : i32, i32
  }
  func.func @transform_5(%arg0: i32) -> (i32, i32) {
    %c0_i32 = arith.constant 0 : i32
    %c0_i32_0 = arith.constant 0 : i32
    %c0_i32_1 = arith.constant 0 : i32
    return %c0_i32, %c0_i32_0 : i32, i32
  }
  func.func @transform_6(%arg0: i32) -> (i32, i32) {
    %c0_i32 = arith.constant 0 : i32
    %c0_i32_0 = arith.constant 0 : i32
    %c0_i32_1 = arith.constant 0 : i32
    return %c0_i32, %c0_i32_0 : i32, i32
  }
  func.func @transform_7(%arg0: i32) -> (i32, i32) {
    %c0_i32 = arith.constant 0 : i32
    %c0_i32_0 = arith.constant 0 : i32
    %c0_i32_1 = arith.constant 0 : i32
    return %c0_i32, %c0_i32_0 : i32, i32
  }
  func.func @transform_8(%arg0: i32) -> (i32, i32) {
    %c0_i32 = arith.constant 0 : i32
    %c0_i32_0 = arith.constant 0 : i32
    %c0_i32_1 = arith.constant 0 : i32
    return %c0_i32, %c0_i32_0 : i32, i32
  }
  func.func @transform_9(%arg0: i32) -> (i32, i32) {
    %c0_i32 = arith.constant 0 : i32
    %c0_i32_0 = arith.constant 0 : i32
    %c0_i32_1 = arith.constant 0 : i32
    return %c0_i32, %c0_i32_0 : i32, i32
  }
  func.func @transform_10(%arg0: i32) -> (i32, i32) {
    %c0_i32 = arith.constant 0 : i32
    %c0_i32_0 = arith.constant 0 : i32
    %c0_i32_1 = arith.constant 0 : i32
    return %c0_i32, %c0_i32_0 : i32, i32
  }
  func.func @transform_11(%arg0: i32) -> (i32, i32) {
    %c0_i32 = arith.constant 0 : i32
    %c0_i32_0 = arith.constant 0 : i32
    %c0_i32_1 = arith.constant 0 : i32
    return %c0_i32, %c0_i32_0 : i32, i32
  }
  func.func @transform_12(%arg0: i32) -> (i32, i32) {
    %c0_i32 = arith.constant 0 : i32
    %c0_i32_0 = arith.constant 0 : i32
    return %arg0, %c0_i32 : i32, i32
  }
}

</mosaic_0001>

<bundles_post_ra>
// kernel: denoising_forward.1
= control target key start
LH: loop header
LB: loop body
LE: loop exit
PB: predicated region body
PF: predicated region fallthrough
CT: control target
= control target key end

     0   :  { %v3297_v0 = vmov 0   ;;  %v5189_v53 = vmov 683565275   ;;  %v5183_v55 = vmov 2475754826   ;;  %s5164_s1 = inlined_call_operand.vmem [shape: f32[128,1], index: 1, kind: input, shape index: {}]   ;;  %s5165_s3 = inlined_call_operand.vmem [shape: f32[1,128], index: 3, kind: input, shape index: {}]   ;;  %s5166_s4 = inlined_call_operand.vmem [shape: f32[1,128], index: 4, kind: input, shape index: {}]   ;;  %s5167_s6 = inlined_call_operand.vmem [shape: bf16[128,128], index: 6, kind: input, shape index: {}]   ;;  %s5168_s5 = inlined_call_operand.vmem [shape: bf16[128,128], index: 5, kind: input, shape index: {}]   ;;  %s5169_s8 = inlined_call_operand.vmem [shape: bf16[128,128], index: 8, kind: input, shape index: {}]   ;;  %s5170_s0 = inlined_call_operand.vmem [shape: s32[128,128], index: 0, kind: input, shape index: {}]   ;;  %s5171_s2 = inlined_call_operand.vmem [shape: s32[1,128], index: 2, kind: input, shape index: {}]   ;;  %s5172_s10 = inlined_call_operand.vmem [shape: bf16[128,128], index: 10, kind: input, shape index: {}]   ;;  %s5173_s7 = inlined_call_operand.vmem [shape: f32[1,128], index: 7, kind: input, shape index: {}]   ;;  %s5174_s9 = inlined_call_operand.vmem [shape: f32[1,128], index: 9, kind: input, shape index: {}]   ;;  %s5175_s12 = inlined_call_operand.vmem [shape: f32[128,128], index: 12, kind: output, shape index: {}]   ;;  %s5176_s11 = inlined_call_operand.vmem [shape: f32[1,128], index: 11, kind: input, shape index: {}]  }
   0x1   :  { %3197 = vset.pattern.permute.xlu1 %v3297_v0  ;;  %3196 = vset.pattern.permute.xlu0 %v3297_v0  ;;  %v137_v1 = vld [vmem:[%s5164_s1 + $0x10] sm:$0xff]  ;;  %v135_v2 = vld [vmem:[%s5164_s1] sm:$0xff]  ;;  %v138_v3 = vld [vmem:[%s5164_s1 + $0x18] sm:$0xff]  ;;  %v5185_v57 = vmov 2131351028  }
   0x2   :  { %164 = vperm.xlu1 %3197, %v137_v1   ;;  %154 = vperm.xlu0 %3196, %v135_v2   ;;  %v136_v4 = vld [vmem:[%s5164_s1 + $0x8] sm:$0xff]  ;;  %v139_v6 = vld [vmem:[%s5164_s1 + $0x20] sm:$0xff]  ;;  %v142_v7 = vld [vmem:[%s5164_s1 + $0x38] sm:$0xff]  ;;  %v5187_v59 = vmov 2102212464  }
   0x3   :  { %v140_v5 = vld [vmem:[%s5164_s1 + $0x28] sm:$0xff]  ;;  %v141_v8 = vld [vmem:[%s5164_s1 + $0x30] sm:$0xff]  ;;  %v143_v10 = vld [vmem:[%s5164_s1 + $0x40] sm:$0xff]  ;;  %v5193_v0 = vmov 920167782  }
   0x4   :  { %v144_v9 = vld [vmem:[%s5164_s1 + $0x48] sm:$0xff]  ;;  %v146_v11 = vld [vmem:[%s5164_s1 + $0x58] sm:$0xff]  ;;  %v145_v12 = vld [vmem:[%s5164_s1 + $0x50] sm:$0xff] }
   0x5   :  { %v148_v13 = vld [vmem:[%s5164_s1 + $0x68] sm:$0xff]  ;;  %v147_v14 = vld [vmem:[%s5164_s1 + $0x60] sm:$0xff]  ;;  %v150_v15 = vld [vmem:[%s5164_s1 + $0x78] sm:$0xff] }
   0x6   :  { %169 = vperm.xlu1 %3197, %v138_v3   ;;  %159 = vperm.xlu0 %3196, %v136_v4   ;;  %v149_v16 = vld [vmem:[%s5164_s1 + $0x70] sm:$0xff]  ;;  %v3422_v17 = vld [vmem:[%s5165_s3] ss:$0 sm:$0xff]  ;;  %v5191_v4 = vmov 1326507024  }
   0x7   :  { %v3427_v18 = vld [vmem:[%s5166_s4] ss:$0 sm:$0xff] }
   0xa   :  { %179 = vperm.xlu1 %3197, %v140_v5   ;;  %174 = vperm.xlu0 %3196, %v139_v6  }
   0xe   :  { %189 = vperm.xlu1 %3197, %v142_v7   ;;  %184 = vperm.xlu0 %3196, %v141_v8  }
  0x12   :  { %199 = vperm.xlu1 %3197, %v144_v9   ;;  %194 = vperm.xlu0 %3196, %v143_v10  }
  0x16   :  { %209 = vperm.xlu1 %3197, %v146_v11   ;;  %204 = vperm.xlu0 %3196, %v145_v12  }
  0x1a   :  { %219 = vperm.xlu1 %3197, %v148_v13   ;;  %214 = vperm.xlu0 %3196, %v147_v14  }
  0x1e   :  { %229 = vperm.xlu1 %3197, %v150_v15   ;;  %224 = vperm.xlu0 %3196, %v149_v16  }
  0x81   :  { %v165_v19 = vpop.permute.xlu1 %164  ;;  %v155_v21 = vpop.permute.xlu0 %154 }
  0x82   :  { %v240_v20 = vmul.f32 %v3422_v17, %v165_v19  ;;  %v238_v23 = vmul.f32 %v3422_v17, %v155_v21 }
  0x84   :  { %v3431_v22 = vadd.f32 %v3427_v18, %v240_v20  ;;  %v3438_v29 = vadd.f32 %v3427_v18, %v238_v23 }
  0x85   :  { %v170_v24 = vpop.permute.xlu1 %169  ;;  %v160_v40 = vpop.permute.xlu0 %159 }
  0x86   :  { %5238 = vst [vmem:[#allocation2_spill] sm:$0xff] %v3431_v22  ;;  %v488_v25 = vand.u32 2139095040, %v3431_v22  ;;  %v241_v26 = vmul.f32 %v3422_v17, %v170_v24  ;;  %v5181_v28 = vand.u32 2147483647, %v3431_v22  ;;  %v280_v37 = vand.u32 2139095040, %v3438_v29 }
  0x87   :  { %v3454_v48 = vmul.f32 %v3422_v17, %v160_v40 }
  0x88   :  { %v489_v27 = vshrl.u32 %v488_v25, 23  ;;  %v3441_v30 = vadd.f32 %v3427_v18, %v241_v26  ;;  %v492_v36 = vand.u32 8388607, %v5181_v28  ;;  %v3451_v47 = vshrl.u32 %v280_v37, 23 }
  0x89   :  { %v180_v34 = vpop.permute.xlu1 %179 }
  0x8a   :  { %v2808_v31 = vadd.s32 4294967169, %v489_v27  ;;  %v5179_v32 = vand.u32 2147483647, %v3441_v30  ;;  %v592_v33 = vand.u32 2139095040, %v3441_v30  ;;  %v243_v41 = vmul.f32 %v3422_v17, %v180_v34 }
  0x8b   :  { %v493_v45 = vor.u32 8388608, %v492_v36 }
  0x8c   :  { %v495_v35 = vadd.s32 1, %v2808_v31  ;;  %v593_v38 = vshrl.u32 %v592_v33, 23  ;;  %v596_v39 = vand.u32 8388607, %v5179_v32  ;;  %v3457_v52 = vadd.f32 %v3427_v18, %v243_v41 }
  0x8d   :  { %v533_v24 = vshll.u32 %v493_v45, 8 }
  0x8e   :  { %vm496_vm0 = vcmp.gt.s32.totalorder %v495_v35, 0  ;;  %v2812_v43 = vadd.s32 4294967169, %v593_v38  ;;  %v597_v50 = vor.u32 8388608, %v596_v39  ;;  %5239 = vst [vmem:[#allocation3_spill] sm:$0xff] %v3457_v52  ;;  %v800_v40 = vand.u32 2139095040, %v3457_v52 }
  0x8f   :  { %v497_v42 = vsel %vm496_vm0, %v495_v35, 0 }
  0x90   :  { %v499_v44 = vand.u32 31, %v497_v42  ;;  %v498_v46 = vshrl.u32 %v497_v42, 5  ;;  %v599_v51 = vadd.s32 1, %v2812_v43  ;;  %v637_v39 = vshll.u32 %v597_v50, 8 }
  0x92   :  { %v500_v49 = vsub.s32 32, %v499_v44  ;;  %v502_v54 = vshll.u32 %v5189_v53, %v499_v44  ;;  %v505_v56 = vshll.u32 %v5183_v55, %v499_v44  ;;  %v508_v58 = vshll.u32 %v5185_v57, %v499_v44 }
  0x93   :  { %v511_v60 = vshll.u32 %v5187_v59, %v499_v44  ;;  %v514_v1 = vshll.u32 %v5193_v0, %v499_v44  ;;  %vm517_vm1 = vcmp.lt.s32.totalorder %v498_v46, 1  ;;  %vm519_vm2 = vcmp.lt.s32.totalorder %v498_v46, 3 }
  0x94   :  { %v503_v61 = vshrl.u32 %v5183_v55, %v500_v49  ;;  %v506_v62 = vshrl.u32 %v5185_v57, %v500_v49  ;;  %v509_v63 = vshrl.u32 %v5187_v59, %v500_v49  ;;  %v501_v2 = vshrl.u32 %v5189_v53, %v500_v49 }
  0x95   :  { %v512_v3 = vshrl.u32 %v5193_v0, %v500_v49  ;;  %v515_v5 = vshrl.u32 %v5191_v4, %v500_v49  ;;  %vm520_vm3 = vcmp.lt.s32.totalorder %v498_v46, 4  ;;  %vm600_vm4 = vcmp.gt.s32.totalorder %v599_v51, 0 }
  0x96   :  { %v504_v6 = vor.u32 %v503_v61, %v502_v54  ;;  %v507_v7 = vor.u32 %v506_v62, %v505_v56  ;;  %v510_v8 = vor.u32 %v509_v63, %v508_v58  ;;  %v601_v20 = vsel %vm600_vm4, %v599_v51, 0 }
  0x97   :  { %v513_v9 = vor.u32 %v512_v3, %v511_v60  ;;  %v516_v10 = vor.u32 %v515_v5, %v514_v1  ;;  %vm518_vm5 = vcmp.lt.s32.totalorder %v498_v46, 2  ;;  %v603_v31 = vand.u32 31, %v601_v20 }
  0x98   :  { %v521_v11 = vsel %vm517_vm1, %v501_v2, %v504_v6  ;;  %v522_v12 = vsel %vm520_vm3, %v510_v8, 2102212464  ;;  %v525_v13 = vsel %vm517_vm1, %v504_v6, %v507_v7  ;;  %v529_v14 = vsel %vm517_vm1, %v507_v7, %v510_v8 }
  0x99   :  { %v523_v15 = vsel %vm519_vm2, %v507_v7, %v522_v12  ;;  %v526_v16 = vsel %vm520_vm3, %v513_v9, 920167782  ;;  %v530_v19 = vsel %vm520_vm3, %v516_v10, 1326507024  ;;  %v602_v37 = vshrl.u32 %v601_v20, 5 }
  0x9a   :  { %v527_v21 = vsel %vm519_vm2, %v510_v8, %v526_v16  ;;  %v531_v23 = vsel %vm519_vm2, %v513_v9, %v530_v19  ;;  %v524_v25 = vsel %vm518_vm5, %v521_v11, %v523_v15  ;;  %v604_v38 = vsub.s32 32, %v603_v31 }
  0x9b   :  { %v528_v26 = vsel %vm518_vm5, %v525_v13, %v527_v21  ;;  %v532_v27 = vsel %vm518_vm5, %v529_v14, %v531_v23  ;;  %v540_v41 = vmul.u32 %v533_v24, %v524_v25  ;;  %v606_v42 = vshll.u32 %v5189_v53, %v603_v31 }
  0x9c   :  { %v3470_v33 = vmul.u32.u64.low %v533_v24, %v532_v27  ;;  %v3471_v34 = vmul.u32.u64.high %v533_v24, %v532_v27, %v3470_v33  ;;  %v3473_v35 = vmul.u32.u64.low %v533_v24, %v528_v26  ;;  %v3474_v36 = vmul.u32.u64.high %v533_v24, %v528_v26, %v3473_v35 }
  0x9d   :  { %v609_v43 = vshll.u32 %v5183_v55, %v603_v31  ;;  %v612_v44 = vshll.u32 %v5185_v57, %v603_v31  ;;  %v607_v45 = vshrl.u32 %v5183_v55, %v604_v38  ;;  %v610_v46 = vshrl.u32 %v5185_v57, %v604_v38 }
  0x9e   :  { %v613_v49 = vshrl.u32 %v5187_v59, %v604_v38  ;;  %v615_v51 = vshll.u32 %v5187_v59, %v603_v31  ;;  %vm542_vm6 = vc.u32 %v3471_v34, %v3473_v35  ;;  %v543_v50 = vadd.s32 1, %v3474_v36 }
  0x9f   :  { %v616_v54 = vshrl.u32 %v5193_v0, %v604_v38  ;;  %v618_v56 = vshll.u32 %v5193_v0, %v603_v31  ;;  %v608_v58 = vor.u32 %v607_v45, %v606_v42  ;;  %v611_v60 = vor.u32 %v610_v46, %v609_v43 }
  0xa0   :  { %v614_v61 = vor.u32 %v613_v49, %v612_v44  ;;  %v619_v62 = vshrl.u32 %v5191_v4, %v604_v38  ;;  %v544_v63 = vsel %vm542_vm6, %v543_v50, %v3474_v36  ;;  %vm621_vm7 = vcmp.lt.s32.totalorder %v602_v37, 1 }
  0xa1   :  { %v617_v1 = vor.u32 %v616_v54, %v615_v51  ;;  %vm624_vm8 = vcmp.lt.s32.totalorder %v602_v37, 4  ;;  %v545_v2 = vadd.s32 %v544_v63, %v540_v41  ;;  %v605_v3 = vshrl.u32 %v5189_v53, %v604_v38 }
  0xa2   :  { %v620_v5 = vor.u32 %v619_v62, %v618_v56  ;;  %v626_v6 = vsel %vm624_vm8, %v614_v61, 2102212464  ;;  %vm623_vm9 = vcmp.lt.s32.totalorder %v602_v37, 3  ;;  %v629_v7 = vsel %vm621_vm7, %v608_v58, %v611_v60 }
  0xa3   :  { %v630_v8 = vsel %vm624_vm8, %v617_v1, 920167782  ;;  %v633_v9 = vsel %vm621_vm7, %v611_v60, %v614_v61  ;;  %v546_v10 = vadd.s32 536870912, %v545_v2  ;;  %vm622_vm10 = vcmp.lt.s32.totalorder %v602_v37, 2 }
  0xa4   :  { %v631_v11 = vsel %vm623_vm9, %v614_v61, %v630_v8  ;;  %v634_v12 = vsel %vm624_vm8, %v620_v5, 1326507024  ;;  %v625_v13 = vsel %vm621_vm7, %v605_v3, %v608_v58  ;;  %v627_v14 = vsel %vm623_vm9, %v611_v60, %v626_v6 }
  0xa5   :  { %v632_v15 = vsel %vm622_vm10, %v629_v7, %v631_v11  ;;  %v635_v16 = vsel %vm623_vm9, %v617_v1, %v634_v12  ;;  %v3493_v19 = vshrl.u32 %v546_v10, 30  ;;  %v801_v26 = vshrl.u32 %v800_v40, 23  ;;  %v175_v40 = vpop.permute.xlu0 %174 }
  0xa6   :  { %v636_v20 = vsel %vm622_vm10, %v633_v9, %v635_v16  ;;  %v3495_v21 = vmul.u32.u64.low %v637_v39, %v632_v15  ;;  %v3496_v23 = vmul.u32.u64.high %v637_v39, %v632_v15, %v3495_v21  ;;  %v628_v31 = vsel %vm622_vm10, %v625_v13, %v627_v14 }
  0xa7   :  { %5240 = vst [vmem:[#allocation4_spill] sm:$0xff] %v3493_v19  ;;  %v3499_v24 = vmul.u32.u64.low %v637_v39, %v636_v20  ;;  %v3500_v25 = vmul.u32.u64.high %v637_v39, %v636_v20, %v3499_v24  ;;  %v548_v27 = vshll.u32 %v3493_v19, 30  ;;  %v2800_v33 = vadd.s32 4294967169, %v3451_v47  ;;  %v190_v20 = vpop.permute.xlu1 %189 }
  0xa8   :  { %v3506_v36 = vadd.f32 %v3427_v18, %v3454_v48  ;;  %v2820_v37 = vadd.s32 4294967169, %v801_v26  ;;  %v647_v41 = vadd.s32 1, %v3496_v23  ;;  %v644_v42 = vmul.u32 %v637_v39, %v628_v31 }
  0xa9   :  { %v3508_v38 = vsub.s32 %v545_v2, %v548_v27  ;;  %vm646_vm11 = vc.u32 %v3500_v25, %v3495_v21  ;;  %v287_v47 = vadd.s32 1, %v2800_v33  ;;  %v5177_v51 = vand.u32 2147483647, %v3457_v52 }
  0xaa   :  { %v807_v43 = vadd.s32 1, %v2820_v37  ;;  %v648_v45 = vsel %vm646_vm11, %v647_v41, %v3496_v23  ;;  %v384_v48 = vand.u32 2139095040, %v3506_v36  ;;  %v242_v39 = vmul.f32 %v3422_v17, %v175_v40 }
  0xab   :  { %v551_v44 = vsub.s32 0, %v3508_v38  ;;  %v649_v46 = vadd.s32 %v648_v45, %v644_v42  ;;  %vm288_vm13 = vcmp.gt.s32.totalorder %v287_v47, 0  ;;  %v804_v63 = vand.u32 8388607, %v5177_v51 }
  0xac   :  { %vm808_vm12 = vcmp.gt.s32.totalorder %v807_v43, 0  ;;  %v385_v61 = vshrl.u32 %v384_v48, 23  ;;  %v3525_v3 = vadd.f32 %v3427_v18, %v242_v39  ;;  %v289_v37 = vsel %vm288_vm13, %v287_v47, 0 }
  0xad   :  { %v2809_v49 = vmin.u32 %v551_v44, %v3508_v38  ;;  %v809_v50 = vsel %vm808_vm12, %v807_v43, 0  ;;  %v650_v54 = vadd.s32 536870912, %v649_v46  ;;  %v805_v23 = vor.u32 8388608, %v804_v63 }
  0xae   :  { %v811_v56 = vand.u32 31, %v809_v50  ;;  %v810_v1 = vshrl.u32 %v809_v50, 5  ;;  %5242 = vst [vmem:[#allocation6_spill] sm:$0xff] %v3525_v3  ;;  %v696_v24 = vand.u32 2139095040, %v3525_v3  ;;  %v2804_v41 = vadd.s32 4294967169, %v385_v61 }
  0xaf   :  { %v553_v58 = vclz %v2809_v49  ;;  %v3519_v60 = vshrl.u32 %v650_v54, 30  ;;  %v245_v42 = vmul.f32 %v3422_v17, %v190_v20  ;;  %v845_v45 = vshll.u32 %v805_v23, 8 }
  0xb0   :  { %v812_v62 = vsub.s32 32, %v811_v56  ;;  %v814_v2 = vshll.u32 %v5189_v53, %v811_v56  ;;  %v817_v7 = vshll.u32 %v5183_v55, %v811_v56  ;;  %v820_v10 = vshll.u32 %v5185_v57, %v811_v56 }
  0xb1   :  { %5241 = vst [vmem:[#allocation5_spill] sm:$0xff] %v3519_v60  ;;  %v652_v5 = vshll.u32 %v3519_v60, 30  ;;  %v2810_v9 = vadd.s32 4294967294, %v553_v58  ;;  %v823_v15 = vshll.u32 %v5187_v59, %v811_v56  ;;  %v826_v33 = vshll.u32 %v5193_v0, %v811_v56 }
  0xb2   :  { %v815_v6 = vshrl.u32 %v5183_v55, %v812_v62  ;;  %v818_v8 = vshrl.u32 %v5185_v57, %v812_v62  ;;  %v821_v11 = vshrl.u32 %v5187_v59, %v812_v62  ;;  %v824_v12 = vshrl.u32 %v5193_v0, %v812_v62 }
  0xb3   :  { %v827_v16 = vshrl.u32 %v5191_v4, %v812_v62  ;;  %v3537_v26 = vsub.s32 %v649_v46, %v652_v5  ;;  %vm829_vm14 = vcmp.lt.s32.totalorder %v810_v1, 1  ;;  %vm2811_vm15 = vcmp.lt.s32.totalorder %v2810_v9, 0 }
  0xb4   :  { %v816_v13 = vor.u32 %v815_v6, %v814_v2  ;;  %v819_v14 = vor.u32 %v818_v8, %v817_v7  ;;  %v822_v27 = vor.u32 %v821_v11, %v820_v10  ;;  %v825_v31 = vor.u32 %v824_v12, %v823_v15  ;;  %v185_v12 = vpop.permute.xlu0 %184 }
  0xb5   :  { %v828_v43 = vor.u32 %v827_v16, %v826_v33  ;;  %vm832_vm0 = vcmp.lt.s32.totalorder %v810_v1, 4  ;;  %vm831_vm1 = vcmp.lt.s32.totalorder %v810_v1, 3  ;;  %v697_v46 = vshrl.u32 %v696_v24, 23 }
  0xb6   :  { %v837_v40 = vsel %vm829_vm14, %v816_v13, %v819_v14  ;;  %v838_v44 = vsel %vm832_vm0, %v825_v31, 920167782  ;;  %v655_v48 = vsub.s32 0, %v3537_v26  ;;  %vm830_vm2 = vcmp.lt.s32.totalorder %v810_v1, 2 }
  0xb7   :  { %v834_v49 = vsel %vm832_vm0, %v822_v27, 2102212464  ;;  %v839_v50 = vsel %vm831_vm1, %v822_v27, %v838_v44  ;;  %v3545_v47 = vsel %vm2811_vm15, 0, %v2810_v9  ;;  %v813_v39 = vshrl.u32 %v5189_v53, %v812_v62 }
  0xb8   :  { %v840_v54 = vsel %vm830_vm2, %v837_v40, %v839_v50  ;;  %v841_v56 = vsel %vm829_vm14, %v819_v14, %v822_v27  ;;  %v391_v58 = vadd.s32 1, %v2804_v41  ;;  %v842_v61 = vsel %vm832_vm0, %v828_v43, 1326507024 }
  0xb9   :  { %v3550_v63 = vmul.u32.u64.low %v845_v45, %v840_v54  ;;  %v3551_v2 = vmul.u32.u64.high %v845_v45, %v840_v54, %v3550_v63  ;;  %v833_v5 = vsel %vm829_vm14, %v813_v39, %v816_v13  ;;  %v835_v6 = vsel %vm831_vm1, %v819_v14, %v834_v49 }
  0xba   :  { %v843_v7 = vsel %vm831_vm1, %v825_v31, %v842_v61  ;;  %v2816_v8 = vadd.s32 4294967169, %v697_v46  ;;  %v561_v9 = vsub.s32 4294967266, %v3545_v47  ;;  %v2813_v62 = vmin.u32 %v655_v48, %v3537_v26 }
  0xbb   :  { %v844_v10 = vsel %vm830_vm2, %v841_v56, %v843_v7  ;;  %v5178_v11 = vand.u32 2147483647, %v3525_v3  ;;  %v3565_v20 = vadd.f32 %v3427_v18, %v245_v42  ;;  %v836_v13 = vsel %vm830_vm2, %v833_v5, %v835_v6 }
  0xbc   :  { %v3561_v15 = vmul.u32.u64.low %v845_v45, %v844_v10  ;;  %v3562_v16 = vmul.u32.u64.high %v845_v45, %v844_v10, %v3561_v15  ;;  %v855_v14 = vadd.s32 1, %v3551_v2  ;;  %v3569_v23 = vshrl.u32 %v289_v37, 5 }
  0xbd   :  { %5243 = vst [vmem:[#allocation7_spill] sm:$0xff] %v3565_v20  ;;  %vm392_vm3 = vcmp.gt.s32.totalorder %v391_v58, 0  ;;  %v703_v24 = vadd.s32 1, %v2816_v8  ;;  %v244_v27 = vmul.f32 %v3422_v17, %v185_v12  ;;  %v557_v31 = vsub.s32 32, %v3545_v47 }
  0xbe   :  { %v3573_v33 = vadd.s32 127, %v561_v9  ;;  %v657_v41 = vclz %v2813_v62  ;;  %v700_v43 = vand.u32 8388607, %v5178_v11  ;;  %v852_v42 = vmul.u32 %v845_v45, %v836_v13 }
  0xbf   :  { %vm854_vm4 = vc.u32 %v3562_v16, %v3550_v63  ;;  %vm704_vm5 = vcmp.gt.s32.totalorder %v703_v24, 0  ;;  %v1008_v1 = vand.u32 2139095040, %v3565_v20  ;;  %v541_v40 = vadd.s32 %v3473_v35, %v3471_v34 }
  0xc0   :  { %v3582_v44 = vand.u32 31, %v289_v37  ;;  %v856_v46 = vsel %vm854_vm4, %v855_v14, %v3551_v2  ;;  %v705_v48 = vsel %vm704_vm5, %v703_v24, 0  ;;  %v3586_v49 = vsel %vm392_vm3, %v391_v58, 0 }
  0xc1   :  { %v857_v50 = vadd.s32 %v856_v46, %v852_v42  ;;  %v707_v39 = vand.u32 31, %v705_v48  ;;  %v3589_v45 = vadd.f32 %v3427_v18, %v244_v27  ;;  %v3591_v54 = vshrl.u32 %v541_v40, %v557_v31 }
  0xc2   :  { %v563_v56 = vshll.u32 %v3573_v33, 23  ;;  %v701_v61 = vor.u32 8388608, %v700_v43  ;;  %v5180_v34 = vand.u32 2147483647, %v3565_v20  ;;  %v2814_v35 = vadd.s32 4294967294, %v657_v41 }
  0xc3   :  { %v858_v37 = vadd.s32 536870912, %v857_v50  ;;  %v708_v5 = vsub.s32 32, %v707_v39  ;;  %v1009_v2 = vshrl.u32 %v1008_v1, 23  ;;  %v706_v6 = vshrl.u32 %v705_v48, 5 }
  0xc4   :  { %v710_v58 = vshll.u32 %v5189_v53, %v707_v39  ;;  %v713_v7 = vshll.u32 %v5183_v55, %v707_v39  ;;  %v716_v8 = vshll.u32 %v5185_v57, %v707_v39  ;;  %v719_v12 = vshll.u32 %v5187_v59, %v707_v39 }
  0xc5   :  { %v3598_v9 = vshrl.u32 %v858_v37, 30  ;;  %v711_v62 = vshrl.u32 %v5183_v55, %v708_v5  ;;  %v714_v10 = vshrl.u32 %v5185_v57, %v708_v5  ;;  %v717_v15 = vshrl.u32 %v5187_v59, %v708_v5 }
  0xc6   :  { %v720_v13 = vshrl.u32 %v5193_v0, %v708_v5  ;;  %v722_v14 = vshll.u32 %v5193_v0, %v707_v39  ;;  %v723_v24 = vshrl.u32 %v5191_v4, %v708_v5  ;;  %vm2815_vm6 = vcmp.lt.s32.totalorder %v2814_v35, 0 }
  0xc7   :  { %5244 = vst [vmem:[#allocation8_spill] sm:$0xff] %v3598_v9  ;;  %v860_v27 = vshll.u32 %v3598_v9, 30  ;;  %v712_v31 = vor.u32 %v711_v62, %v710_v58  ;;  %v715_v41 = vor.u32 %v714_v10, %v713_v7  ;;  %v718_v43 = vor.u32 %v717_v15, %v716_v8 }
  0xc8   :  { %v721_v42 = vor.u32 %v720_v13, %v719_v12  ;;  %v724_v1 = vor.u32 %v723_v24, %v722_v14  ;;  %v2828_v40 = vadd.s32 4294967169, %v1009_v2  ;;  %vm725_vm7 = vcmp.lt.s32.totalorder %v706_v6, 1 }
  0xc9   :  { %v3608_v46 = vsub.s32 %v857_v50, %v860_v27  ;;  %vm728_vm8 = vcmp.lt.s32.totalorder %v706_v6, 4  ;;  %v741_v48 = vshll.u32 %v701_v61, 8  ;;  %v3610_v37 = vsel %vm2815_vm6, 0, %v2814_v35 }
  0xca   :  { %v709_v39 = vshrl.u32 %v5189_v53, %v708_v5  ;;  %v730_v51 = vsel %vm728_vm8, %v718_v43, 2102212464  ;;  %v733_v11 = vsel %vm725_vm7, %v712_v31, %v715_v41  ;;  %vm726_vm9 = vcmp.lt.s32.totalorder %v706_v6, 2 }
  0xcb   :  { %vm727_vm10 = vcmp.lt.s32.totalorder %v706_v6, 3  ;;  %v734_v32 = vsel %vm728_vm8, %v721_v42, 920167782  ;;  %v737_v58 = vsel %vm725_vm7, %v715_v41, %v718_v43  ;;  %v738_v62 = vsel %vm728_vm8, %v724_v1, 1326507024 }
  0xcc   :  { %v729_v7 = vsel %vm725_vm7, %v709_v39, %v712_v31  ;;  %v735_v8 = vsel %vm727_vm10, %v718_v43, %v734_v32  ;;  %v1015_v10 = vadd.s32 1, %v2828_v40  ;;  %v863_v50 = vsub.s32 0, %v3608_v46 }
  0xcd   :  { %v731_v2 = vsel %vm727_vm10, %v715_v41, %v730_v51  ;;  %v736_v12 = vsel %vm726_vm9, %v733_v11, %v735_v8  ;;  %v739_v61 = vsel %vm727_vm10, %v721_v42, %v738_v62  ;;  %v665_v13 = vsub.s32 4294967266, %v3610_v37 }
  0xce   :  { %v740_v35 = vsel %vm726_vm9, %v737_v58, %v739_v61  ;;  %v3616_v15 = vmul.u32.u64.low %v741_v48, %v736_v12  ;;  %v3617_v5 = vmul.u32.u64.high %v741_v48, %v736_v12, %v3616_v15  ;;  %vm1016_vm11 = vcmp.gt.s32.totalorder %v1015_v10, 0 }
  0xcf   :  { %v3621_v14 = vmul.u32.u64.low %v741_v48, %v740_v35  ;;  %v3622_v24 = vmul.u32.u64.high %v741_v48, %v740_v35, %v3621_v14  ;;  %v1017_v32 = vsel %vm1016_vm11, %v1015_v10, 0  ;;  %v558_v27 = vshll.u32 %v3508_v38, %v3545_v47 }
  0xd0   :  { %v732_v51 = vsel %vm726_vm9, %v729_v7, %v731_v2  ;;  %v1012_v11 = vand.u32 8388607, %v5180_v34  ;;  %v1019_v31 = vand.u32 31, %v1017_v32  ;;  %v3630_v41 = vsub.s32 32, %v3582_v44 }
  0xd1   :  { %v645_v43 = vadd.s32 %v3495_v21, %v3500_v25  ;;  %v3635_v42 = vshrl.u32 %v3586_v49, 5  ;;  %v2821_v1 = vmin.u32 %v863_v50, %v3608_v46  ;;  %v3639_v40 = vor.u32 %v3591_v54, %v558_v27 }
  0xd2   :  { %v3643_v38 = vor.u32 4788187, %v563_v56  ;;  %v751_v47 = vadd.s32 1, %v3617_v5  ;;  %v1020_v6 = vsub.s32 32, %v1019_v31  ;;  %v661_v39 = vsub.s32 32, %v3610_v37 }
  0xd3   :  { %5245 = vst [vmem:[#allocation9_spill] sm:$0xff] %v3635_v42  ;;  %v3647_v58 = vadd.s32 127, %v665_v13  ;;  %v748_v21 = vmul.u32 %v741_v48, %v732_v51  ;;  %vm750_vm12 = vc.u32 %v3622_v24, %v3616_v15  ;;  %v1013_v7 = vor.u32 8388608, %v1012_v11 }
  0xd4   :  { %v752_v25 = vsel %vm750_vm12, %v751_v47, %v3617_v5  ;;  %v1023_v54 = vshrl.u32 %v5183_v55, %v1020_v6  ;;  %v904_v33 = vand.u32 2139095040, %v3589_v45  ;;  %v865_v56 = vclz %v2821_v1 }
  0xd5   :  { %v753_v8 = vadd.s32 %v752_v25, %v748_v21  ;;  %v1018_v62 = vshrl.u32 %v1017_v32, 5  ;;  %v1022_v10 = vshll.u32 %v5189_v53, %v1019_v31  ;;  %v1025_v50 = vshll.u32 %v5183_v55, %v1019_v31 }
  0xd6   :  { %v1026_v2 = vshrl.u32 %v5185_v57, %v1020_v6  ;;  %v1028_v48 = vshll.u32 %v5185_v57, %v1019_v31  ;;  %v1029_v12 = vshrl.u32 %v5187_v59, %v1020_v6  ;;  %v1031_v5 = vshll.u32 %v5187_v59, %v1019_v31 }
  0xd7   :  { %v754_v61 = vadd.s32 536870912, %v753_v8  ;;  %v1024_v35 = vor.u32 %v1023_v54, %v1022_v10  ;;  %v1032_v13 = vshrl.u32 %v5193_v0, %v1020_v6  ;;  %v1034_v32 = vshll.u32 %v5193_v0, %v1019_v31 }
  0xd8   :  { %v1027_v14 = vor.u32 %v1026_v2, %v1025_v50  ;;  %v1030_v27 = vor.u32 %v1029_v12, %v1028_v48  ;;  %v1035_v51 = vshrl.u32 %v5191_v4, %v1020_v6  ;;  %v662_v11 = vshll.u32 %v3537_v26, %v3610_v37 }
  0xd9   :  { %v663_v1 = vshrl.u32 %v645_v43, %v661_v39  ;;  %v3665_v47 = vshrl.u32 %v754_v61, 30  ;;  %v1033_v21 = vor.u32 %v1032_v13, %v1031_v5  ;;  %v667_v25 = vshll.u32 %v3647_v58, 23 }
  0xda   :  { %v2822_v54 = vadd.s32 4294967294, %v865_v56  ;;  %v1036_v10 = vor.u32 %v1035_v51, %v1034_v32  ;;  %v1053_v34 = vshll.u32 %v1013_v7, 8  ;;  %vm1037_vm13 = vcmp.lt.s32.totalorder %v1018_v62, 1 }
  0xdb   :  { %5246 = vst [vmem:[#allocation10_spill] sm:$0xff] %v3665_v47  ;;  %v756_v28 = vshll.u32 %v3665_v47, 30  ;;  %vm1040_vm14 = vcmp.lt.s32.totalorder %v1018_v62, 4  ;;  %v905_v50 = vshrl.u32 %v904_v33, 23  ;;  %vm1039_vm15 = vcmp.lt.s32.totalorder %v1018_v62, 3 }
  0xdc   :  { %v1042_v31 = vsel %vm1040_vm14, %v1030_v27, 2102212464  ;;  %v1045_v2 = vsel %vm1037_vm13, %v1024_v35, %v1027_v14  ;;  %v1046_v48 = vsel %vm1040_vm14, %v1033_v21, 920167782  ;;  %v1021_v37 = vshrl.u32 %v5189_v53, %v1020_v6 }
  0xdd   :  { %v3670_v26 = vsub.s32 %v753_v8, %v756_v28  ;;  %vm1038_vm0 = vcmp.lt.s32.totalorder %v1018_v62, 2  ;;  %v1047_v43 = vsel %vm1039_vm15, %v1030_v27, %v1046_v48  ;;  %vm2823_vm1 = vcmp.lt.s32.totalorder %v2822_v54, 0  ;;  %v200_v48 = vpop.permute.xlu1 %199 }
  0xde   :  { %v1048_v39 = vsel %vm1038_vm0, %v1045_v2, %v1047_v43  ;;  %v1049_v58 = vsel %vm1037_vm13, %v1027_v14, %v1030_v27  ;;  %v1050_v7 = vsel %vm1040_vm14, %v1036_v10, 1326507024  ;;  %v1041_v33 = vsel %vm1037_vm13, %v1021_v37, %v1024_v35 }
  0xdf   :  { %v759_v56 = vsub.s32 0, %v3670_v26  ;;  %v1043_v12 = vsel %vm1039_vm15, %v1027_v14, %v1042_v31  ;;  %v1051_v61 = vsel %vm1039_vm15, %v1033_v21, %v1050_v7  ;;  %v2824_v6 = vadd.s32 4294967169, %v905_v50 }
  0xe0   :  { %v1052_v5 = vsel %vm1038_vm0, %v1049_v58, %v1051_v61  ;;  %v3678_v28 = vmul.u32.u64.low %v1053_v34, %v1048_v39  ;;  %v3679_v8 = vmul.u32.u64.high %v1053_v34, %v1048_v39, %v3678_v28  ;;  %v3682_v13 = vsel %vm2823_vm1, 0, %v2822_v54  ;;  %v195_v58 = vpop.permute.xlu0 %194 }
  0xe1   :  { %v2817_v32 = vmin.u32 %v759_v56, %v3670_v26  ;;  %v3685_v51 = vmul.u32.u64.low %v1053_v34, %v1052_v5  ;;  %v3686_v27 = vmul.u32.u64.high %v1053_v34, %v1052_v5, %v3685_v51  ;;  %v3689_v10 = vand.u32 31, %v3586_v49 }
  0xe2   :  { %v1044_v35 = vsel %vm1038_vm0, %v1041_v33, %v1043_v12  ;;  %v5182_v14 = vand.u32 2147483647, %v3589_v45  ;;  %v911_v21 = vadd.s32 1, %v2824_v6  ;;  %v565_v31 = vand.u32 2147483647, %v3643_v38 }
  0xe3   :  { %v567_v2 = vcvt.s32.f32 %v3639_v40  ;;  %v3695_v50 = vor.u32 %v663_v1, %v662_v11  ;;  %v3697_v54 = vor.u32 4788187, %v667_v25  ;;  %v869_v37 = vsub.s32 32, %v3682_v13 }
  0xe4   :  { %v873_v43 = vsub.s32 4294967266, %v3682_v13  ;;  %v1063_v49 = vadd.s32 1, %v3679_v8  ;;  %vm912_vm2 = vcmp.gt.s32.totalorder %v911_v21, 0  ;;  %v761_v62 = vclz %v2817_v32 }
  0xe5   :  { %v1060_v39 = vmul.u32 %v1053_v34, %v1044_v35  ;;  %vm1062_vm3 = vc.u32 %v3686_v27, %v3678_v28  ;;  %v913_v38 = vsel %vm912_vm2, %v911_v21, 0  ;;  %v908_v11 = vand.u32 8388607, %v5182_v14 }
  0xe6   :  { %v1064_v40 = vsel %vm1062_vm3, %v1063_v49, %v3679_v8  ;;  %v915_v1 = vand.u32 31, %v913_v38  ;;  %v247_v25 = vmul.f32 %v3422_v17, %v200_v48  ;;  %v3708_v7 = vmul.f32 %v567_v2, %v565_v31 }
  0xe7   :  { %v3711_v56 = vsub.s32 32, %v3689_v10  ;;  %v853_v34 = vadd.s32 %v3550_v63, %v3562_v16  ;;  %v1065_v33 = vadd.s32 %v1064_v40, %v1060_v39  ;;  %v3718_v8 = vmul.f32 %v3422_v17, %v195_v58 }
  0xe8   :  { %v916_v5 = vsub.s32 32, %v915_v1  ;;  %v3722_v32 = vadd.s32 127, %v873_v43  ;;  %v2818_v51 = vadd.s32 4294967294, %v761_v62  ;;  %v909_v21 = vor.u32 8388608, %v908_v11 }
  0xe9   :  { %v3720_v6 = vshrl.u32 %v853_v34, %v869_v37  ;;  %v1066_v35 = vadd.s32 536870912, %v1065_v33  ;;  %v3727_v16 = vadd.f32 %v3427_v18, %v247_v25  ;;  %v918_v48 = vshll.u32 %v5189_v53, %v915_v1 }
  0xea   :  { %v919_v31 = vshrl.u32 %v5183_v55, %v916_v5  ;;  %v922_v63 = vshrl.u32 %v5185_v57, %v916_v5  ;;  %v921_v49 = vshll.u32 %v5183_v55, %v915_v1  ;;  %v925_v37 = vshrl.u32 %v5187_v59, %v916_v5 }
  0xeb   :  { %v3729_v2 = vshrl.u32 %v1066_v35, 30  ;;  %v914_v43 = vshrl.u32 %v913_v38, 5  ;;  %v924_v62 = vshll.u32 %v5185_v57, %v915_v1  ;;  %v927_v39 = vshll.u32 %v5187_v59, %v915_v1 }
  0xec   :  { %v928_v58 = vshrl.u32 %v5193_v0, %v916_v5  ;;  %vm2819_vm4 = vcmp.lt.s32.totalorder %v2818_v51, 0  ;;  %v920_v11 = vor.u32 %v919_v31, %v918_v48  ;;  %v923_v25 = vor.u32 %v922_v63, %v921_v49 }
  0xed   :  { %5247 = vst [vmem:[#allocation11_spill] sm:$0xff] %v3729_v2  ;;  %v1068_v40 = vshll.u32 %v3729_v2, 30  ;;  %v926_v34 = vor.u32 %v925_v37, %v924_v62  ;;  %v930_v14 = vshll.u32 %v5193_v0, %v915_v1  ;;  %v931_v55 = vshrl.u32 %v5191_v4, %v916_v5 }
  0xee   :  { %v929_v35 = vor.u32 %v928_v58, %v927_v39  ;;  %v875_v61 = vshll.u32 %v3722_v32, 23  ;;  %v949_v57 = vshll.u32 %v909_v21, 8  ;;  %v3744_v12 = vsel %vm2819_vm4, 0, %v2818_v51 }
  0xef   :  { %v3741_v38 = vsub.s32 %v1065_v33, %v1068_v40  ;;  %v932_v53 = vor.u32 %v931_v55, %v930_v14  ;;  %vm933_vm5 = vcmp.lt.s32.totalorder %v914_v43, 1  ;;  %v1216_v31 = vand.u32 2139095040, %v3727_v16 }
  0xf0   :  { %vm935_vm6 = vcmp.lt.s32.totalorder %v914_v43, 3  ;;  %vm936_vm7 = vcmp.lt.s32.totalorder %v914_v43, 4  ;;  %v941_v1 = vsel %vm933_vm5, %v920_v11, %v923_v25  ;;  %v945_v33 = vsel %vm933_vm5, %v923_v25, %v926_v34 }
  0xf1   :  { %v1071_v63 = vsub.s32 0, %v3741_v38  ;;  %v938_v48 = vsel %vm936_vm7, %v926_v34, 2102212464  ;;  %v942_v49 = vsel %vm936_vm7, %v929_v35, 920167782  ;;  %v769_v21 = vsub.s32 4294967266, %v3744_v12 }
  0xf2   :  { %v946_v32 = vsel %vm936_vm7, %v932_v53, 1326507024  ;;  %v5248_v37 = vmov 683565275   ;;  %vm934_vm8 = vcmp.lt.s32.totalorder %v914_v43, 2  ;;  %v943_v55 = vsel %vm935_vm6, %v926_v34, %v942_v49 }
  0xf3   :  { %v917_v51 = vshrl.u32 %v5248_v37, %v916_v5  ;;  %vm487_vm9 = vcmp.lt.s32.totalorder %v3431_v22, 0  ;;  %v2829_v14 = vmin.u32 %v1071_v63, %v3741_v38  ;;  %v944_v62 = vsel %vm934_vm8, %v941_v1, %v943_v55 }
  0xf4   :  { %v947_v39 = vsel %vm935_vm6, %v929_v35, %v946_v32  ;;  %v1217_v58 = vshrl.u32 %v1216_v31, 23  ;;  %v765_v40 = vsub.s32 32, %v3744_v12  ;;  %v939_v4 = vsel %vm935_vm6, %v923_v25, %v938_v48 }
  0xf5   :  { %v937_v53 = vsel %vm933_vm5, %v917_v51, %v920_v11  ;;  %v948_v5 = vsel %vm934_vm8, %v945_v33, %v947_v39  ;;  %v3764_v34 = vmul.u32.u64.low %v949_v57, %v944_v62  ;;  %v3765_v49 = vmul.u32.u64.high %v949_v57, %v944_v62, %v3764_v34  ;;  %v205_v39 = vpop.permute.xlu0 %204 }
  0xf6   :  { %v3761_v0 = vmul.u32.u64.low %v949_v57, %v948_v5  ;;  %v3762_v59 = vmul.u32.u64.high %v949_v57, %v948_v5, %v3761_v0  ;;  %v870_v63 = vshll.u32 %v3608_v46, %v3682_v13  ;;  %v770_v35 = vadd.s32 127, %v769_v21 }
  0xf7   :  { %v2836_v31 = vadd.s32 4294967169, %v1217_v58  ;;  %v5249_v1 = vand.u32 2147483647, %v3727_v16  ;;  %v749_v11 = vadd.s32 %v3616_v15, %v3622_v24  ;;  %v1073_v25 = vclz %v2829_v14 }
  0xf8   :  { %v940_v48 = vsel %vm934_vm8, %v937_v53, %v939_v4  ;;  %v3777_v0 = vadd.f32 %v3427_v18, %v3718_v8  ;;  %v569_v33 = vxor.u32 2147483648, %v3708_v7  ;;  %v5250_v51 = vand.u32 2147483647, %v3697_v54  ;;  %v210_v54 = vpop.permute.xlu1 %209 }
  0xf9   :  { %v1220_v32 = vand.u32 8388607, %v5249_v1  ;;  %v5251_v46 = vcvt.s32.f32 %v3695_v50  ;;  %v3787_v21 = vor.u32 %v3720_v6, %v870_v63  ;;  %v1223_v55 = vadd.s32 1, %v2836_v31 }
  0xfa   :  { %v3789_v15 = vor.u32 4788187, %v875_v61  ;;  %v767_v24 = vshrl.u32 %v749_v11, %v765_v40  ;;  %vm958_vm10 = vc.u32 %v3762_v59, %v3764_v34  ;;  %v959_v18 = vadd.s32 1, %v3765_v49 }
  0xfb   :  { %v3784_v13 = vmul.f32 %v5251_v46, %v5250_v51  ;;  %v771_v4 = vshll.u32 %v770_v35, 23  ;;  %v956_v8 = vmul.u32 %v949_v57, %v940_v48  ;;  %v1221_v43 = vor.u32 8388608, %v1220_v32 }
  0xfc   :  { %vm1224_vm11 = vcmp.gt.s32.totalorder %v1223_v55, 0  ;;  %v2830_v50 = vadd.s32 4294967294, %v1073_v25  ;;  %v960_v14 = vsel %vm958_vm10, %v959_v18, %v3765_v49  ;;  %v1112_v6 = vand.u32 2139095040, %v3777_v0 }
  0xfd   :  { %v1225_v62 = vsel %vm1224_vm11, %v1223_v55, 0  ;;  %v3799_v61 = vsel %vm487_vm9, %v569_v33, %v3708_v7  ;;  %v766_v57 = vshll.u32 %v3670_v26, %v3744_v12  ;;  %v961_v40 = vadd.s32 %v960_v14, %v956_v8 }
  0xfe   :  { %5252 = vst [vmem:[#allocation12_spill] sm:$0xff] %v3799_v61  ;;  %v1227_v49 = vand.u32 31, %v1225_v62  ;;  %v3807_v63 = vmul.f32 %v3422_v17, %v210_v54  ;;  %v3811_v31 = vor.u32 4788187, %v771_v4  ;;  %v3814_v1 = vmul.f32 %v3422_v17, %v205_v39 }
  0xff   :  { %v3809_v35 = vor.u32 %v767_v24, %v766_v57  ;;  %v962_v7 = vadd.s32 536870912, %v961_v40  ;;  %vm2831_vm12 = vcmp.lt.s32.totalorder %v2830_v50, 0  ;;  %v3816_v26 = vshll.u32 %v1221_v43, 8 }
 0x100   :  { %v1228_v32 = vsub.s32 32, %v1227_v49  ;;  %v1113_v12 = vshrl.u32 %v1112_v6, 23  ;;  %v1226_v25 = vshrl.u32 %v1225_v62, 5  ;;  %v1230_v48 = vshll.u32 %v5248_v37, %v1227_v49 }
 0x101   :  { %v3818_v11 = vshrl.u32 %v962_v7, 30  ;;  %v5254_v33 = vmov 2475754826   ;;  %v5255_v55 = vmov 2131351028   ;;  %v3832_v5 = vsel %vm2831_vm12, 0, %v2830_v50 }
 0x102   :  { %v1233_v51 = vshll.u32 %v5254_v33, %v1227_v49  ;;  %v1231_v46 = vshrl.u32 %v5254_v33, %v1228_v32  ;;  %v1234_v24 = vshrl.u32 %v5255_v55, %v1228_v32  ;;  %v1236_v18 = vshll.u32 %v5255_v55, %v1227_v49 }
 0x103   :  { %5253 = vst [vmem:[#allocation13_spill] sm:$0xff] %v3818_v11  ;;  %v5256_v17 = vmov 2102212464   ;;  %v964_v8 = vshll.u32 %v3818_v11, 30  ;;  %v5257_v54 = vmov 920167782  }
 0x104   :  { %v1237_v4 = vshrl.u32 %v5256_v17, %v1228_v32  ;;  %v1239_v43 = vshll.u32 %v5256_v17, %v1227_v49  ;;  %v1240_v14 = vshrl.u32 %v5257_v54, %v1228_v32  ;;  %v1242_v62 = vshll.u32 %v5257_v54, %v1227_v49 }
 0x105   :  { %v1232_v6 = vor.u32 %v1231_v46, %v1230_v48  ;;  %v1235_v39 = vor.u32 %v1234_v24, %v1233_v51  ;;  %v5258_v7 = vmov 1326507024   ;;  %v3834_v53 = vsub.s32 %v961_v40, %v964_v8 }
 0x106   :  { %v1238_v57 = vor.u32 %v1237_v4, %v1236_v18  ;;  %v1243_v58 = vshrl.u32 %v5258_v7, %v1228_v32  ;;  %v1241_v2 = vor.u32 %v1240_v14, %v1239_v43  ;;  %vm1245_vm13 = vcmp.lt.s32.totalorder %v1226_v25, 1 }
 0x107   :  { %vm1248_vm14 = vcmp.lt.s32.totalorder %v1226_v25, 4  ;;  %v2832_v47 = vadd.s32 4294967169, %v1113_v12  ;;  %v967_v60 = vsub.s32 0, %v3834_v53  ;;  %v1229_v49 = vshrl.u32 %v5248_v37, %v1228_v32 }
 0x108   :  { %v1244_v11 = vor.u32 %v1243_v58, %v1242_v62  ;;  %v1250_v48 = vsel %vm1248_vm14, %v1238_v57, 2102212464  ;;  %v1253_v51 = vsel %vm1245_vm13, %v1232_v6, %v1235_v39  ;;  %vm1247_vm15 = vcmp.lt.s32.totalorder %v1226_v25, 3 }
 0x109   :  { %v1254_v46 = vsel %vm1248_vm14, %v1241_v2, 920167782  ;;  %v1257_v24 = vsel %vm1245_vm13, %v1235_v39, %v1238_v57  ;;  %v2825_v40 = vmin.u32 %v967_v60, %v3834_v53  ;;  %vm1246_vm0 = vcmp.lt.s32.totalorder %v1226_v25, 2 }
 0x10a   :  { %v1258_v50 = vsel %vm1248_vm14, %v1244_v11, 1326507024  ;;  %v1249_v18 = vsel %vm1245_vm13, %v1229_v49, %v1232_v6  ;;  %v1255_v4 = vsel %vm1247_vm15, %v1238_v57, %v1254_v46  ;;  %v1251_v8 = vsel %vm1247_vm15, %v1235_v39, %v1250_v48 }
 0x10b   :  { %v1256_v58 = vsel %vm1246_vm0, %v1253_v51, %v1255_v4  ;;  %v1259_v43 = vsel %vm1247_vm15, %v1241_v2, %v1258_v50  ;;  %v1119_v14 = vadd.s32 1, %v2832_v47  ;;  %v969_v12 = vclz %v2825_v40 }
 0x10c   :  { %v1260_v62 = vsel %vm1246_vm0, %v1257_v24, %v1259_v43  ;;  %v3841_v9 = vmul.u32.u64.low %v3816_v26, %v1256_v58  ;;  %v3842_v32 = vmul.u32.u64.high %v3816_v26, %v1256_v58, %v3841_v9  ;;  %v773_v19 = vand.u32 2147483647, %v3811_v31 }
 0x10d   :  { %v3847_v11 = vmul.u32.u64.low %v3816_v26, %v1260_v62  ;;  %v3848_v61 = vmul.u32.u64.high %v3816_v26, %v1260_v62, %v3847_v11  ;;  %vm1120_vm1 = vcmp.gt.s32.totalorder %v1119_v14, 0  ;;  %v1077_v60 = vsub.s32 32, %v3832_v5 }
 0x10e   :  { %v1081_v25 = vsub.s32 4294967266, %v3832_v5  ;;  %v1252_v2 = vsel %vm1246_vm0, %v1249_v18, %v1251_v8  ;;  %v1121_v47 = vsel %vm1120_vm1, %v1119_v14, 0  ;;  %v775_v6 = vcvt.s32.f32 %v3809_v35  ;;  %v3867_v35 = vld [vmem:[%s5166_s4] ss:$0 sm:$0xff] }
 0x10f   :  { %v2826_v39 = vadd.s32 4294967294, %v969_v12  ;;  %v5259_v57 = vand.u32 2147483647, %v3777_v0  ;;  %v1123_v48 = vand.u32 31, %v1121_v47  ;;  %v5260_v31 = vand.u32 2147483647, %v3789_v15 }
 0x110   :  { %v5261_v51 = vcvt.s32.f32 %v3787_v21  ;;  %v1061_v24 = vadd.s32 %v3678_v28, %v3686_v27  ;;  %v1271_v50 = vadd.s32 1, %v3842_v32  ;;  %v3871_v40 = vadd.f32 %v3867_v35, %v3807_v63 }
 0x111   :  { %v1116_v49 = vand.u32 8388607, %v5259_v57  ;;  %v3873_v18 = vmul.f32 %v775_v6, %v773_v19  ;;  %v1268_v21 = vmul.u32 %v3816_v26, %v1252_v2  ;;  %vm1270_vm2 = vc.u32 %v3848_v61, %v3841_v9 }
 0x112   :  { %v3859_v46 = vmul.f32 %v5261_v51, %v5260_v31  ;;  %v1124_v15 = vsub.s32 32, %v1123_v48  ;;  %v3878_v28 = vshrl.u32 %v1061_v24, %v1077_v60  ;;  %v1082_v27 = vadd.s32 127, %v1081_v25 }
 0x113   :  { %v1272_v4 = vsel %vm1270_vm2, %v1271_v50, %v3842_v32  ;;  %v3883_v8 = vadd.f32 %v3867_v35, %v3814_v1  ;;  %vm2827_vm3 = vcmp.lt.s32.totalorder %v2826_v39, 0  ;;  %v1117_v58 = vor.u32 8388608, %v1116_v49 }
 0x114   :  { %v1273_v63 = vadd.s32 %v1272_v4, %v1268_v21  ;;  %v1127_v19 = vshrl.u32 %v5254_v33, %v1124_v15  ;;  %v1126_v26 = vshll.u32 %v5248_v37, %v1123_v48  ;;  %v1129_v43 = vshll.u32 %v5254_v33, %v1123_v48 }
 0x115   :  { %v1130_v14 = vshrl.u32 %v5255_v55, %v1124_v15  ;;  %v1132_v32 = vshll.u32 %v5255_v55, %v1123_v48  ;;  %v1133_v11 = vshrl.u32 %v5256_v17, %v1124_v15  ;;  %v1424_v1 = vand.u32 2139095040, %v3871_v40 }
 0x116   :  { %v1274_v62 = vadd.s32 536870912, %v1273_v63  ;;  %v3893_v60 = vsel %vm2827_vm3, 0, %v2826_v39  ;;  %v1122_v25 = vshrl.u32 %v1121_v47, 5  ;;  %v1128_v2 = vor.u32 %v1127_v19, %v1126_v26 }
 0x117   :  { %v1131_v6 = vor.u32 %v1130_v14, %v1129_v43  ;;  %v1134_v49 = vor.u32 %v1133_v11, %v1132_v32  ;;  %v1135_v31 = vshll.u32 %v5256_v17, %v1123_v48  ;;  %v1136_v51 = vshrl.u32 %v5257_v54, %v1124_v15 }
 0x118   :  { %v3895_v57 = vshrl.u32 %v1274_v62, 30  ;;  %v1083_v24 = vshll.u32 %v1082_v27, 23  ;;  %v1138_v50 = vshll.u32 %v5257_v54, %v1123_v48  ;;  %v1139_v21 = vshrl.u32 %v5258_v7, %v1124_v15 }
 0x119   :  { %v3901_v4 = vshll.u32 %v1117_v58, 8  ;;  %vm591_vm4 = vcmp.lt.s32.totalorder %v3441_v30, 0  ;;  %v977_v47 = vsub.s32 4294967266, %v3893_v60  ;;  %v1137_v19 = vor.u32 %v1136_v51, %v1135_v31 }
 0x11a   :  { %5262 = vst [vmem:[#allocation14_spill] sm:$0xff] %v3895_v57  ;;  %v1276_v39 = vshll.u32 %v3895_v57, 30  ;;  %v1425_v26 = vshrl.u32 %v1424_v1, 23  ;;  %v1125_v43 = vshrl.u32 %v5248_v37, %v1124_v15  ;;  %v1140_v14 = vor.u32 %v1139_v21, %v1138_v50 }
 0x11b   :  { %vm1141_vm5 = vcmp.lt.s32.totalorder %v1122_v25, 1  ;;  %vm1144_vm6 = vcmp.lt.s32.totalorder %v1122_v25, 4  ;;  %vm1143_vm7 = vcmp.lt.s32.totalorder %v1122_v25, 3  ;;  %vm1142_vm8 = vcmp.lt.s32.totalorder %v1122_v25, 2 }
 0x11c   :  { %v1146_v27 = vsel %vm1144_vm6, %v1134_v49, 2102212464  ;;  %v1149_v48 = vsel %vm1141_vm5, %v1128_v2, %v1131_v6  ;;  %v1150_v62 = vsel %vm1144_vm6, %v1137_v19, 920167782  ;;  %v3907_v32 = vsub.s32 %v1273_v63, %v1276_v39 }
 0x11d   :  { %v1151_v58 = vsel %vm1143_vm7, %v1134_v49, %v1150_v62  ;;  %v1153_v11 = vsel %vm1141_vm5, %v1131_v6, %v1134_v49  ;;  %v1084_v12 = vor.u32 4788187, %v1083_v24  ;;  %v1145_v22 = vsel %vm1141_vm5, %v1125_v43, %v1128_v2 }
 0x11e   :  { %v1152_v57 = vsel %vm1142_vm8, %v1149_v48, %v1151_v58  ;;  %v1154_v31 = vsel %vm1144_vm6, %v1140_v14, 1326507024  ;;  %v1147_v1 = vsel %vm1143_vm7, %v1131_v6, %v1146_v27  ;;  %v973_v21 = vsub.s32 32, %v3893_v60  ;;  %v220_v58 = vpop.permute.xlu1 %219 }
 0x11f   :  { %v1155_v51 = vsel %vm1143_vm7, %v1137_v19, %v1154_v31  ;;  %v3911_v15 = vmul.u32.u64.low %v3901_v4, %v1152_v57  ;;  %v3912_v50 = vmul.u32.u64.high %v3901_v4, %v1152_v57, %v3911_v15  ;;  %v978_v42 = vadd.s32 127, %v977_v47  ;;  %v3198_v57 = vld [vmem:[%s5167_s6] sm:$0xff]  }
 0x120   :  { %v1156_v63 = vsel %vm1142_vm8, %v1153_v11, %v1155_v51  ;;  %v2844_v39 = vadd.s32 4294967169, %v1425_v26  ;;  %v1078_v49 = vshll.u32 %v3741_v38, %v3832_v5  ;;  %v1279_v2 = vsub.s32 0, %v3907_v32  ;;  %2979 = vmatprep.subr.bf16.mxu0 %v3198_v57 }
 0x121   :  { %v3921_v24 = vmul.u32.u64.low %v3901_v4, %v1156_v63  ;;  %v3922_v6 = vmul.u32.u64.high %v3901_v4, %v1156_v63, %v3921_v24  ;;  %v1085_v19 = vand.u32 2147483647, %v1084_v12  ;;  %v957_v47 = vadd.s32 %v3764_v34, %v3762_v59  ;;  %2980 = vmatpush3.bf16.msra.mxu0 %v3198_v57 }
 0x122   :  { %v1148_v43 = vsel %vm1142_vm8, %v1145_v22, %v1147_v1  ;;  %v1431_v26 = vadd.s32 1, %v2844_v39  ;;  %v5263_v38 = vxor.u32 2147483648, %v3784_v13  ;;  %v1080_v27 = vor.u32 %v3878_v28, %v1078_v49  ;;  %v3199_v28 = vld [vmem:[%s5167_s6 + $0x8] sm:$0xff]   ;;  %v3960_v24 = vld [vmem:[%s5165_s3] ss:$0 sm:$0xff] }
 0x123   :  { %v1167_v48 = vadd.s32 1, %v3912_v50  ;;  %v975_v12 = vshrl.u32 %v957_v47, %v973_v21  ;;  %v979_v62 = vshll.u32 %v978_v42, 23  ;;  %v5265_v59 = vand.u32 2147483647, %v3871_v40  ;;  %2981 = vmatprep.subr.bf16.mxu0 %v3199_v28 }
 0x124   :  { %v3935_v5 = vsel %vm591_vm4, %v5263_v38, %v3784_v13  ;;  %vm1432_vm10 = vcmp.gt.s32.totalorder %v1431_v26, 0  ;;  %v2837_v34 = vmin.u32 %v1279_v2, %v3907_v32  ;;  %v1164_v25 = vmul.u32 %v3901_v4, %v1148_v43  ;;  %v3200_v43 = vld [vmem:[%s5167_s6 + $0x10] sm:$0xff]  }
 0x125   :  { %5264 = vst [vmem:[#allocation15_spill] sm:$0xff] %v3935_v5  ;;  %v1428_v22 = vand.u32 8388607, %v5265_v59  ;;  %vm1166_vm11 = vc.u32 %v3922_v6, %v3911_v15  ;;  %v1433_v13 = vsel %vm1432_vm10, %v1431_v26, 0  ;;  %v1320_v1 = vand.u32 2139095040, %v3883_v8  ;;  %2982 = vmatpush3.bf16.msra.mxu0 %v3199_v28 }
 0x126   :  { %v1168_v11 = vsel %vm1166_vm11, %v1167_v48, %v3912_v50  ;;  %v1435_v31 = vand.u32 31, %v1433_v13  ;;  %v1087_v51 = vcvt.s32.f32 %v1080_v27  ;;  %v974_v4 = vshll.u32 %v3834_v53, %v3893_v60  ;;  %2983 = vmatprep.subr.bf16.mxu0 %v3200_v43 }
 0x127   :  { %v1169_v21 = vadd.s32 %v1168_v11, %v1164_v25  ;;  %v5212_v63 = vand.u32 2147483647, %v3883_v8  ;;  %v3955_v39 = vor.u32 4788187, %v979_v62  ;;  %v1429_v49 = vor.u32 8388608, %v1428_v22 }
 0x128   :  { %v1436_v2 = vsub.s32 32, %v1435_v31  ;;  %v3963_v50 = vmul.f32 %v3960_v24, %v220_v58  ;;  %v3965_v57 = vmul.f32 %v1087_v51, %v1085_v19  ;;  %v3967_v53 = vor.u32 %v975_v12, %v974_v4 }
 0x129   :  { %v1281_v60 = vclz %v2837_v34  ;;  %v1170_v47 = vadd.s32 536870912, %v1169_v21  ;;  %v1438_v26 = vshll.u32 %v5248_v37, %v1435_v31  ;;  %v1441_v27 = vshll.u32 %v5254_v33, %v1435_v31  ;;  %2984 = vmatpush3.bf16.msra.mxu0 %v3200_v43 }
 0x12a   :  { %v1439_v38 = vshrl.u32 %v5254_v33, %v1436_v2  ;;  %v1321_v48 = vshrl.u32 %v1320_v1, 23  ;;  %v1442_v19 = vshrl.u32 %v5255_v55, %v1436_v2  ;;  %v1444_v12 = vshll.u32 %v5255_v55, %v1435_v31 }
 0x12b   :  { %v3975_v62 = vshrl.u32 %v1170_v47, 30  ;;  %v1445_v59 = vshrl.u32 %v5256_v17, %v1436_v2  ;;  %v1434_v22 = vshrl.u32 %v1433_v13, 5  ;;  %v1447_v34 = vshll.u32 %v5256_v17, %v1435_v31  ;;  %v3201_v13 = vld [vmem:[%s5167_s6 + $0x18] sm:$0xff]  }
 0x12c   :  { %v1448_v25 = vshrl.u32 %v5257_v54, %v1436_v2  ;;  %v3984_v58 = vand.u32 8388607, %v5212_v63  ;;  %vm799_vm12 = vcmp.lt.s32.totalorder %v3457_v52, 0  ;;  %v1440_v11 = vor.u32 %v1439_v38, %v1438_v26  ;;  %2985 = vmatprep.subr.bf16.mxu0 %v3201_v13 }
 0x12d   :  { %5266 = vst [vmem:[#allocation16_spill] sm:$0xff] %v3975_v62  ;;  %v1172_v28 = vshll.u32 %v3975_v62, 30  ;;  %v1443_v1 = vor.u32 %v1442_v19, %v1441_v27  ;;  %v1446_v51 = vor.u32 %v1445_v59, %v1444_v12  ;;  %v2838_v4 = vadd.s32 4294967294, %v1281_v60  ;;  %2986 = vmatpush3.bf16.msra.mxu0 %v3201_v13 }
 0x12e   :  { %v1449_v47 = vor.u32 %v1448_v25, %v1447_v34  ;;  %v1450_v42 = vshll.u32 %v5257_v54, %v1435_v31  ;;  %v1451_v14 = vshrl.u32 %v5258_v7, %v1436_v2  ;;  %v1437_v43 = vshrl.u32 %v5248_v37, %v1436_v2 }
 0x12f   :  { %v3993_v63 = vsub.s32 %v1169_v21, %v1172_v28  ;;  %v3996_v5 = vshll.u32 %v1429_v49, 8  ;;  %v2840_v62 = vadd.s32 4294967169, %v1321_v48  ;;  %vm695_vm13 = vcmp.lt.s32.totalorder %v3525_v3, 0  ;;  %v3202_v21 = vld [vmem:[%s5167_s6 + $0x20] sm:$0xff]  }
 0x130   :  { %v1452_v26 = vor.u32 %v1451_v14, %v1450_v42  ;;  %vm1453_vm14 = vcmp.lt.s32.totalorder %v1434_v22, 1  ;;  %vm1455_vm15 = vcmp.lt.s32.totalorder %v1434_v22, 3  ;;  %vm1456_vm0 = vcmp.lt.s32.totalorder %v1434_v22, 4  ;;  %2987 = vmatprep.subr.bf16.mxu0 %v3202_v21 }
 0x131   :  { %v1175_v60 = vsub.s32 0, %v3993_v63  ;;  %v1458_v31 = vsel %vm1456_vm0, %v1446_v51, 2102212464  ;;  %v1461_v38 = vsel %vm1453_vm14, %v1440_v11, %v1443_v1  ;;  %v1462_v27 = vsel %vm1456_vm0, %v1449_v47, 920167782  ;;  %2988 = vmatpush3.bf16.msra.mxu0 %v3202_v21 }
 0x132   :  { %vm2839_vm1 = vcmp.lt.s32.totalorder %v2838_v4, 0  ;;  %vm1454_vm2 = vcmp.lt.s32.totalorder %v1434_v22, 2  ;;  %v1463_v49 = vsel %vm1455_vm15, %v1446_v51, %v1462_v27  ;;  %v1465_v2 = vsel %vm1453_vm14, %v1443_v1, %v1446_v51 }
 0x133   :  { %v2833_v14 = vmin.u32 %v1175_v60, %v3993_v63  ;;  %v1457_v42 = vsel %vm1453_vm14, %v1437_v43, %v1440_v11  ;;  %v1464_v48 = vsel %vm1454_vm2, %v1461_v38, %v1463_v49  ;;  %v1466_v19 = vsel %vm1456_vm0, %v1452_v26, 1326507024  ;;  %v3203_v43 = vld [vmem:[%s5167_s6 + $0x28] sm:$0xff]   ;;  %v215_v49 = vpop.permute.xlu0 %214 }
 0x134   :  { %v1459_v12 = vsel %vm1455_vm15, %v1443_v1, %v1458_v31  ;;  %v1467_v59 = vsel %vm1455_vm15, %v1449_v47, %v1466_v19  ;;  %v4009_v34 = vmul.u32.u64.low %v3996_v5, %v1464_v48  ;;  %v4010_v25 = vmul.u32.u64.high %v3996_v5, %v1464_v48, %v4009_v34  ;;  %2989 = vmatprep.subr.bf16.mxu0 %v3203_v43 }
 0x135   :  { %v4013_v28 = vsel %vm2839_vm1, 0, %v2838_v4  ;;  %v1177_v51 = vclz %v2833_v14  ;;  %v1468_v13 = vsel %vm1454_vm2, %v1465_v2, %v1467_v59  ;;  %v1327_v11 = vadd.s32 1, %v2840_v62  ;;  %2990 = vmatpush3.bf16.msra.mxu0 %v3203_v43 }
 0x136   :  { %v5267_v1 = vxor.u32 2147483648, %v3859_v46  ;;  %v981_v26 = vand.u32 2147483647, %v3955_v39  ;;  %v4028_v4 = vmul.u32.u64.low %v3996_v5, %v1468_v13  ;;  %v4029_v60 = vmul.u32.u64.high %v3996_v5, %v1468_v13, %v4028_v4 }
 0x137   :  { %v1460_v31 = vsel %vm1454_vm2, %v1457_v42, %v1459_v12  ;;  %v1325_v62 = vor.u32 8388608, %v3984_v58  ;;  %vm1328_vm3 = vcmp.gt.s32.totalorder %v1327_v11, 0  ;;  %v4035_v38 = vadd.f32 %v3867_v35, %v3963_v50 }
 0x138   :  { %v4024_v47 = vsel %vm799_vm12, %v5267_v1, %v3859_v46  ;;  %v983_v27 = vcvt.s32.f32 %v3967_v53  ;;  %v1289_v46 = vsub.s32 4294967266, %v4013_v28  ;;  %v1479_v39 = vadd.s32 1, %v4010_v25  ;;  %v3204_v53 = vld [vmem:[%s5167_s6 + $0x30] sm:$0xff]   ;;  %v3205_v1 = vld [vmem:[%s5167_s6 + $0x38] sm:$0xff]  }
 0x139   :  { %5268 = vst [vmem:[#allocation17_spill] sm:$0xff] %v4024_v47  ;;  %v1329_v21 = vsel %vm1328_vm3, %v1327_v11, 0  ;;  %v5269_v22 = vxor.u32 2147483648, %v3873_v18  ;;  %v2834_v2 = vadd.s32 4294967294, %v1177_v51  ;;  %v1269_v48 = vadd.s32 %v3841_v9, %v3848_v61  ;;  %2991 = vmatprep.subr.bf16.mxu0 %v3204_v53 }
 0x13a   :  { %v1331_v14 = vand.u32 31, %v1329_v21  ;;  %v4051_v42 = vmul.f32 %v983_v27, %v981_v26  ;;  %v1476_v19 = vmul.u32 %v3996_v5, %v1460_v31  ;;  %vm1478_vm5 = vc.u32 %v4029_v60, %v4009_v34  ;;  %2992 = vmatpush3.bf16.msra.mxu0 %v3204_v53 }
 0x13b   :  { %v4045_v58 = vsel %vm695_vm13, %v5269_v22, %v3873_v18  ;;  %v1480_v18 = vsel %vm1478_vm5, %v1479_v39, %v4010_v25  ;;  %v4059_v12 = vshll.u32 %v1325_v62, 8  ;;  %v4063_v51 = vmul.f32 %v3960_v24, %v215_v49  ;;  %2993 = vmatprep.subr.bf16.mxu0 %v3205_v1 }
 0x13c   :  { %5270 = vst [vmem:[#allocation18_spill] sm:$0xff] %v4045_v58  ;;  %v1285_v13 = vsub.s32 32, %v4013_v28  ;;  %v4066_v11 = vadd.s32 127, %v1289_v46  ;;  %v1481_v9 = vadd.s32 %v1480_v18, %v1476_v19  ;;  %v1332_v61 = vsub.s32 32, %v1331_v14 }
 0x13d   :  { %vm2835_vm6 = vcmp.lt.s32.totalorder %v2834_v2, 0  ;;  %v1330_v5 = vshrl.u32 %v1329_v21, 5  ;;  %v1334_v43 = vshll.u32 %v5248_v37, %v1331_v14  ;;  %v1632_v25 = vand.u32 2139095040, %v4035_v38 }
 0x13e   :  { %v1482_v26 = vadd.s32 536870912, %v1481_v9  ;;  %v1335_v4 = vshrl.u32 %v5254_v33, %v1332_v61  ;;  %v1337_v31 = vshll.u32 %v5254_v33, %v1331_v14  ;;  %v1338_v62 = vshrl.u32 %v5255_v55, %v1332_v61  ;;  %2994 = vmatpush3.bf16.msra.mxu0 %v3205_v1 }
 0x13f   :  { %v1340_v27 = vshll.u32 %v5255_v55, %v1331_v14  ;;  %v1341_v46 = vshrl.u32 %v5256_v17, %v1332_v61  ;;  %v1343_v39 = vshll.u32 %v5256_v17, %v1331_v14  ;;  %v1344_v21 = vshrl.u32 %v5257_v54, %v1332_v61 }
 0x140   :  { %v4080_v49 = vsel %vm2835_vm6, 0, %v2834_v2  ;;  %v4082_v22 = vshrl.u32 %v1482_v26, 30  ;;  %v1336_v53 = vor.u32 %v1335_v4, %v1334_v43  ;;  %v1339_v19 = vor.u32 %v1338_v62, %v1337_v31 }
 0x141   :  { %v1286_v18 = vshll.u32 %v3907_v32, %v4013_v28  ;;  %v1287_v50 = vshrl.u32 %v1269_v48, %v1285_v13  ;;  %v1342_v59 = vor.u32 %v1341_v46, %v1340_v27  ;;  %v1345_v47 = vor.u32 %v1344_v21, %v1343_v39 }
 0x142   :  { %5271 = vst [vmem:[#allocation19_spill] sm:$0xff] %v4082_v22  ;;  %v1291_v52 = vshll.u32 %v4066_v11, 23  ;;  %v1484_v58 = vshll.u32 %v4082_v22, 30  ;;  %v1346_v3 = vshll.u32 %v5257_v54, %v1331_v14  ;;  %v1347_v2 = vshrl.u32 %v5258_v7, %v1332_v61 }
 0x143   :  { %v1181_v26 = vsub.s32 32, %v4080_v49  ;;  %vm1349_vm7 = vcmp.lt.s32.totalorder %v1330_v5, 1  ;;  %vm1352_vm8 = vcmp.lt.s32.totalorder %v1330_v5, 4  ;;  %v1633_v43 = vshrl.u32 %v1632_v25, 23 }
 0x144   :  { %v4091_v1 = vsub.s32 %v1481_v9, %v1484_v58  ;;  %v1348_v4 = vor.u32 %v1347_v2, %v1346_v3  ;;  %v1354_v32 = vsel %vm1352_vm8, %v1342_v59, 2102212464  ;;  %v1357_v28 = vsel %vm1349_vm7, %v1336_v53, %v1339_v19 }
 0x145   :  { %v1333_v48 = vshrl.u32 %v5248_v37, %v1332_v61  ;;  %vm1351_vm10 = vcmp.lt.s32.totalorder %v1330_v5, 3  ;;  %v1358_v13 = vsel %vm1352_vm8, %v1345_v47, 920167782  ;;  %v1361_v11 = vsel %vm1349_vm7, %v1339_v19, %v1342_v59 }
 0x146   :  { %vm1007_vm11 = vcmp.lt.s32.totalorder %v3565_v20, 0  ;;  %vm903_vm14 = vcmp.lt.s32.totalorder %v3589_v45, 0  ;;  %v1487_v14 = vsub.s32 0, %v4091_v1  ;;  %vm1350_vm15 = vcmp.lt.s32.totalorder %v1330_v5, 2 }
 0x147   :  { %v1359_v25 = vsel %vm1351_vm10, %v1342_v59, %v1358_v13  ;;  %v1362_v58 = vsel %vm1352_vm8, %v1348_v4, 1326507024  ;;  %v1353_v3 = vsel %vm1349_vm7, %v1333_v48, %v1336_v53  ;;  %v1355_v9 = vsel %vm1351_vm10, %v1339_v19, %v1354_v32 }
 0x148   :  { %v1360_v31 = vsel %vm1350_vm15, %v1357_v28, %v1359_v25  ;;  %v1363_v62 = vsel %vm1351_vm10, %v1345_v47, %v1362_v58  ;;  %v2845_v61 = vmin.u32 %v1487_v14, %v4091_v1  ;;  %v1185_v21 = vsub.s32 4294967266, %v4080_v49 }
 0x149   :  { %v1364_v27 = vsel %vm1350_vm15, %v1361_v11, %v1363_v62  ;;  %v4102_v46 = vmul.u32.u64.low %v4059_v12, %v1360_v31  ;;  %v4103_v39 = vmul.u32.u64.high %v4059_v12, %v1360_v31, %v4102_v46  ;;  %v2852_v59 = vadd.s32 4294967169, %v1633_v43 }
 0x14a   :  { %v4108_v2 = vmul.u32.u64.low %v4059_v12, %v1364_v27  ;;  %v4109_v22 = vmul.u32.u64.high %v4059_v12, %v1364_v27, %v4108_v2  ;;  %v1165_v5 = vadd.s32 %v3911_v15, %v3922_v6  ;;  %v1489_v53 = vclz %v2845_v61 }
 0x14b   :  { %v1356_v47 = vsel %vm1350_vm15, %v1353_v3, %v1355_v9  ;;  %v4115_v19 = vadd.f32 %v3867_v35, %v4063_v51  ;;  %v985_v4 = vxor.u32 2147483648, %v4051_v42  ;;  %v4118_v32 = vor.u32 %v1287_v50, %v1286_v18 }
 0x14c   :  { %v4120_v28 = vor.u32 4788187, %v1291_v52  ;;  %v1639_v48 = vadd.s32 1, %v2852_v59  ;;  %v1182_v13 = vshll.u32 %v3993_v63, %v4080_v49  ;;  %v1183_v43 = vshrl.u32 %v1165_v5, %v1181_v26 }
 0x14d   :  { %v1375_v11 = vadd.s32 1, %v4103_v39  ;;  %v5272_v15 = vand.u32 2147483647, %v4035_v38  ;;  %v1186_v14 = vadd.s32 127, %v1185_v21  ;;  %v1372_v51 = vmul.u32 %v4059_v12, %v1356_v47 }
 0x14e   :  { %vm1374_vm0 = vc.u32 %v4109_v22, %v4102_v46  ;;  %vm1640_vm1 = vcmp.gt.s32.totalorder %v1639_v48, 0  ;;  %v2846_v50 = vadd.s32 4294967294, %v1489_v53  ;;  %v1528_v25 = vand.u32 2139095040, %v4115_v19 }
 0x14f   :  { %v1636_v6 = vand.u32 8388607, %v5272_v15  ;;  %v1376_v52 = vsel %vm1374_vm0, %v1375_v11, %v4103_v39  ;;  %v1641_v18 = vsel %vm1640_vm1, %v1639_v48, 0  ;;  %v5273_v63 = vxor.u32 2147483648, %v3965_v57 }
 0x150   :  { %v4142_v12 = vsel %vm903_vm14, %v985_v4, %v4051_v42  ;;  %v1377_v26 = vadd.s32 %v1376_v52, %v1372_v51  ;;  %v1643_v58 = vand.u32 31, %v1641_v18  ;;  %v1293_v3 = vand.u32 2147483647, %v4120_v28 }
 0x151   :  { %v4137_v49 = vsel %vm1007_vm11, %v5273_v63, %v3965_v57  ;;  %5275 = vst [vmem:[#allocation21_spill] sm:$0xff] %v4142_v12  ;;  %v1295_v9 = vcvt.s32.f32 %v4118_v32  ;;  %v4146_v31 = vor.u32 %v1183_v43, %v1182_v13  ;;  %v1637_v62 = vor.u32 8388608, %v1636_v6 }
 0x152   :  { %5274 = vst [vmem:[#allocation20_spill] sm:$0xff] %v4137_v49  ;;  %v1187_v61 = vshll.u32 %v1186_v14, 23  ;;  %v1378_v27 = vadd.s32 536870912, %v1377_v26  ;;  %v1644_v39 = vsub.s32 32, %v1643_v58  ;;  %v5223_v57 = vand.u32 2147483647, %v4115_v19 }
 0x153   :  { %vm2847_vm2 = vcmp.lt.s32.totalorder %v2846_v50, 0  ;;  %v1642_v21 = vshrl.u32 %v1641_v18, 5  ;;  %v1646_v2 = vshll.u32 %v5248_v37, %v1643_v58  ;;  %v1529_v42 = vshrl.u32 %v1528_v25, 23 }
 0x154   :  { %v4150_v59 = vshrl.u32 %v1378_v27, 30  ;;  %v1647_v5 = vshrl.u32 %v5254_v33, %v1644_v39  ;;  %v1649_v53 = vshll.u32 %v5254_v33, %v1643_v58  ;;  %v1650_v47 = vshrl.u32 %v5255_v55, %v1644_v39 }
 0x155   :  { %v1652_v4 = vshll.u32 %v5255_v55, %v1643_v58  ;;  %v1653_v32 = vshrl.u32 %v5256_v17, %v1644_v39  ;;  %v1655_v28 = vshll.u32 %v5256_v17, %v1643_v58  ;;  %v1656_v48 = vshrl.u32 %v5257_v54, %v1644_v39 }
 0x156   :  { %5276 = vst [vmem:[#allocation22_spill] sm:$0xff] %v4150_v59  ;;  %v4159_v13 = vsel %vm2847_vm2, 0, %v2846_v50  ;;  %v1380_v43 = vshll.u32 %v4150_v59, 30  ;;  %v1648_v11 = vor.u32 %v1647_v5, %v1646_v2  ;;  %v1651_v15 = vor.u32 %v1650_v47, %v1649_v53 }
 0x157   :  { %v1188_v6 = vor.u32 4788187, %v1187_v61  ;;  %v1654_v14 = vor.u32 %v1653_v32, %v1652_v4  ;;  %v1657_v51 = vor.u32 %v1656_v48, %v1655_v28  ;;  %v1677_v52 = vshll.u32 %v1637_v62, 8  ;;  %v230_v28 = vpop.permute.xlu1 %229 }
 0x158   :  { %v4162_v18 = vsub.s32 %v1377_v26, %v1380_v43  ;;  %v1658_v25 = vshll.u32 %v5257_v54, %v1643_v58  ;;  %v1659_v63 = vshrl.u32 %v5258_v7, %v1644_v39  ;;  %v1532_v27 = vand.u32 8388607, %v5223_v57 }
 0x159   :  { %v1497_v50 = vsub.s32 4294967266, %v4159_v13  ;;  %vm1661_vm3 = vcmp.lt.s32.totalorder %v1642_v21, 1  ;;  %vm1664_vm5 = vcmp.lt.s32.totalorder %v1642_v21, 4  ;;  %v2848_v59 = vadd.s32 4294967169, %v1529_v42 }
 0x15a   :  { %v1383_v2 = vsub.s32 0, %v4162_v18  ;;  %v1660_v61 = vor.u32 %v1659_v63, %v1658_v25  ;;  %v1666_v5 = vsel %vm1664_vm5, %v1654_v14, 2102212464  ;;  %v1669_v62 = vsel %vm1661_vm3, %v1648_v11, %v1651_v15 }
 0x15b   :  { %v1645_v26 = vshrl.u32 %v5248_v37, %v1644_v39  ;;  %vm1663_vm6 = vcmp.lt.s32.totalorder %v1642_v21, 3  ;;  %v1670_v58 = vsel %vm1664_vm5, %v1657_v51, 920167782  ;;  %v1673_v53 = vsel %vm1661_vm3, %v1651_v15, %v1654_v14 }
 0x15c   :  { %v2841_v47 = vmin.u32 %v1383_v2, %v4162_v18  ;;  %vm1662_vm7 = vcmp.lt.s32.totalorder %v1642_v21, 2  ;;  %v1671_v4 = vsel %vm1663_vm6, %v1654_v14, %v1670_v58  ;;  %v1674_v32 = vsel %vm1664_vm5, %v1660_v61, 1326507024 }
 0x15d   :  { %v1665_v42 = vsel %vm1661_vm3, %v1645_v26, %v1648_v11  ;;  %v1667_v48 = vsel %vm1663_vm6, %v1651_v15, %v1666_v5  ;;  %v1672_v43 = vsel %vm1662_vm7, %v1669_v62, %v1671_v4  ;;  %v1675_v25 = vsel %vm1663_vm6, %v1657_v51, %v1674_v32 }
 0x15e   :  { %v1385_v63 = vclz %v2841_v47  ;;  %v1676_v57 = vsel %vm1662_vm7, %v1673_v53, %v1675_v25  ;;  %v4177_v39 = vmul.u32.u64.low %v1677_v52, %v1672_v43  ;;  %v4178_v49 = vmul.u32.u64.high %v1677_v52, %v1672_v43, %v4177_v39 }
 0x15f   :  { %v4181_v20 = vmul.u32.u64.low %v1677_v52, %v1676_v57  ;;  %v4182_v12 = vmul.u32.u64.high %v1677_v52, %v1676_v57, %v4181_v20  ;;  %v1535_v2 = vadd.s32 1, %v2848_v59  ;;  %v253_v14 = vmul.f32 %v3960_v24, %v230_v28 }
 0x160   :  { %v4185_v61 = vmul.f32 %v1295_v9, %v1293_v3  ;;  %v1191_v11 = vcvt.s32.f32 %v4146_v31  ;;  %v2842_v15 = vadd.s32 4294967294, %v1385_v63  ;;  %v1668_v51 = vsel %vm1662_vm7, %v1665_v42, %v1667_v48  ;;  %v225_v31 = vpop.permute.xlu0 %224 }
 0x161   :  { %v1189_v5 = vand.u32 2147483647, %v1188_v6  ;;  %v1493_v62 = vsub.s32 32, %v4159_v13  ;;  %v1533_v26 = vor.u32 8388608, %v1532_v27  ;;  %vm1536_vm8 = vcmp.gt.s32.totalorder %v1535_v2, 0 }
 0x162   :  { %v4190_v58 = vadd.s32 127, %v1497_v50  ;;  %vm2843_vm10 = vcmp.lt.s32.totalorder %v2842_v15, 0  ;;  %v1687_v20 = vadd.s32 1, %v4178_v49  ;;  %v1537_v57 = vsel %vm1536_vm8, %v1535_v2, 0 }
 0x163   :  { %v4193_v59 = vsel %vm2843_vm10, 0, %v2842_v15  ;;  %v1684_v3 = vmul.u32 %v1677_v52, %v1668_v51  ;;  %vm1686_vm15 = vc.u32 %v4182_v12, %v4177_v39  ;;  %v4198_v9 = vadd.f32 %v3867_v35, %v253_v14 }
 0x164   :  { %v1477_v21 = vadd.s32 %v4009_v34, %v4029_v60  ;;  %v1393_v6 = vsub.s32 4294967266, %v4193_v59  ;;  %v1688_v27 = vsel %vm1686_vm15, %v1687_v20, %v4178_v49  ;;  %v4204_v50 = vshrl.u32 %v1537_v57, 5 }
 0x165   :  { %v1297_v53 = vxor.u32 2147483648, %v4185_v61  ;;  %v4207_v47 = vmul.f32 %v1191_v11, %v1189_v5  ;;  %v1689_v52 = vadd.s32 %v1688_v27, %v1684_v3  ;;  %v1539_v4 = vand.u32 31, %v1537_v57 }
 0x166   :  { %v1495_v32 = vshrl.u32 %v1477_v21, %v1493_v62  ;;  %v1499_v28 = vshll.u32 %v4190_v58, 23  ;;  %v4210_v42 = vshll.u32 %v1533_v26, 8  ;;  %v252_v48 = vmul.f32 %v3960_v24, %v225_v31 }
 0x167   :  { %v1690_v34 = vadd.s32 536870912, %v1689_v52  ;;  %v1540_v60 = vsub.s32 32, %v1539_v4  ;;  %v1840_v49 = vand.u32 2139095040, %v4198_v9  ;;  %v1394_v25 = vadd.s32 127, %v1393_v6 }
 0x168   :  { %v1542_v63 = vshll.u32 %v5248_v37, %v1539_v4  ;;  %vm1557_vm0 = vcmp.lt.s32.totalorder %v4204_v50, 1  ;;  %vm1558_vm1 = vcmp.lt.s32.totalorder %v4204_v50, 2  ;;  %v1545_v11 = vshll.u32 %v5254_v33, %v1539_v4 }
 0x169   :  { %v4218_v2 = vshrl.u32 %v1690_v34, 30  ;;  %v1543_v14 = vshrl.u32 %v5254_v33, %v1540_v60  ;;  %v1546_v24 = vshrl.u32 %v5255_v55, %v1540_v60  ;;  %vm1215_vm2 = vcmp.lt.s32.totalorder %v3727_v16, 0 }
 0x16a   :  { %v1548_v15 = vshll.u32 %v5255_v55, %v1539_v4  ;;  %v1549_v51 = vshrl.u32 %v5256_v17, %v1540_v60  ;;  %v1551_v5 = vshll.u32 %v5256_v17, %v1539_v4  ;;  %v1552_v62 = vshrl.u32 %v5257_v54, %v1540_v60 }
 0x16b   :  { %5277 = vst [vmem:[#allocation23_spill] sm:$0xff] %v4218_v2  ;;  %v1692_v26 = vshll.u32 %v4218_v2, 30  ;;  %v1544_v58 = vor.u32 %v1543_v14, %v1542_v63  ;;  %v1547_v20 = vor.u32 %v1546_v24, %v1545_v11  ;;  %vm1559_vm3 = vcmp.lt.s32.totalorder %v4204_v50, 3 }
 0x16c   :  { %v1550_v57 = vor.u32 %v1549_v51, %v1548_v15  ;;  %v1553_v3 = vor.u32 %v1552_v62, %v1551_v5  ;;  %v1554_v31 = vshll.u32 %v5257_v54, %v1539_v4  ;;  %v1555_v21 = vshrl.u32 %v5258_v7, %v1540_v60 }
 0x16d   :  { %v4232_v6 = vsub.s32 %v1689_v52, %v1692_v26  ;;  %v1541_v27 = vshrl.u32 %v5248_v37, %v1540_v60  ;;  %vm1560_vm5 = vcmp.lt.s32.totalorder %v4204_v50, 4  ;;  %v1565_v34 = vsel %vm1557_vm0, %v1544_v58, %v1547_v20 }
 0x16e   :  { %v1556_v43 = vor.u32 %v1555_v21, %v1554_v31  ;;  %v1562_v63 = vsel %vm1560_vm5, %v1550_v57, 2102212464  ;;  %v1566_v14 = vsel %vm1560_vm5, %v1553_v3, 920167782  ;;  %v1841_v11 = vshrl.u32 %v1840_v49, 23 }
 0x16f   :  { %v1395_v24 = vshll.u32 %v1394_v25, 23  ;;  %v1695_v15 = vsub.s32 0, %v4232_v6  ;;  %v1567_v4 = vsel %vm1559_vm3, %v1550_v57, %v1566_v14  ;;  %v1569_v52 = vsel %vm1557_vm0, %v1547_v20, %v1550_v57 }
 0x170   :  { %v1561_v60 = vsel %vm1557_vm0, %v1541_v27, %v1544_v58  ;;  %v1563_v51 = vsel %vm1559_vm3, %v1547_v20, %v1562_v63  ;;  %v1568_v5 = vsel %vm1558_vm1, %v1565_v34, %v1567_v4  ;;  %v1570_v62 = vsel %vm1560_vm5, %v1556_v43, 1326507024 }
 0x171   :  { %v2853_v49 = vmin.u32 %v1695_v15, %v4232_v6  ;;  %v1571_v25 = vsel %vm1559_vm3, %v1553_v3, %v1570_v62  ;;  %v4253_v26 = vmul.u32.u64.low %v4210_v42, %v1568_v5  ;;  %v4254_v31 = vmul.u32.u64.high %v4210_v42, %v1568_v5, %v4253_v26 }
 0x172   :  { %v1494_v58 = vshll.u32 %v4091_v1, %v4159_v13  ;;  %v1500_v57 = vor.u32 4788187, %v1499_v28  ;;  %v1572_v20 = vsel %vm1558_vm1, %v1569_v52, %v1571_v25  ;;  %v2860_v21 = vadd.s32 4294967169, %v1841_v11 }
 0x173   :  { %v4264_v43 = vsel %vm1215_vm2, %v1297_v53, %v4185_v61  ;;  %v1697_v27 = vclz %v2853_v49  ;;  %v4267_v3 = vmul.u32.u64.low %v4210_v42, %v1572_v20  ;;  %v4268_v34 = vmul.u32.u64.high %v4210_v42, %v1572_v20, %v4267_v3 }
 0x174   :  { %v1496_v63 = vor.u32 %v1495_v32, %v1494_v58  ;;  %v1564_v14 = vsel %vm1558_vm1, %v1561_v60, %v1563_v51  ;;  %v1847_v1 = vadd.s32 1, %v2860_v21  ;;  %v4273_v13 = vadd.f32 %v3867_v35, %v252_v48 }
 0x175   :  { %v4275_v28 = vor.u32 4788187, %v1395_v24  ;;  %v2854_v11 = vadd.s32 4294967294, %v1697_v27  ;;  %v1583_v15 = vadd.s32 1, %v4254_v31  ;;  %v5278_v61 = vand.u32 2147483647, %v4198_v9 }
 0x176   :  { %v1501_v52 = vand.u32 2147483647, %v1500_v57  ;;  %v1389_v32 = vsub.s32 32, %v4193_v59  ;;  %vm1848_vm6 = vcmp.gt.s32.totalorder %v1847_v1, 0  ;;  %v1373_v50 = vadd.s32 %v4102_v46, %v4109_v22  ;;  %v3206_v57 = vld [vmem:[%s5168_s5] sm:$0xff]  }
 0x177   :  { %v1844_v53 = vand.u32 8388607, %v5278_v61  ;;  %v1580_v35 = vmul.u32 %v4210_v42, %v1564_v14  ;;  %vm1582_vm7 = vc.u32 %v4268_v34, %v4253_v26  ;;  %v1849_v48 = vsel %vm1848_vm6, %v1847_v1, 0  ;;  %3011 = vmatprep.subr.bf16.mxu0 %v3206_v57 }
 0x178   :  { %v1503_v24 = vcvt.s32.f32 %v1496_v63  ;;  %vm2855_vm8 = vcmp.lt.s32.totalorder %v2854_v11, 0  ;;  %v1584_v60 = vsel %vm1582_vm7, %v1583_v15, %v4254_v31  ;;  %v1851_v51 = vand.u32 31, %v1849_v48 }
 0x179   :  { %v1585_v62 = vadd.s32 %v1584_v60, %v1580_v35  ;;  %v1845_v49 = vor.u32 8388608, %v1844_v53  ;;  %v1736_v25 = vand.u32 2139095040, %v4273_v13  ;;  %v1390_v22 = vshll.u32 %v4162_v18, %v4193_v59 }
 0x17a   :  { %v4290_v58 = vmul.f32 %v1503_v24, %v1501_v52  ;;  %v1391_v46 = vshrl.u32 %v1373_v50, %v1389_v32  ;;  %v1852_v42 = vsub.s32 32, %v1851_v51  ;;  %v4297_v20 = vsel %vm2855_vm8, 0, %v2854_v11 }
 0x17b   :  { %v1586_v31 = vadd.s32 536870912, %v1585_v62  ;;  %v1854_v21 = vshll.u32 %v5248_v37, %v1851_v51  ;;  %v1857_v27 = vshll.u32 %v5254_v33, %v1851_v51  ;;  %v1860_v14 = vshll.u32 %v5255_v55, %v1851_v51 }
 0x17c   :  { %v1855_v3 = vshrl.u32 %v5254_v33, %v1852_v42  ;;  %v1858_v63 = vshrl.u32 %v5255_v55, %v1852_v42  ;;  %v1861_v18 = vshrl.u32 %v5256_v17, %v1852_v42  ;;  %v1850_v1 = vshrl.u32 %v1849_v48, 5 }
 0x17d   :  { %v4305_v59 = vshrl.u32 %v1586_v31, 30  ;;  %v1863_v11 = vshll.u32 %v5256_v17, %v1851_v51  ;;  %v1864_v15 = vshrl.u32 %v5257_v54, %v1852_v42  ;;  %v1392_v61 = vor.u32 %v1391_v46, %v1390_v22 }
 0x17e   :  { %v1856_v53 = vor.u32 %v1855_v3, %v1854_v21  ;;  %v1859_v52 = vor.u32 %v1858_v63, %v1857_v27  ;;  %v1862_v32 = vor.u32 %v1861_v18, %v1860_v14  ;;  %vm1111_vm10 = vcmp.lt.s32.totalorder %v3777_v0, 0 }
 0x17f   :  { %5279 = vst [vmem:[#allocation24_spill] sm:$0xff] %v4305_v59  ;;  %v1588_v50 = vshll.u32 %v4305_v59, 30  ;;  %v1865_v35 = vor.u32 %v1864_v15, %v1863_v11  ;;  %v1885_v24 = vshll.u32 %v1845_v49, 8  ;;  %v1701_v57 = vsub.s32 32, %v4297_v20 }
 0x180   :  { %v1866_v48 = vshll.u32 %v5257_v54, %v1851_v51  ;;  %v1867_v31 = vshrl.u32 %v5258_v7, %v1852_v42  ;;  %v1737_v5 = vshrl.u32 %v1736_v25, 23  ;;  %vm1869_vm15 = vcmp.lt.s32.totalorder %v1850_v1, 1 }
 0x181   :  { %v4315_v4 = vsub.s32 %v1585_v62, %v1588_v50  ;;  %vm1871_vm0 = vcmp.lt.s32.totalorder %v1850_v1, 3  ;;  %vm1872_vm1 = vcmp.lt.s32.totalorder %v1850_v1, 4  ;;  %v1877_v21 = vsel %vm1869_vm15, %v1856_v53, %v1859_v52 }
 0x182   :  { %v1868_v22 = vor.u32 %v1867_v31, %v1866_v48  ;;  %v1874_v46 = vsel %vm1872_vm1, %v1862_v32, 2102212464  ;;  %v1878_v27 = vsel %vm1872_vm1, %v1865_v35, 920167782  ;;  %v1853_v3 = vshrl.u32 %v5248_v37, %v1852_v42 }
 0x183   :  { %v1591_v49 = vsub.s32 0, %v4315_v4  ;;  %vm1870_vm3 = vcmp.lt.s32.totalorder %v1850_v1, 2  ;;  %v1879_v51 = vsel %vm1871_vm0, %v1862_v32, %v1878_v27  ;;  %v1705_v63 = vsub.s32 4294967266, %v4297_v20 }
 0x184   :  { %v1880_v62 = vsel %vm1870_vm3, %v1877_v21, %v1879_v51  ;;  %v1881_v25 = vsel %vm1869_vm15, %v1859_v52, %v1862_v32  ;;  %v1882_v14 = vsel %vm1872_vm1, %v1868_v22, 1326507024  ;;  %v1873_v11 = vsel %vm1869_vm15, %v1853_v3, %v1856_v53 }
 0x185   :  { %v2849_v18 = vmin.u32 %v1591_v49, %v4315_v4  ;;  %v1875_v15 = vsel %vm1871_vm0, %v1859_v52, %v1874_v46  ;;  %v1883_v50 = vsel %vm1871_vm0, %v1865_v35, %v1882_v14  ;;  %v2856_v27 = vadd.s32 4294967169, %v1737_v5 }
 0x186   :  { %v1884_v42 = vsel %vm1870_vm3, %v1881_v25, %v1883_v50  ;;  %v4329_v48 = vmul.u32.u64.low %v1885_v24, %v1880_v62  ;;  %v4330_v31 = vmul.u32.u64.high %v1885_v24, %v1880_v62, %v4329_v48  ;;  %v1399_v60 = vcvt.s32.f32 %v1392_v61 }
 0x187   :  { %v1593_v21 = vclz %v2849_v18  ;;  %v4333_v51 = vmul.u32.u64.low %v1885_v24, %v1884_v42  ;;  %v4334_v32 = vmul.u32.u64.high %v1885_v24, %v1884_v42, %v4333_v51  ;;  %v5280_v22 = vxor.u32 2147483648, %v4207_v47 }
 0x188   :  { %v1685_v52 = vadd.s32 %v4177_v39, %v4182_v12  ;;  %v1876_v35 = vsel %vm1870_vm3, %v1873_v11, %v1875_v15  ;;  %v1743_v46 = vadd.s32 1, %v2856_v27  ;;  %v5281_v5 = vand.u32 2147483647, %v4275_v28 }
 0x189   :  { %v4341_v53 = vsel %vm1111_vm10, %v5280_v22, %v4207_v47  ;;  %v2850_v49 = vadd.s32 4294967294, %v1593_v21  ;;  %v5282_v3 = vand.u32 2147483647, %v4273_v13  ;;  %v5226_v25 = vand.u32 2147483647, %v3438_v29 }
 0x18a   :  { %v4348_v61 = vmul.f32 %v1399_v60, %v5281_v5  ;;  %v1703_v14 = vshrl.u32 %v1685_v52, %v1701_v57  ;;  %v4353_v18 = vadd.s32 127, %v1705_v63  ;;  %v1895_v47 = vadd.s32 1, %v4330_v31 }
 0x18b   :  { %v1740_v62 = vand.u32 8388607, %v5282_v3  ;;  %vm1744_vm5 = vcmp.gt.s32.totalorder %v1743_v46, 0  ;;  %v1892_v39 = vmul.u32 %v1885_v24, %v1876_v35  ;;  %vm1894_vm6 = vc.u32 %v4334_v32, %v4329_v48 }
 0x18c   :  { %v1745_v28 = vsel %vm1744_vm5, %v1743_v46, 0  ;;  %v1702_v1 = vshll.u32 %v4232_v6, %v4297_v20  ;;  %vm2851_vm7 = vcmp.lt.s32.totalorder %v2850_v49, 0  ;;  %v1896_v60 = vsel %vm1894_vm6, %v1895_v47, %v4330_v31 }
 0x18d   :  { %v1747_v11 = vand.u32 31, %v1745_v28  ;;  %v1581_v63 = vadd.s32 %v4253_v26, %v4268_v34  ;;  %v1897_v15 = vadd.s32 %v1896_v60, %v1892_v39  ;;  %v4367_v24 = vand.u32 8388607, %v5226_v25 }
 0x18e   :  { %v4369_v50 = vor.u32 %v1703_v14, %v1702_v1  ;;  %v1741_v27 = vor.u32 8388608, %v1740_v62  ;;  %v4372_v20 = vsel %vm2851_vm7, 0, %v2850_v49  ;;  %v1746_v46 = vshrl.u32 %v1745_v28, 5 }
 0x18f   :  { %v1748_v6 = vsub.s32 32, %v1747_v11  ;;  %v1898_v31 = vadd.s32 536870912, %v1897_v15  ;;  %v1750_v21 = vshll.u32 %v5248_v37, %v1747_v11  ;;  %v1753_v51 = vshll.u32 %v5254_v33, %v1747_v11 }
 0x190   :  { %v1756_v22 = vshll.u32 %v5255_v55, %v1747_v11  ;;  %v1759_v5 = vshll.u32 %v5256_v17, %v1747_v11  ;;  %v294_v47 = vshll.u32 %v5248_v37, %v3582_v44  ;;  %v1597_v39 = vsub.s32 32, %v4372_v20 }
 0x191   :  { %v1751_v26 = vshrl.u32 %v5254_v33, %v1748_v6  ;;  %v1754_v34 = vshrl.u32 %v5255_v55, %v1748_v6  ;;  %v1757_v52 = vshrl.u32 %v5256_v17, %v1748_v6  ;;  %v4380_v35 = vshrl.u32 %v1898_v31, 30 }
 0x192   :  { %v1760_v49 = vshrl.u32 %v5257_v54, %v1748_v6  ;;  %v1781_v25 = vshll.u32 %v1741_v27, 8  ;;  %v1601_v31 = vsub.s32 4294967266, %v4372_v20  ;;  %v1749_v28 = vshrl.u32 %v5248_v37, %v1748_v6 }
 0x193   :  { %5283 = vst [vmem:[#allocation25_spill] sm:$0xff] %v4380_v35  ;;  %v1752_v3 = vor.u32 %v1751_v26, %v1750_v21  ;;  %v1755_v62 = vor.u32 %v1754_v34, %v1753_v51  ;;  %v1758_v14 = vor.u32 %v1757_v52, %v1756_v22  ;;  %v1900_v1 = vshll.u32 %v4380_v35, 30 }
 0x194   :  { %v1761_v60 = vor.u32 %v1760_v49, %v1759_v5  ;;  %v1762_v57 = vshll.u32 %v5257_v54, %v1747_v11  ;;  %v1763_v12 = vshrl.u32 %v5258_v7, %v1748_v6  ;;  %vm1765_vm8 = vcmp.lt.s32.totalorder %v1746_v46, 1 }
 0x195   :  { %v4392_v21 = vsub.s32 %v1897_v15, %v1900_v1  ;;  %vm1767_vm15 = vcmp.lt.s32.totalorder %v1746_v46, 3  ;;  %vm1768_vm0 = vcmp.lt.s32.totalorder %v1746_v46, 4  ;;  %v1773_v34 = vsel %vm1765_vm8, %v1752_v3, %v1755_v62 }
 0x196   :  { %v1764_v51 = vor.u32 %v1763_v12, %v1762_v57  ;;  %v1770_v26 = vsel %vm1768_vm0, %v1758_v14, 2102212464  ;;  %v1774_v22 = vsel %vm1768_vm0, %v1761_v60, 920167782  ;;  %vm1766_vm1 = vcmp.lt.s32.totalorder %v1746_v46, 2 }
 0x197   :  { %v1903_v52 = vsub.s32 0, %v4392_v21  ;;  %v1769_v27 = vsel %vm1765_vm8, %v1749_v28, %v1752_v3  ;;  %v1775_v5 = vsel %vm1767_vm15, %v1758_v14, %v1774_v22  ;;  %v1771_v49 = vsel %vm1767_vm15, %v1755_v62, %v1770_v26 }
 0x198   :  { %v1776_v11 = vsel %vm1766_vm1, %v1773_v34, %v1775_v5  ;;  %v1777_v42 = vsel %vm1765_vm8, %v1755_v62, %v1758_v14  ;;  %v1778_v6 = vsel %vm1768_vm0, %v1764_v51, 1326507024  ;;  %v1602_v15 = vadd.s32 127, %v1601_v31 }
 0x199   :  { %v2861_v1 = vmin.u32 %v1903_v52, %v4392_v21  ;;  %v1779_v35 = vsel %vm1767_vm15, %v1761_v60, %v1778_v6  ;;  %v295_v12 = vshrl.u32 %v5254_v33, %v3630_v41  ;;  %v297_v3 = vshll.u32 %v5254_v33, %v3582_v44 }
 0x19a   :  { %v1780_v57 = vsel %vm1766_vm1, %v1777_v42, %v1779_v35  ;;  %v4401_v2 = vmul.u32.u64.low %v1781_v25, %v1776_v11  ;;  %v4402_v59 = vmul.u32.u64.high %v1781_v25, %v1776_v11, %v4401_v2  ;;  %v1772_v28 = vsel %vm1766_vm1, %v1769_v27, %v1771_v49 }
 0x19b   :  { %v4407_v26 = vmul.u32.u64.low %v1781_v25, %v1780_v57  ;;  %v4408_v62 = vmul.u32.u64.high %v1781_v25, %v1780_v57, %v4407_v26  ;;  %v298_v14 = vshrl.u32 %v5255_v55, %v3630_v41  ;;  %v1598_v46 = vshll.u32 %v4315_v4, %v4372_v20 }
 0x19c   :  { %v1599_v60 = vshrl.u32 %v1581_v63, %v1597_v39  ;;  %v1905_v31 = vclz %v2861_v1  ;;  %v301_v42 = vshrl.u32 %v5256_v17, %v3630_v41  ;;  %v1603_v35 = vshll.u32 %v1602_v15, 23 }
 0x19d   :  { %v300_v51 = vshll.u32 %v5255_v55, %v3582_v44  ;;  %v304_v34 = vshrl.u32 %v5257_v54, %v3630_v41  ;;  %v307_v22 = vshrl.u32 %v5258_v7, %v3630_v41  ;;  %v1788_v52 = vmul.u32 %v1781_v25, %v1772_v28 }
 0x19e   :  { %v1791_v27 = vadd.s32 1, %v4402_v59  ;;  %v303_v4 = vshll.u32 %v5256_v17, %v3582_v44  ;;  %v306_v63 = vshll.u32 %v5257_v54, %v3582_v44  ;;  %vm1790_vm3 = vc.u32 %v4408_v62, %v4401_v2 }
 0x19f   :  { %v296_v20 = vor.u32 %v295_v12, %v294_v47  ;;  %v299_v39 = vor.u32 %v298_v14, %v297_v3  ;;  %v302_v5 = vor.u32 %v301_v42, %v300_v51  ;;  %v2862_v49 = vadd.s32 4294967294, %v1905_v31 }
 0x1a0   :  { %v1792_v11 = vsel %vm1790_vm3, %v1791_v27, %v4402_v59  ;;  %v305_v6 = vor.u32 %v304_v34, %v303_v4  ;;  %v308_v15 = vor.u32 %v307_v22, %v306_v63  ;;  %vm5233_vm5 = vcmp.lt.s32.totalorder %v3871_v40, 0 }
 0x1a1   :  { %v5284_v25 = vshll.u32 %v4353_v18, 23  ;;  %v1711_v57 = vcvt.s32.f32 %v4369_v50  ;;  %v1793_v28 = vadd.s32 %v1792_v11, %v1788_v52  ;;  %v285_v44 = vor.u32 8388608, %v4367_v24 }
 0x1a2   :  { %vm5234_vm6 = vcmp.lt.s32.totalorder %v3883_v8, 0  ;;  %v1600_v47 = vor.u32 %v1599_v60, %v1598_v46  ;;  %v1604_v12 = vor.u32 4788187, %v1603_v35  ;;  %v293_v3 = vshrl.u32 %v5248_v37, %v3630_v41 }
 0x1a3   :  { %v1708_v1 = vor.u32 4788187, %v5284_v25  ;;  %vm312_vm7 = vcmp.lt.s32.totalorder %v3569_v23, 4  ;;  %v1794_v59 = vadd.s32 536870912, %v1793_v28  ;;  %vm309_vm8 = vcmp.lt.s32.totalorder %v3569_v23, 1 }
 0x1a4   :  { %vm310_vm15 = vcmp.lt.s32.totalorder %v3569_v23, 2  ;;  %v314_v18 = vsel %vm312_vm7, %v302_v5, 2102212464  ;;  %vm2863_vm0 = vcmp.lt.s32.totalorder %v2862_v49, 0  ;;  %v317_v50 = vsel %vm309_vm8, %v296_v20, %v299_v39 }
 0x1a5   :  { %v318_v26 = vsel %vm312_vm7, %v305_v6, 920167782  ;;  %v322_v14 = vsel %vm312_vm7, %v308_v15, 1326507024  ;;  %v4441_v24 = vshrl.u32 %v1794_v59, 30  ;;  %vm311_vm1 = vcmp.lt.s32.totalorder %v3569_v23, 3 }
 0x1a6   :  { %v313_v46 = vsel %vm309_vm8, %v293_v3, %v296_v20  ;;  %v321_v60 = vsel %vm309_vm8, %v299_v39, %v302_v5  ;;  %v315_v31 = vsel %vm311_vm1, %v299_v39, %v314_v18  ;;  %v319_v41 = vsel %vm311_vm1, %v302_v5, %v318_v26 }
 0x1a7   :  { %v323_v42 = vsel %vm311_vm1, %v305_v6, %v322_v14  ;;  %v325_v35 = vshll.u32 %v285_v44, 8  ;;  %v1709_v51 = vand.u32 2147483647, %v1708_v1  ;;  %v4444_v34 = vsel %vm2863_vm0, 0, %v2862_v49 }
 0x1a8   :  { %v1796_v22 = vshll.u32 %v4441_v24, 30  ;;  %v320_v52 = vsel %vm310_vm15, %v317_v50, %v319_v41  ;;  %v1605_v27 = vand.u32 2147483647, %v1604_v12  ;;  %v324_v4 = vsel %vm310_vm15, %v321_v60, %v323_v42 }
 0x1a9   :  { %v4451_v63 = vmul.u32.u64.low %v325_v35, %v320_v52  ;;  %v4452_v11 = vmul.u32.u64.high %v325_v35, %v320_v52, %v4451_v63  ;;  %v316_v39 = vsel %vm310_vm15, %v313_v46, %v315_v31  ;;  %v5285_v6 = vxor.u32 2147483648, %v4290_v58 }
 0x1aa   :  { %v4455_v20 = vsub.s32 %v1793_v28, %v1796_v22  ;;  %v4459_v5 = vmul.u32.u64.low %v325_v35, %v324_v4  ;;  %v4460_v49 = vmul.u32.u64.high %v325_v35, %v324_v4, %v4459_v5  ;;  %v1607_v25 = vcvt.s32.f32 %v1600_v47 }
 0x1ab   :  { %v4467_v15 = vsel %vm5233_vm5, %v5285_v6, %v4290_v58  ;;  %v1913_v1 = vsub.s32 4294967266, %v4444_v34  ;;  %v381_v44 = vand.u32 2147483647, %v3506_v36  ;;  %v5286_v28 = vxor.u32 2147483648, %v4348_v61 }
 0x1ac   :  { %v4478_v12 = vmul.f32 %v1711_v57, %v1709_v51  ;;  %v1893_v3 = vadd.s32 %v4329_v48, %v4334_v32  ;;  %v1799_v58 = vsub.s32 0, %v4455_v20  ;;  %v4483_v59 = vmul.f32 %v1607_v25, %v1605_v27 }
 0x1ad   :  { %v4476_v23 = vsel %vm5234_vm6, %v5286_v28, %v4348_v61  ;;  %v1909_v47 = vsub.s32 32, %v4444_v34  ;;  %v332_v18 = vmul.u32 %v325_v35, %v316_v39  ;;  %v335_v50 = vadd.s32 1, %v4452_v11 }
 0x1ae   :  { %v2857_v26 = vmin.u32 %v1799_v58, %v4455_v20  ;;  %vm334_vm3 = vc.u32 %v4460_v49, %v4451_v63  ;;  %v399_v61 = vshrl.u32 %v5254_v33, %v3711_v56  ;;  %v402_v48 = vshrl.u32 %v5255_v55, %v3711_v56 }
 0x1af   :  { %v1914_v32 = vadd.s32 127, %v1913_v1  ;;  %v336_v57 = vsel %vm334_vm3, %v335_v50, %v4452_v11  ;;  %v388_v14 = vand.u32 8388607, %v381_v44  ;;  %v398_v46 = vshll.u32 %v5248_v37, %v3689_v10  ;;  %v5287_v1 = vld [vmem:[#allocation9_spill] sm:$0xff] }
 0x1b0   :  { %v1801_v60 = vclz %v2857_v26  ;;  %v337_v31 = vadd.s32 %v336_v57, %v332_v18  ;;  %v401_v41 = vshll.u32 %v5254_v33, %v3689_v10  ;;  %v405_v42 = vshrl.u32 %v5256_v17, %v3711_v56 }
 0x1b1   :  { %v404_v35 = vshll.u32 %v5255_v55, %v3689_v10  ;;  %v407_v51 = vshll.u32 %v5256_v17, %v3689_v10  ;;  %v408_v22 = vshrl.u32 %v5257_v54, %v3711_v56  ;;  %v411_v52 = vshrl.u32 %v5258_v7, %v3711_v56 }
 0x1b2   :  { %v2858_v27 = vadd.s32 4294967294, %v1801_v60  ;;  %v338_v4 = vadd.s32 536870912, %v337_v31  ;;  %v400_v11 = vor.u32 %v399_v61, %v398_v46  ;;  %v403_v39 = vor.u32 %v402_v48, %v401_v41 }
 0x1b3   :  { %v1915_v33 = vshll.u32 %v1914_v32, 23  ;;  %v406_v5 = vor.u32 %v405_v42, %v404_v35  ;;  %v409_v6 = vor.u32 %v408_v22, %v407_v51  ;;  %v410_v25 = vshll.u32 %v5257_v54, %v3689_v10 }
 0x1b4   :  { %vm2859_vm7 = vcmp.lt.s32.totalorder %v2858_v27, 0  ;;  %v4513_v55 = vshrl.u32 %v338_v4, 30  ;;  %v389_v17 = vor.u32 8388608, %v388_v14  ;;  %vm416_vm8 = vcmp.lt.s32.totalorder %v5287_v1, 4 }
 0x1b5   :  { %v1804_v28 = vsel %vm2859_vm7, 0, %v2858_v27  ;;  %v412_v58 = vor.u32 %v411_v52, %v410_v25  ;;  %vm413_vm15 = vcmp.lt.s32.totalorder %v5287_v1, 1  ;;  %v422_v7 = vsel %vm416_vm8, %v409_v6, 920167782 }
 0x1b6   :  { %v1809_v18 = vsub.s32 4294967266, %v1804_v28  ;;  %v340_v50 = vshll.u32 %v4513_v55, 30  ;;  %vm415_vm0 = vcmp.lt.s32.totalorder %v5287_v1, 3  ;;  %v421_v10 = vsel %vm413_vm15, %v400_v11, %v403_v39 }
 0x1b7   :  { %v1911_v54 = vshrl.u32 %v1893_v3, %v1909_v47  ;;  %v4523_v26 = vor.u32 4788187, %v1915_v33  ;;  %v397_v61 = vshrl.u32 %v5248_v37, %v3711_v56  ;;  %v423_v48 = vsel %vm415_vm0, %v406_v5, %v422_v7 }
 0x1b8   :  { %v1810_v32 = vadd.s32 127, %v1809_v18  ;;  %v4529_v57 = vsub.s32 %v337_v31, %v340_v50  ;;  %vm414_vm1 = vcmp.lt.s32.totalorder %v5287_v1, 2  ;;  %v418_v14 = vsel %vm416_vm8, %v406_v5, 2102212464  ;;  %v5288_v50 = vld [vmem:[#allocation2_spill] sm:$0xff] }
 0x1b9   :  { %v424_v46 = vsel %vm414_vm1, %v421_v10, %v423_v48  ;;  %v425_v3 = vsel %vm413_vm15, %v403_v39, %v406_v5  ;;  %v426_v56 = vsel %vm416_vm8, %v412_v58, 1326507024  ;;  %v429_v37 = vshll.u32 %v389_v17, 8  ;;  %v5295_v48 = vld [vmem:[#allocation12_spill] sm:$0xff] }
 0x1ba   :  { %v1805_v47 = vsub.s32 32, %v1804_v28  ;;  %v1811_v60 = vshll.u32 %v1810_v32, 23  ;;  %v343_v31 = vsub.s32 0, %v4529_v57  ;;  %v417_v41 = vsel %vm413_vm15, %v397_v61, %v400_v11 }
 0x1bb   :  { %vm279_vm3 = vcmp.lt.s32.totalorder %v3438_v29, 0  ;;  %v419_v42 = vsel %vm415_vm0, %v403_v39, %v418_v14  ;;  %v427_v35 = vsel %vm415_vm0, %v409_v6, %v426_v56  ;;  %v1713_v52 = vxor.u32 2147483648, %v4478_v12 }
 0x1bc   :  { %v4548_v51 = vmul.u32.u64.low %v429_v37, %v424_v46  ;;  %v4549_v22 = vmul.u32.u64.high %v429_v37, %v424_v46, %v4548_v51  ;;  %v1910_v27 = vshll.u32 %v4392_v21, %v4444_v34  ;;  %v2801_v4 = vmin.u32 %v343_v31, %v4529_v57 }
 0x1bd   :  { %v428_v11 = vsel %vm414_vm1, %v425_v3, %v427_v35  ;;  %v1789_v39 = vadd.s32 %v4401_v2, %v4408_v62  ;;  %v4560_v33 = vor.u32 4788187, %v1811_v60  ;;  %v1609_v25 = vxor.u32 2147483648, %v4483_v59 }
 0x1be   :  { %v4562_v5 = vmul.u32.u64.low %v429_v37, %v428_v11  ;;  %v4563_v6 = vmul.u32.u64.high %v429_v37, %v428_v11, %v4562_v5  ;;  %v1912_v17 = vor.u32 %v1911_v54, %v1910_v27  ;;  %v345_v58 = vclz %v2801_v4  ;;  %v5330_v4 = vld [vmem:[#allocation16_spill] sm:$0xff] }
 0x1bf   :  { %v420_v21 = vsel %vm414_vm1, %v417_v41, %v419_v42  ;;  %v1917_v34 = vand.u32 2147483647, %v4523_v26  ;;  %v1807_v7 = vshrl.u32 %v1789_v39, %v1805_v47  ;;  %v439_v18 = vadd.s32 1, %v4549_v22  ;;  %v3214_v41 = vld [vmem:[%s5169_s8] sm:$0xff]  }
 0x1c0   :  { %v5289_v10 = vand.u32 2147483647, %v5288_v50  ;;  %v1806_v62 = vshll.u32 %v4455_v20, %v1804_v28  ;;  %v5292_v61 = vand.u32 2147483647, %v3438_v29  ;;  %v2802_v1 = vadd.s32 4294967294, %v345_v58  ;;  %v5296_v20 = vld [vmem:[#allocation4_spill] sm:$0xff]  ;;  %3043 = vmatprep.subr.bf16.mxu1 %v3214_v41 }
 0x1c1   :  { %v363_v26 = vsub.s32 4, %v4513_v55  ;;  %v1813_v14 = vand.u32 2147483647, %v4560_v33  ;;  %v436_v46 = vmul.u32 %v429_v37, %v420_v21  ;;  %vm438_vm15 = vc.u32 %v4563_v6, %v4548_v51  ;;  %v3215_v37 = vld [vmem:[%s5169_s8 + $0x8] sm:$0xff]   ;;  %3044 = vmatpush3.bf16.msra.mxu1 %v3214_v41  ;;  %v5304_v41 = vld [vmem:[#allocation10_spill] sm:$0xff] }
 0x1c2   :  { %vm4572_vm7 = vcmp.le.f32.partialorder %v5289_v10, 0.7853982  ;;  %vm4579_vm8 = vcmp.le.f32.partialorder %v5292_v61, 0.7853982  ;;  %v571_v28 = vsub.s32 4, %v5296_v20  ;;  %v1919_v3 = vcvt.s32.f32 %v1912_v17  ;;  %v5303_v58 = vld [vmem:[#allocation15_spill] sm:$0xff]  ;;  %3045 = vmatprep.subr.bf16.mxu1 %v3215_v37 }
 0x1c3   :  { %v573_v32 = vsel %vm4572_vm7, %v5288_v50, %v5295_v48  ;;  %vm2803_vm0 = vcmp.lt.s32.totalorder %v2802_v1, 0  ;;  %vm383_vm1 = vcmp.lt.s32.totalorder %v3506_v36, 0  ;;  %v440_v56 = vsel %vm438_vm15, %v439_v18, %v4549_v22 }
 0x1c4   :  { %v1808_v47 = vor.u32 %v1807_v7, %v1806_v62  ;;  %v348_v60 = vsel %vm2803_vm0, 0, %v2802_v1  ;;  %v441_v31 = vadd.s32 %v440_v56, %v436_v46  ;;  %3230 = vcosq.f32 %v573_v32 }
 0x1c5   :  { %vm5236_vm5 = vcmp.lt.s32.totalorder %v4035_v38, 0  ;;  %v333_v42 = vadd.s32 %v4451_v63, %v4460_v49  ;;  %v349_v35 = vsub.s32 32, %v348_v60  ;;  %v353_v27 = vsub.s32 4294967266, %v348_v60  ;;  %v5302_v49 = vld [vmem:[#allocation5_spill] sm:$0xff]  ;;  %3046 = vmatpush3.bf16.msra.mxu1 %v3215_v37  ;;  %v5309_v63 = vld [vmem:[#allocation18_spill] sm:$0xff] }
 0x1c6   :  { %v364_v22 = vsel %vm279_vm3, %v363_v26, %v4513_v55  ;;  %vm4608_vm15 = vcmp.le.f32.partialorder %v381_v44, 0.7853982  ;;  %v442_v11 = vadd.s32 536870912, %v441_v31  ;;  %v572_v39 = vsel %vm487_vm9, %v571_v28, %v5296_v20 }
 0x1c7   :  { %v5299_v33 = vand.u32 2147483647, %v3441_v30  ;;  %v675_v5 = vsub.s32 4, %v5302_v49  ;;  %vm5237_vm6 = vcmp.lt.s32.totalorder %v4115_v19, 0  ;;  %v350_v44 = vshll.u32 %v4529_v57, %v348_v60  ;;  %v3216_v57 = vld [vmem:[%s5169_s8 + $0x10] sm:$0xff]  }
 0x1c8   :  { %v351_v55 = vshrl.u32 %v333_v42, %v349_v35  ;;  %v354_v17 = vadd.s32 127, %v353_v27  ;;  %v1815_v7 = vcvt.s32.f32 %v1808_v47  ;;  %v443_v18 = vshrl.u32 %v442_v11, 30  ;;  %3047 = vmatprep.subr.bf16.mxu1 %v3216_v57  ;;  %v5305_v27 = vld [vmem:[#allocation6_spill] sm:$0xff] }
 0x1c9   :  { %vm4617_vm0 = vcmp.le.f32.partialorder %v5299_v33, 0.7853982  ;;  %3232 = vsinq.f32 %v573_v32  ;;  %v676_v10 = vsel %vm591_vm4, %v675_v5, %v5302_v49  ;;  %v574_v1 = vsel %vm4572_vm7, 0, %v572_v39  ;;  %3048 = vmatpush3.bf16.msra.mxu1 %v3216_v57 }
 0x1ca   :  { %v677_v21 = vsel %vm4617_vm0, %v3441_v30, %v5303_v58  ;;  %v352_v62 = vor.u32 %v351_v55, %v350_v44  ;;  %v355_v61 = vshll.u32 %v354_v17, 23  ;;  %vm5235_vm9 = vcmp.lt.s32.totalorder %v4273_v13, 0 }
 0x1cb   :  { %3234 = vcosq.f32 %v677_v21  ;;  %v366_v26 = vsel %vm4579_vm8, 0, %v364_v22  ;;  %v444_v48 = vshll.u32 %v443_v18, 30  ;;  %v467_v32 = vsub.s32 4, %v443_v18 }
 0x1cc   :  { %3236 = vsinq.f32 %v677_v21  ;;  %v4639_v46 = vmul.f32 %v1919_v3, %v1917_v34  ;;  %v1816_v20 = vmul.f32 %v1815_v7, %v1813_v14  ;;  %v356_v28 = vor.u32 4788187, %v355_v61  ;;  %v3217_v34 = vld [vmem:[%s5169_s8 + $0x18] sm:$0xff]   ;;  %v3218_v7 = vld [vmem:[%s5169_s8 + $0x20] sm:$0xff]  }
 0x1cd   :  { %v678_v56 = vsel %vm4617_vm0, 0, %v676_v10  ;;  %v4643_v47 = vsub.s32 %v441_v31, %v444_v48  ;;  %v468_v2 = vsel %vm383_vm1, %v467_v32, %v443_v18  ;;  %v578_v60 = vadd.s32 3, %v574_v1  ;;  %3049 = vmatprep.subr.bf16.mxu1 %v3217_v34 }
 0x1ce   :  { %v779_v42 = vsub.s32 4, %v5304_v41  ;;  %v357_v3 = vand.u32 2147483647, %v356_v28  ;;  %v359_v14 = vcvt.s32.f32 %v352_v62  ;;  %v370_v35 = vadd.s32 3, %v366_v26  ;;  %v3231_v31 = vpop.eup %3230  ;;  %3050 = vmatpush3.bf16.msra.mxu1 %v3217_v34 }
 0x1cf   :  { %v5306_v22 = vand.u32 2147483647, %v5305_v27  ;;  %v4662_v11 = vsel %vm5236_vm5, %v1713_v52, %v4478_v12  ;;  %v447_v39 = vsub.s32 0, %v4643_v47  ;;  %v682_v33 = vadd.s32 3, %v678_v56  ;;  %3051 = vmatprep.subr.bf16.mxu1 %v3218_v7 }
 0x1d0   :  { %v1817_v5 = vxor.u32 2147483648, %v1816_v20  ;;  %v360_v44 = vmul.f32 %v359_v14, %v357_v3  ;;  %v470_v55 = vsel %vm4608_vm15, 0, %v468_v2  ;;  %v780_v17 = vsel %vm695_vm13, %v779_v42, %v5304_v41  ;;  %v5310_v14 = vld [vmem:[#allocation8_spill] sm:$0xff] }
 0x1d1   :  { %vm4653_vm4 = vcmp.le.f32.partialorder %v5306_v22, 0.7853982  ;;  %v4679_v12 = vsel %vm5237_vm6, %v1609_v25, %v4483_v59  ;;  %v1921_v52 = vxor.u32 2147483648, %v4639_v46  ;;  %v2805_v58 = vmin.u32 %v447_v39, %v4643_v47 }
 0x1d2   :  { %v781_v49 = vsel %vm4653_vm4, %v5305_v27, %v5309_v63  ;;  %v4683_v21 = vand.u32 3, %v578_v60  ;;  %v361_v18 = vxor.u32 2147483648, %v360_v44  ;;  %v4688_v10 = vand.u32 3, %v370_v35  ;;  %3052 = vmatpush3.bf16.msra.mxu1 %v3218_v7  ;;  %v5315_v7 = vld [vmem:[#allocation17_spill] sm:$0xff] }
 0x1d3   :  { %v585_v57 = vxor.u32 2147483648, %v3231_v31  ;;  %3238 = vcosq.f32 %v781_v49  ;;  %v3233_v62 = vpop.eup %3232  ;;  %v449_v61 = vclz %v2805_v58  ;;  %v474_v59 = vadd.s32 3, %v470_v55 }
 0x1d4   :  { %v4690_v25 = vand.u32 3, %v682_v33  ;;  %v782_v1 = vsel %vm4653_vm4, 0, %v780_v17  ;;  %v4696_v48 = vsel %vm5235_vm9, %v1817_v5, %v1816_v20  ;;  %v362_v32 = vsel %vm279_vm3, %v361_v18, %v360_v44  ;;  %v3219_v20 = vld [vmem:[%s5169_s8 + $0x28] sm:$0xff]  }
 0x1d5   :  { %v3235_v26 = vpop.eup %3234  ;;  %v437_v28 = vadd.s32 %v4548_v51, %v4563_v6  ;;  %3240 = vsinq.f32 %v781_v49  ;;  %v365_v2 = vsel %vm4579_vm8, %v3438_v29, %v362_v32  ;;  %v2806_v60 = vadd.s32 4294967294, %v449_v61  ;;  %3053 = vmatprep.subr.bf16.mxu1 %v3219_v20  ;;  %v5311_v49 = vld [vmem:[#allocation3_spill] sm:$0xff] }
 0x1d6   :  { %v3237_v56 = vpop.eup %3236  ;;  %vm580_vm13 = vcmp.lt.s32.totalorder %v4683_v21, 2  ;;  %vm581_vm7 = vcmp.eq.s32.totalorder %v4683_v21, 0  ;;  %vm584_vm0 = vcmp.eq.s32.totalorder %v4683_v21, 2  ;;  %3242 = vcosq.f32 %v365_v2  ;;  %3054 = vmatpush3.bf16.msra.mxu1 %v3219_v20 }
 0x1d7   :  { %v582_v51 = vxor.u32 2147483648, %v3233_v62  ;;  %v586_v6 = vsel %vm584_vm0, %v585_v57, %v3233_v62  ;;  %v786_v41 = vadd.s32 3, %v782_v1  ;;  %3244 = vsinq.f32 %v365_v2 }
 0x1d8   :  { %vm2807_vm3 = vcmp.lt.s32.totalorder %v2806_v60, 0  ;;  %v4711_v54 = vand.u32 3, %v474_v59  ;;  %vm684_vm8 = vcmp.lt.s32.totalorder %v4690_v25, 2  ;;  %v686_v34 = vxor.u32 2147483648, %v3237_v56 }
 0x1d9   :  { %v452_v42 = vsel %vm2807_vm3, 0, %v2806_v60  ;;  %v689_v3 = vxor.u32 2147483648, %v3235_v26  ;;  %v883_v35 = vsub.s32 4, %v5310_v14  ;;  %vm577_vm4 = vweird.f32 %v5288_v50  ;;  %v5319_v60 = vld [vmem:[#allocation13_spill] sm:$0xff] }
 0x1da   :  { %v453_v22 = vsub.s32 32, %v452_v42  ;;  %v457_v37 = vsub.s32 4294967266, %v452_v42  ;;  %vm685_vm9 = vcmp.eq.s32.totalorder %v4690_v25, 0  ;;  %vm688_vm0 = vcmp.eq.s32.totalorder %v4690_v25, 2 }
 0x1db   :  { %v454_v39 = vshll.u32 %v4643_v47, %v452_v42  ;;  %v583_v33 = vsel %vm581_vm7, %v3231_v31, %v582_v51  ;;  %vm681_vm3 = vweird.f32 %v3441_v30  ;;  %v787_v63 = vand.u32 3, %v786_v41  ;;  %v5320_v42 = vld [vmem:[#allocation21_spill] sm:$0xff]  ;;  %v5326_v30 = vld [vmem:[#allocation20_spill] sm:$0xff] }
 0x1dc   :  { %v5312_v5 = vand.u32 2147483647, %v5311_v49  ;;  %v455_v55 = vshrl.u32 %v437_v28, %v453_v22  ;;  %v458_v17 = vadd.s32 127, %v457_v37  ;;  %v884_v58 = vsel %vm799_vm12, %v883_v35, %v5310_v14 }
 0x1dd   :  { %v3239_v31 = vpop.eup %3238  ;;  %v687_v18 = vsel %vm685_vm9, %v3235_v26, %v686_v34  ;;  %v690_v57 = vsel %vm688_vm0, %v689_v3, %v3237_v56  ;;  %vm373_vm7 = vcmp.eq.s32.totalorder %v4688_v10, 0  ;;  %vm376_vm6 = vcmp.eq.s32.totalorder %v4688_v10, 2 }
 0x1de   :  { %vm4724_vm5 = vcmp.le.f32.partialorder %v5312_v5, 0.7853982  ;;  %v456_v61 = vor.u32 %v455_v55, %v454_v39  ;;  %v459_v59 = vshll.u32 %v458_v17, 23  ;;  %v793_v1 = vxor.u32 2147483648, %v3239_v31 }
 0x1df   :  { %v885_v47 = vsel %vm4724_vm5, %v5311_v49, %v5315_v7  ;;  %v886_v62 = vsel %vm4724_vm5, 0, %v884_v58  ;;  %v3241_v32 = vpop.eup %3240  ;;  %v587_v28 = vsel %vm580_vm13, %v583_v33, %v586_v6  ;;  %v5316_v26 = vand.u32 2147483647, %v3589_v45  ;;  %v5321_v58 = vld [vmem:[#allocation7_spill] sm:$0xff] }
 0x1e0   :  { %3246 = vcosq.f32 %v885_v47  ;;  %v890_v2 = vadd.s32 3, %v886_v62  ;;  %v987_v20 = vsub.s32 4, %v5319_v60  ;;  %v460_v51 = vor.u32 4788187, %v459_v59  ;;  %v3243_v3 = vpop.eup %3242 }
 0x1e1   :  { %3248 = vsinq.f32 %v885_v47  ;;  %vm4743_vm12 = vcmp.le.f32.partialorder %v5316_v26, 0.7853982  ;;  %v790_v41 = vxor.u32 2147483648, %v3241_v32  ;;  %vm792_vm5 = vcmp.eq.s32.totalorder %v787_v63, 2  ;;  %v3245_v35 = vpop.eup %3244  ;;  %v5334_v47 = vld [vmem:[#allocation14_spill] sm:$0xff] }
 0x1e2   :  { %v989_v34 = vsel %vm4743_vm12, %v3589_v45, %v5320_v42  ;;  %vm372_vm9 = vcmp.lt.s32.totalorder %v4688_v10, 2  ;;  %v463_v21 = vcvt.s32.f32 %v456_v61  ;;  %v691_v6 = vsel %vm684_vm8, %v687_v18, %v690_v57  ;;  %v5325_v18 = vld [vmem:[#allocation11_spill] sm:$0xff] }
 0x1e3   :  { %vm789_vm13 = vcmp.eq.s32.totalorder %v787_v63, 0  ;;  %v794_v14 = vsel %vm792_vm5, %v793_v1, %v3241_v32  ;;  %v461_v22 = vand.u32 2147483647, %v460_v51  ;;  %v891_v39 = vand.u32 3, %v890_v2 }
 0x1e4   :  { %v791_v37 = vsel %vm789_vm13, %v3239_v31, %v790_v41  ;;  %v988_v33 = vsel %vm903_vm14, %v987_v20, %v5319_v60  ;;  %v374_v5 = vxor.u32 2147483648, %v3245_v35  ;;  %v377_v44 = vxor.u32 2147483648, %v3243_v3 }
 0x1e5   :  { %v4760_v55 = vsel %vm577_vm4, nan, %v587_v28  ;;  %3250 = vcosq.f32 %v989_v34  ;;  %v464_v17 = vmul.f32 %v463_v21, %v461_v22  ;;  %v4764_v25 = vsel %vm681_vm3, nan, %v691_v6  ;;  %v5338_v6 = vld [vmem:[#allocation22_spill] sm:$0xff] }
 0x1e6   :  { %vm788_vm8 = vcmp.lt.s32.totalorder %v787_v63, 2  ;;  %v5322_v7 = vand.u32 2147483647, %v5321_v58  ;;  %vm369_vm14 = vweird.f32 %v3438_v29  ;;  %v990_v50 = vsel %vm4743_vm12, 0, %v988_v33 }
 0x1e7   :  { %v795_v31 = vsel %vm788_vm8, %v791_v37, %v794_v14  ;;  %3252 = vsinq.f32 %v989_v34  ;;  %v1091_v57 = vsub.s32 4, %v5325_v18  ;;  %v465_v62 = vxor.u32 2147483648, %v464_v17 }
 0x1e8   :  { %vm4768_vm0 = vcmp.le.f32.partialorder %v5322_v7, 0.7853982  ;;  %vm892_vm4 = vcmp.lt.s32.totalorder %v891_v39, 2  ;;  %vm893_vm3 = vcmp.eq.s32.totalorder %v891_v39, 0  ;;  %v375_v59 = vsel %vm373_vm7, %v3243_v3, %v374_v5 }
 0x1e9   :  { %v1093_v63 = vsel %vm4768_vm0, %v5321_v58, %v5326_v30  ;;  %v378_v1 = vsel %vm376_vm6, %v377_v44, %v3245_v35  ;;  %v1092_v32 = vsel %vm1007_vm11, %v1091_v57, %v5325_v18  ;;  %v466_v2 = vsel %vm383_vm1, %v465_v62, %v464_v17 }
 0x1ea   :  { %v3247_v61 = vpop.eup %3246  ;;  %3254 = vcosq.f32 %v1093_v63  ;;  %v1094_v56 = vsel %vm4768_vm0, 0, %v1092_v32  ;;  %v469_v60 = vsel %vm4608_vm15, %v3506_v36, %v466_v2  ;;  %vm896_vm6 = vcmp.eq.s32.totalorder %v891_v39, 2 }
 0x1eb   :  { %v3249_v28 = vpop.eup %3248  ;;  %v897_v26 = vxor.u32 2147483648, %v3247_v61  ;;  %3256 = vsinq.f32 %v1093_v63  ;;  %v994_v51 = vadd.s32 3, %v990_v50  ;;  %v379_v41 = vsel %vm372_vm9, %v375_v59, %v378_v1 }
 0x1ec   :  { %v894_v20 = vxor.u32 2147483648, %v3249_v28  ;;  %3258 = vcosq.f32 %v469_v60  ;;  %v1098_v34 = vadd.s32 3, %v1094_v56  ;;  %v5327_v21 = vand.u32 2147483647, %v3777_v0 }
 0x1ed   :  { %v898_v42 = vsel %vm896_vm6, %v897_v26, %v3249_v28  ;;  %3260 = vsinq.f32 %v469_v60  ;;  %v1195_v14 = vsub.s32 4, %v5330_v4  ;;  %v1942_v35 = vpack.c.bf16 %v4764_v25, %v4760_v55 }
 0x1ee   :  { %v895_v3 = vsel %vm893_vm3, %v3247_v61, %v894_v20  ;;  %vm4799_vm11 = vcmp.le.f32.partialorder %v5327_v21, 0.7853982  ;;  %vm785_vm1 = vweird.f32 %v5305_v27  ;;  %vm889_vm15 = vweird.f32 %v5311_v49 }
 0x1ef   :  { %v899_v10 = vsel %vm892_vm4, %v895_v3, %v898_v42  ;;  %v1197_v22 = vsel %vm4799_vm11, %v3777_v0, %v4341_v53  ;;  %v3251_v37 = vpop.eup %3250  ;;  %v995_v33 = vand.u32 3, %v994_v51  ;;  %v1196_v5 = vsel %vm1111_vm10, %v1195_v14, %v5330_v4 }
 0x1f0   :  { %3262 = vcosq.f32 %v1197_v22  ;;  %v4818_v44 = vsel %vm369_vm14, nan, %v379_v41  ;;  %vm480_vm7 = vcmp.eq.s32.totalorder %v4711_v54, 2  ;;  %v4821_v27 = vsel %vm785_vm1, nan, %v795_v31 }
 0x1f1   :  { %v4823_v39 = vsel %vm889_vm15, nan, %v899_v10  ;;  %v1099_v53 = vand.u32 3, %v1098_v34  ;;  %v3253_v17 = vpop.eup %3252  ;;  %vm477_vm12 = vcmp.eq.s32.totalorder %v4711_v54, 0  ;;  %v1198_v49 = vsel %vm4799_vm11, 0, %v1196_v5 }
 0x1f2   :  { %3264 = vsinq.f32 %v1197_v22  ;;  %v5331_v7 = vand.u32 2147483647, %v3727_v16  ;;  %v1299_v50 = vsub.s32 4, %v5334_v47  ;;  %vm476_vm5 = vcmp.lt.s32.totalorder %v4711_v54, 2 }
 0x1f3   :  { %v998_v31 = vxor.u32 2147483648, %v3253_v17  ;;  %v1001_v18 = vxor.u32 2147483648, %v3251_v37  ;;  %v1202_v57 = vadd.s32 3, %v1198_v49  ;;  %vm473_vm9 = vweird.f32 %v3506_v36  ;;  %v3207_v36 = vld [vmem:[%s5168_s5 + $0x8] sm:$0xff]  }
 0x1f4   :  { %vm4830_vm10 = vcmp.le.f32.partialorder %v5331_v7, 0.7853982  ;;  %v3255_v30 = vpop.eup %3254  ;;  %vm996_vm13 = vcmp.lt.s32.totalorder %v995_v33, 2  ;;  %vm997_vm8 = vcmp.eq.s32.totalorder %v995_v33, 0  ;;  %v1300_v63 = vsel %vm1215_vm2, %v1299_v50, %v5334_v47 }
 0x1f5   :  { %v1301_v62 = vsel %vm4830_vm10, %v3727_v16, %v4264_v43  ;;  %v3257_v61 = vpop.eup %3256  ;;  %v1943_v59 = vpack.c.bf16 %v4823_v39, %v4821_v27  ;;  %vm1000_vm0 = vcmp.eq.s32.totalorder %v995_v33, 2  ;;  %v1105_v1 = vxor.u32 2147483648, %v3255_v30 }
 0x1f6   :  { %3266 = vcosq.f32 %v1301_v62  ;;  %v1302_v32 = vsel %vm4830_vm10, 0, %v1300_v63  ;;  %vm1100_vm14 = vcmp.lt.s32.totalorder %v1099_v53, 2  ;;  %v1102_v43 = vxor.u32 2147483648, %v3257_v61  ;;  %v3259_v2 = vpop.eup %3258 }
 0x1f7   :  { %v1203_v28 = vand.u32 3, %v1202_v57  ;;  %3268 = vsinq.f32 %v1301_v62  ;;  %vm993_vm4 = vweird.f32 %v3589_v45  ;;  %v999_v26 = vsel %vm997_vm8, %v3251_v37, %v998_v31  ;;  %v3261_v20 = vpop.eup %3260  ;;  %v3296_v45 = vld [vmem:[%s5168_s5] sm:$0xff]  }
 0x1f8   :  { %v1002_v56 = vsel %vm1000_vm0, %v1001_v18, %v3253_v17  ;;  %vm1104_vm2 = vcmp.eq.s32.totalorder %v1099_v53, 2  ;;  %v1306_v60 = vadd.s32 3, %v1302_v32  ;;  %v481_v51 = vxor.u32 2147483648, %v3259_v2 }
 0x1f9   :  { %vm1101_vm3 = vcmp.eq.s32.totalorder %v1099_v53, 0  ;;  %v1106_v41 = vsel %vm1104_vm2, %v1105_v1, %v3257_v61  ;;  %v5335_v42 = vand.u32 2147483647, %v3883_v8  ;;  %v478_v3 = vxor.u32 2147483648, %v3261_v20  ;;  %v5343_v1 = vld [vmem:[#allocation19_spill] sm:$0xff] }
 0x1fa   :  { %vm1097_vm11 = vweird.f32 %v5321_v58  ;;  %v1103_v21 = vsel %vm1101_vm3, %v3255_v30, %v1102_v43  ;;  %v1403_v4 = vsub.s32 4, %v5338_v6  ;;  %v3263_v10 = vpop.eup %3262  ;;  %v482_v22 = vsel %vm480_vm7, %v481_v51, %v3261_v20 }
 0x1fb   :  { %vm4851_vm6 = vcmp.le.f32.partialorder %v5335_v42, 0.7853982  ;;  %v1003_v37 = vsel %vm996_vm13, %v999_v26, %v1002_v56  ;;  %vm1201_vm1 = vweird.f32 %v3777_v0  ;;  %vm1204_vm15 = vcmp.lt.s32.totalorder %v1203_v28, 2 }
 0x1fc   :  { %v1405_v14 = vsel %vm4851_vm6, %v3883_v8, %v4476_v23  ;;  %vm1205_vm10 = vcmp.eq.s32.totalorder %v1203_v28, 0  ;;  %v479_v5 = vsel %vm477_vm12, %v3259_v2, %v478_v3  ;;  %vm1208_vm8 = vcmp.eq.s32.totalorder %v1203_v28, 2  ;;  %v3265_v7 = vpop.eup %3264 }
 0x1fd   :  { %v1209_v17 = vxor.u32 2147483648, %v3263_v10  ;;  %v1307_v49 = vand.u32 3, %v1306_v60  ;;  %v483_v23 = vsel %vm476_vm5, %v479_v5, %v482_v22  ;;  %v1107_v29 = vsel %vm1100_vm14, %v1103_v21, %v1106_v41  ;;  %v5348_v41 = vld [vmem:[#allocation24_spill] sm:$0xff] }
 0x1fe   :  { %vm1305_vm7 = vweird.f32 %v3727_v16  ;;  %vm5339_vm13 = vcmp.lt.s32.totalorder %v3883_v8, 0  ;;  %3270 = vcosq.f32 %v1405_v14  ;;  %v484_v47 = vsel %vm473_vm9, nan, %v483_v23 }
 0x1ff   :  { %v1404_v33 = vsel %vm5339_vm13, %v1403_v4, %v5338_v6  ;;  %v1206_v50 = vxor.u32 2147483648, %v3265_v7  ;;  %v1210_v31 = vsel %vm1208_vm8, %v1209_v17, %v3265_v7  ;;  %v1941_v54 = vpack.c.bf16 %v484_v47, %v4818_v44 }
 0x200   :  { %v1406_v18 = vsel %vm4851_vm6, 0, %v1404_v33  ;;  %v3267_v57 = vpop.eup %3266  ;;  %3272 = vsinq.f32 %v1405_v14  ;;  %v5340_v62 = vand.u32 2147483647, %v3871_v40  ;;  %v1507_v32 = vsub.s32 4, %v5343_v1  ;;  %v5350_v14 = vld [vmem:[#allocation23_spill] sm:$0xff] }
 0x201   :  { %v1410_v53 = vadd.s32 3, %v1406_v18  ;;  %v1207_v63 = vsel %vm1205_vm10, %v3263_v10, %v1206_v50  ;;  %v1313_v61 = vxor.u32 2147483648, %v3267_v57  ;;  %v3269_v43 = vpop.eup %3268  ;;  %2995 = vmatprep.mubr.bf16.mxu0 %v1941_v54  ;;  %v1004_v2 = vsel %vm993_vm4, nan, %v1003_v37 }
 0x202   :  { %vm4881_vm12 = vcmp.le.f32.partialorder %v5340_v62, 0.7853982  ;;  %v1211_v26 = vsel %vm1204_vm15, %v1207_v63, %v1210_v31  ;;  %vm1312_vm5 = vcmp.eq.s32.totalorder %v1307_v49, 2  ;;  %2996 = vmatmul.mubr.bf16.vlgmr.msra.gmra.mrb[0].mxu0 %v1942_v35  ;;  %v1310_v56 = vxor.u32 2147483648, %v3269_v43  ;;  %v3208_v35 = vld [vmem:[%s5168_s5 + $0x10] sm:$0xff]  }
 0x203   :  { %v1509_v44 = vsel %vm4881_vm12, %v3871_v40, %v4467_v15  ;;  %v1314_v60 = vsel %vm1312_vm5, %v1313_v61, %v3269_v43  ;;  %v1411_v20 = vand.u32 3, %v1410_v53  ;;  %vm5344_vm9 = vcmp.lt.s32.totalorder %v3871_v40, 0  ;;  %3012 = vmatpush3.bf16.msra.mxu0 %v3296_v45  ;;  %2999 = vmatprep.mubr.bf16.mxu0 %v1943_v59  ;;  %v3222_v45 = vld [vmem:[%s5172_s10] sm:$0xff]  }
 0x204   :  { %3274 = vcosq.f32 %v1509_v44  ;;  %v1508_v15 = vsel %vm5344_vm9, %v1507_v32, %v5343_v1  ;;  %v1108_v55 = vsel %vm1097_vm11, nan, %v1107_v29  ;;  %vm1308_vm0 = vcmp.lt.s32.totalorder %v1307_v49, 2  ;;  %3013 = vmatprep.subr.bf16.mxu0 %v3207_v36 }
 0x205   :  { %vm1309_vm14 = vcmp.eq.s32.totalorder %v1307_v49, 0  ;;  %v1510_v25 = vsel %vm4881_vm12, 0, %v1508_v15  ;;  %vm1839_vm4 = vcmp.lt.s32.totalorder %v4198_v9, 0  ;;  %v1212_v28 = vsel %vm1201_vm1, nan, %v1211_v26 }
 0x206   :  { %v1311_v27 = vsel %vm1309_vm14, %v3267_v57, %v1310_v56  ;;  %3276 = vsinq.f32 %v1509_v44  ;;  %v5345_v58 = vand.u32 2147483647, %v4115_v19  ;;  %v1514_v51 = vadd.s32 3, %v1510_v25 }
 0x207   :  { %v1315_v59 = vsel %vm1308_vm0, %v1311_v27, %v1314_v60  ;;  %v1611_v42 = vsub.s32 4, %v5348_v41  ;;  %v1944_v3 = vpack.c.bf16 %v1108_v55, %v1004_v2  ;;  %vm1412_vm3 = vcmp.lt.s32.totalorder %v1411_v20, 2  ;;  %3014 = vmatpush3.bf16.msra.mxu0 %v3207_v36  ;;  %v5360_v55 = vld [vmem:[#allocation25_spill] sm:$0xff] }
 0x208   :  { %vm4921_vm2 = vcmp.le.f32.partialorder %v5345_v58, 0.7853982  ;;  %v1316_v0 = vsel %vm1305_vm7, nan, %v1315_v59  ;;  %v3271_v21 = vpop.eup %3270  ;;  %vm5349_vm6 = vcmp.lt.s32.totalorder %v4115_v19, 0  ;;  %v1715_v10 = vsub.s32 4, %v5350_v14  ;;  %3015 = vmatprep.subr.bf16.mxu0 %v3208_v35 }
 0x209   :  { %v1613_v34 = vsel %vm4921_vm2, %v4115_v19, %v4679_v12  ;;  %v1945_v6 = vpack.c.bf16 %v1316_v0, %v1212_v28  ;;  %v1612_v4 = vsel %vm5349_vm6, %v1611_v42, %v5348_v41  ;;  %v3209_v12 = vld [vmem:[%s5168_s5 + $0x18] sm:$0xff]   ;;  %vm1413_vm11 = vcmp.eq.s32.totalorder %v1411_v20, 0 }
 0x20a   :  { %3278 = vcosq.f32 %v1613_v34  ;;  %vm1416_vm1 = vcmp.eq.s32.totalorder %v1411_v20, 2  ;;  %v1417_v16 = vxor.u32 2147483648, %v3271_v21  ;;  %v5351_v22 = vand.u32 2147483647, %v4035_v38  ;;  %v3273_v37 = vpop.eup %3272  ;;  %3000 = vmatmul.mubr.bf16.gmra.mrb[4].mxu0 %v1944_v3 }
 0x20b   :  { %3280 = vsinq.f32 %v1613_v34  ;;  %v1515_v5 = vand.u32 3, %v1514_v51  ;;  %v1614_v17 = vsel %vm4921_vm2, 0, %v1612_v4  ;;  %vm5352_vm10 = vcmp.lt.s32.totalorder %v4035_v38, 0  ;;  %3016 = vmatpush3.bf16.msra.mxu0 %v3208_v35  ;;  %3003 = vmatprep.mubr.bf16.mxu0 %v1945_v6  ;;  %v3212_v51 = vld [vmem:[%s5168_s5 + $0x30] sm:$0xff]  }
 0x20c   :  { %vm1630_vm15 = vcmp.le.f32.partialorder %v5351_v22, 0.7853982  ;;  %v1716_v49 = vsel %vm5352_vm10, %v1715_v10, %v5350_v14  ;;  %v1414_v23 = vxor.u32 2147483648, %v3273_v37  ;;  %v1418_v29 = vsel %vm1416_vm1, %v1417_v16, %v3273_v37  ;;  %3017 = vmatprep.subr.bf16.mxu0 %v3209_v12  ;;  %v3213_v10 = vld [vmem:[%s5168_s5 + $0x38] sm:$0xff]  }
 0x20d   :  { %v1717_v7 = vsel %vm1630_vm15, %v4035_v38, %v4662_v11  ;;  %v1618_v33 = vadd.s32 3, %v1614_v17  ;;  %v1718_v47 = vsel %vm1630_vm15, 0, %v1716_v49  ;;  %v5353_v18 = vand.u32 2147483647, %v4273_v13  ;;  %v3210_v11 = vld [vmem:[%s5168_s5 + $0x20] sm:$0xff]  }
 0x20e   :  { %v3275_v50 = vpop.eup %3274  ;;  %3282 = vcosq.f32 %v1717_v7  ;;  %v1722_v31 = vadd.s32 3, %v1718_v47  ;;  %v1819_v54 = vsub.s32 4, %v4441_v24  ;;  %v1415_v53 = vsel %vm1413_vm11, %v3271_v21, %v1414_v23 }
 0x20f   :  { %vm4950_vm8 = vcmp.le.f32.partialorder %v5353_v18, 0.7853982  ;;  %v1521_v62 = vxor.u32 2147483648, %v3275_v50  ;;  %v1619_v30 = vand.u32 3, %v1618_v33  ;;  %3284 = vsinq.f32 %v1717_v7  ;;  %3018 = vmatpush3.bf16.msra.mxu0 %v3209_v12 }
 0x210   :  { %v1922_v36 = vsel %vm1839_vm4, %v1921_v52, %v4639_v46  ;;  %v1419_v63 = vsel %vm1412_vm3, %v1415_v53, %v1418_v29  ;;  %vm5356_vm7 = vcmp.lt.s32.totalorder %v4273_v13, 0  ;;  %v1821_v1 = vsel %vm4950_vm8, %v4273_v13, %v4696_v48  ;;  %v3277_v32 = vpop.eup %3276  ;;  %3019 = vmatprep.subr.bf16.mxu0 %v3210_v11  ;;  %v3211_v48 = vld [vmem:[%s5168_s5 + $0x28] sm:$0xff]  }
 0x211   :  { %v1820_v61 = vsel %vm5356_vm7, %v1819_v54, %v4441_v24  ;;  %vm1409_vm13 = vweird.f32 %v3883_v8  ;;  %vm1513_vm12 = vweird.f32 %v3871_v40  ;;  %vm1516_vm5 = vcmp.lt.s32.totalorder %v1515_v5, 2  ;;  %v43_v54 = vld [vmem:[%s5170_s0 + $0x8] sm:$0xff] }
 0x212   :  { %vm1520_vm9 = vcmp.eq.s32.totalorder %v1515_v5, 2  ;;  %vm1517_vm0 = vcmp.eq.s32.totalorder %v1515_v5, 0  ;;  %v1518_v46 = vxor.u32 2147483648, %v3277_v32  ;;  %v1723_v44 = vand.u32 3, %v1722_v31  ;;  %v2781_v31 = vld [vmem:[%s5171_s2] ss:$0 sm:$0xff] }
 0x213   :  { %v1522_v52 = vsel %vm1520_vm9, %v1521_v62, %v3277_v32  ;;  %v1420_v24 = vsel %vm1409_vm13, nan, %v1419_v63  ;;  %vm1621_vm14 = vcmp.eq.s32.totalorder %v1619_v30, 0  ;;  %v1822_v8 = vsel %vm4950_vm8, 0, %v1820_v61  ;;  %3020 = vmatpush3.bf16.msra.mxu0 %v3210_v11  ;;  %v46_v32 = vld [vmem:[%s5170_s0 + $0x20] sm:$0xff] }
 0x214   :  { %v3279_v43 = vpop.eup %3278  ;;  %3286 = vcosq.f32 %v1821_v1  ;;  %v1519_v26 = vsel %vm1517_vm0, %v3275_v50, %v1518_v46  ;;  %vm1624_vm2 = vcmp.eq.s32.totalorder %v1619_v30, 2  ;;  %v5357_v15 = vand.u32 2147483647, %v4198_v9  ;;  %3021 = vmatprep.subr.bf16.mxu0 %v3211_v48 }
 0x215   :  { %v3281_v2 = vpop.eup %3280  ;;  %v1625_v56 = vxor.u32 2147483648, %v3279_v43  ;;  %3288 = vsinq.f32 %v1821_v1  ;;  %v1523_v60 = vsel %vm1516_vm5, %v1519_v26, %v1522_v52  ;;  %v1923_v25 = vsub.s32 4, %v5360_v55  ;;  %v44_v1 = vld [vmem:[%s5170_s0 + $0x10] sm:$0xff]  ;;  %v55_v26 = vld [vmem:[%s5170_s0 + $0x68] sm:$0xff] }
 0x216   :  { %v1622_v20 = vxor.u32 2147483648, %v3281_v2  ;;  %vm4982_vm3 = vcmp.le.f32.partialorder %v5357_v15, 0.7853982  ;;  %v1524_v35 = vsel %vm1513_vm12, nan, %v1523_v60  ;;  %v1826_v27 = vadd.s32 3, %v1822_v8  ;;  %v48_v52 = vld [vmem:[%s5170_s0 + $0x30] sm:$0xff] }
 0x217   :  { %v1626_v28 = vsel %vm1624_vm2, %v1625_v56, %v3281_v2  ;;  %v1925_v58 = vsel %vm4982_vm3, %v4198_v9, %v1922_v36  ;;  %v1946_v39 = vpack.c.bf16 %v1524_v35, %v1420_v24  ;;  %v1924_v40 = vsel %vm1839_vm4, %v1923_v25, %v5360_v55  ;;  %3022 = vmatpush3.bf16.msra.mxu0 %v3211_v48  ;;  %v51_v24 = vld [vmem:[%s5170_s0 + $0x48] sm:$0xff]  ;;  %v52_v48 = vld [vmem:[%s5170_s0 + $0x50] sm:$0xff]  ;;  %v53_v8 = vld [vmem:[%s5170_s0 + $0x58] sm:$0xff] }
 0x218   :  { %v1623_v59 = vsel %vm1621_vm14, %v3279_v43, %v1622_v20  ;;  %3290 = vcosq.f32 %v1925_v58  ;;  %v3283_v41 = vpop.eup %3282  ;;  %vm1620_vm6 = vcmp.lt.s32.totalorder %v1619_v30, 2  ;;  %v1926_v0 = vsel %vm4982_vm3, 0, %v1924_v40  ;;  %3023 = vmatprep.subr.bf16.mxu0 %v3212_v51  ;;  %v50_v43 = vld [vmem:[%s5170_s0 + $0x40] sm:$0xff]  ;;  %v56_v56 = vld [vmem:[%s5170_s0 + $0x70] sm:$0xff]  ;;  %v57_v60 = vld [vmem:[%s5170_s0 + $0x78] sm:$0xff] }
 0x219   :  { %v3285_v42 = vpop.eup %3284  ;;  %3004 = vmatmul.mubr.bf16.gmra.mrb[8].mxu0 %v1946_v39  ;;  %v1627_v34 = vsel %vm1620_vm6, %v1623_v59, %v1626_v28  ;;  %v1729_v3 = vxor.u32 2147483648, %v3283_v41  ;;  %3292 = vsinq.f32 %v1925_v58  ;;  %vm1617_vm11 = vweird.f32 %v4115_v19  ;;  %v54_v2 = vld [vmem:[%s5170_s0 + $0x60] sm:$0xff]  ;;  %v3220_v20 = vld [vmem:[%s5169_s8 + $0x30] sm:$0xff]   ;;  %v3221_v15 = vld [vmem:[%s5169_s8 + $0x38] sm:$0xff]  }
 0x21a   :  { %v1726_v21 = vxor.u32 2147483648, %v3285_v42  ;;  %vm1728_vm1 = vcmp.eq.s32.totalorder %v1723_v44, 2  ;;  %vm1725_vm15 = vcmp.eq.s32.totalorder %v1723_v44, 0  ;;  %v1827_v4 = vand.u32 3, %v1826_v27  ;;  %3055 = vmatprep.subr.bf16.mxu1 %v3220_v20  ;;  %v5071_v55 = vld [vmem:[%s5173_s7] ss:$0 sm:$0xff] }
 0x21b   :  { %v1730_v6 = vsel %vm1728_vm1, %v1729_v3, %v3285_v42  ;;  %v1930_v14 = vadd.s32 3, %v1926_v0  ;;  %v1628_v12 = vsel %vm1617_vm11, nan, %v1627_v34  ;;  %vm1724_vm4 = vcmp.lt.s32.totalorder %v1723_v44, 2  ;;  %3024 = vmatpush3.bf16.msra.mxu0 %v3212_v51  ;;  %v49_v44 = vld [vmem:[%s5170_s0 + $0x38] sm:$0xff]  ;;  %3056 = vmatpush3.bf16.msra.mxu1 %v3220_v20 }
 0x21c   :  { %v1727_v16 = vsel %vm1725_vm15, %v3283_v41, %v1726_v21  ;;  %vm1721_vm10 = vweird.f32 %v4035_v38  ;;  %vm1832_vm8 = vcmp.eq.s32.totalorder %v1827_v4, 2  ;;  %3025 = vmatprep.subr.bf16.mxu0 %v3213_v10  ;;  %vm1829_vm7 = vcmp.eq.s32.totalorder %v1827_v4, 0  ;;  %v42_v38 = vld [vmem:[%s5170_s0] sm:$0xff]  ;;  %3057 = vmatprep.subr.bf16.mxu1 %v3221_v15 }
 0x21d   :  { %v1731_v37 = vsel %vm1724_vm4, %v1727_v16, %v1730_v6  ;;  %v1931_v23 = vand.u32 3, %v1930_v14  ;;  %vm1828_vm13 = vcmp.lt.s32.totalorder %v1827_v4, 2  ;;  %vm1825_vm5 = vweird.f32 %v4273_v13  ;;  %v45_v13 = vld [vmem:[%s5170_s0 + $0x18] sm:$0xff]  ;;  %v3223_v14 = vld [vmem:[%s5172_s10 + $0x8] sm:$0xff]  }
 0x21e   :  { %v3287_v22 = vpop.eup %3286  ;;  %v1732_v5 = vsel %vm1721_vm10, nan, %v1731_v37  ;;  %vm63_vm0 = vcmp.eq.s32.totalorder %v42_v38, %v2781_v31  ;;  %vm64_vm2 = vcmp.eq.s32.totalorder %v43_v54, %v2781_v31  ;;  %vm1929_vm3 = vweird.f32 %v4198_v9  ;;  %v47_v9 = vld [vmem:[%s5170_s0 + $0x28] sm:$0xff]  ;;  %v3225_v38 = vld [vmem:[%s5172_s10 + $0x18] sm:$0xff]  }
 0x21f   :  { %v3289_v19 = vpop.eup %3288  ;;  %v1833_v17 = vxor.u32 2147483648, %v3287_v22  ;;  %v1947_v49 = vpack.c.bf16 %v1732_v5, %v1628_v12  ;;  %3026 = vmatpush3.bf16.msra.mxu0 %v3213_v10  ;;  %vm1936_vm12 = vcmp.eq.s32.totalorder %v1931_v23, 2  ;;  %vm1933_vm9 = vcmp.eq.s32.totalorder %v1931_v23, 0  ;;  %vm2880_vm6 = vmpackc.low %vm64_vm2, %vm63_vm0  ;;  %3058 = vmatpush3.bf16.msra.mxu1 %v3221_v15  ;;  %v3228_v15 = vld [vmem:[%s5172_s10 + $0x30] sm:$0xff]  }
 0x220   :  { %v1830_v7 = vxor.u32 2147483648, %v3289_v19  ;;  %vm1932_vm14 = vcmp.lt.s32.totalorder %v1931_v23, 2  ;;  %v3304_v46 = vmov 1.0|1.0   ;;  %vm65_vm11 = vcmp.eq.s32.totalorder %v44_v1, %v2781_v31  ;;  %3075 = vmatprep.subr.bf16.mxu1 %v3222_v45 }
 0x221   :  { %v1834_v29 = vsel %vm1832_vm8, %v1833_v17, %v3289_v19  ;;  %3007 = vmatprep.mubr.bf16.mxu0 %v1947_v49  ;;  %vm66_vm1 = vcmp.eq.s32.totalorder %v45_v13, %v2781_v31  ;;  %vm67_vm15 = vcmp.eq.s32.totalorder %v46_v32, %v2781_v31  ;;  %vm68_vm4 = vcmp.eq.s32.totalorder %v47_v9, %v2781_v31  ;;  %v3224_v17 = vld [vmem:[%s5172_s10 + $0x10] sm:$0xff]  }
 0x222   :  { %v3291_v33 = vpop.eup %3290  ;;  %v1831_v47 = vsel %vm1829_vm7, %v3287_v22, %v1830_v7  ;;  %vm2882_vm10 = vmpackc.low %vm66_vm1, %vm65_vm11  ;;  %vm69_vm7 = vcmp.eq.s32.totalorder %v48_v52, %v2781_v31  ;;  %vm74_vm2 = vcmp.eq.s32.totalorder %v53_v8, %v2781_v31 }
 0x223   :  { %v1937_v50 = vxor.u32 2147483648, %v3291_v33  ;;  %v3293_v18 = vpop.eup %3292  ;;  %v1835_v57 = vsel %vm1828_vm13, %v1831_v47, %v1834_v29  ;;  %vm2884_vm8 = vmpackc.low %vm68_vm4, %vm67_vm15  ;;  %vm70_vm13 = vcmp.eq.s32.totalorder %v49_v44, %v2781_v31  ;;  %vm77_vm15 = vcmp.eq.s32.totalorder %v56_v56, %v2781_v31 }
 0x224   :  { %v1934_v11 = vxor.u32 2147483648, %v3293_v18  ;;  %v1836_v62 = vsel %vm1825_vm5, nan, %v1835_v57  ;;  %vm72_vm5 = vcmp.eq.s32.totalorder %v51_v24, %v2781_v31  ;;  %vm78_vm4 = vcmp.eq.s32.totalorder %v57_v60, %v2781_v31 }
 0x225   :  { %v1938_v53 = vsel %vm1936_vm12, %v1937_v50, %v3293_v18  ;;  %vm71_vm12 = vcmp.eq.s32.totalorder %v50_v43, %v2781_v31 }
 0x226   :  { %v1935_v30 = vsel %vm1933_vm9, %v3291_v33, %v1934_v11  ;;  %vm2886_vm9 = vmpackc.low %vm70_vm13, %vm69_vm7 }
 0x227   :  { %v1939_v36 = vsel %vm1932_vm14, %v1935_v30, %v1938_v53  ;;  %vm2888_vm0 = vmpackc.low %vm72_vm5, %vm71_vm12  ;;  %vm73_vm14 = vcmp.eq.s32.totalorder %v52_v48, %v2781_v31  ;;  %v3226_v30 = vld [vmem:[%s5172_s10 + $0x20] sm:$0xff]  }
 0x228   :  { %v1940_v63 = vsel %vm1929_vm3, nan, %v1939_v36  ;;  %vm75_vm3 = vcmp.eq.s32.totalorder %v54_v2, %v2781_v31  ;;  %vm2890_vm11 = vmpackc.low %vm74_vm2, %vm73_vm14 }
 0x229   :  { %v1948_v61 = vpack.c.bf16 %v1940_v63, %v1836_v62 }
 0x22b   :  { %3008 = vmatmul.mubr.bf16.gmra.mrb[12].mxu0 %v1948_v61 }
 0x22c   :  { %3027 = vmatprep.mubr.msk.bf16.mxu0 %vm2880_vm6, %v3304_v46  ;;  %vm76_vm6 = vcmp.eq.s32.totalorder %v55_v26, %v2781_v31 }
 0x22d   :  { %vm2892_vm1 = vmpackc.low %vm76_vm6, %vm75_vm3 }
 0x233   :  { %3028 = vmatmul.mubr.msk.bf16.vlgmr.msra.gmra.mrb[0].mxu0 %vm2882_vm10, %v3304_v46  ;;  %vm2894_vm10 = vmpackc.low %vm78_vm4, %vm77_vm15 }
 0x234   :  { %3031 = vmatprep.mubr.msk.bf16.mxu0 %vm2884_vm8, %v3304_v46 }
 0x23b   :  { %3032 = vmatmul.mubr.msk.bf16.gmra.mrb[4].mxu0 %vm2886_vm9, %v3304_v46 }
 0x23c   :  { %3035 = vmatprep.mubr.msk.bf16.mxu0 %vm2888_vm0, %v3304_v46 }
 0x243   :  { %3036 = vmatmul.mubr.msk.bf16.gmra.mrb[8].mxu0 %vm2890_vm11, %v3304_v46 }
 0x244   :  { %3039 = vmatprep.mubr.msk.bf16.mxu0 %vm2892_vm1, %v3304_v46 }
 0x24b   :  { %3040 = vmatmul.mubr.msk.bf16.gmra.mrb[12].mxu0 %vm2894_vm10, %v3304_v46  ;;  %v3227_v46 = vld [vmem:[%s5172_s10 + $0x28] sm:$0xff]  }
 0x306   :  { %v3029_v25 = vpop.f32.mrb[0].mxu0 }
 0x307   :  { %v2264_v35 = vadd.f32 %v3029_v25, %v5071_v55  ;;  %v2192_v28 = vpop.f32.mrb[1].mxu0 }
 0x308   :  { %v2262_v27 = vadd.f32 %v5071_v55, %v2192_v28  ;;  %v3030_v58 = vpop.f32.mrb[2].mxu0 }
 0x309   :  { %v2265_v39 = vadd.f32 %v3030_v58, %v5071_v55  ;;  %v2195_v59 = vpop.f32.mrb[3].mxu0  ;;  %v2280_v40 = vmax.f32 %v2264_v35, 0.0 }
 0x30a   :  { %v2263_v51 = vadd.f32 %v5071_v55, %v2195_v59  ;;  %v2278_v42 = vmax.f32 %v2262_v27, 0.0 }
 0x30b   :  { %v2281_v41 = vmax.f32 %v2265_v39, 0.0 }
 0x30c   :  { %v2279_v34 = vmax.f32 %v2263_v51, 0.0 }
 0x30d   :  { %v2312_v3 = vpack.c.bf16 %v2281_v41, %v2280_v40 }
 0x30e   :  { %v3033_v0 = vpop.f32.mrb[4].mxu0  ;;  %v2311_v21 = vpack.c.bf16 %v2279_v34, %v2278_v42 }
 0x30f   :  { %v2268_v6 = vadd.f32 %v3033_v0, %v5071_v55  ;;  %v2208_v4 = vpop.f32.mrb[5].mxu0 }
 0x310   :  { %v2266_v10 = vadd.f32 %v5071_v55, %v2208_v4  ;;  %v3034_v12 = vpop.f32.mrb[6].mxu0  ;;  %3059 = vmatprep.mubr.bf16.mxu1 %v2311_v21 }
 0x311   :  { %v2269_v16 = vadd.f32 %v3034_v12, %v5071_v55  ;;  %v2211_v22 = vpop.f32.mrb[7].mxu0  ;;  %3060 = vmatmul.mubr.bf16.vlgmr.msra.gmra.mrb[0].mxu1 %v2312_v3  ;;  %v2284_v19 = vmax.f32 %v2268_v6, 0.0 }
 0x312   :  { %v2267_v37 = vadd.f32 %v5071_v55, %v2211_v22  ;;  %3076 = vmatpush3.bf16.msra.mxu1 %v3222_v45  ;;  %v2282_v49 = vmax.f32 %v2266_v10, 0.0  ;;  %v3229_v45 = vld [vmem:[%s5172_s10 + $0x38] sm:$0xff]  }
 0x313   :  { %v2285_v5 = vmax.f32 %v2269_v16, 0.0  ;;  %3077 = vmatprep.subr.bf16.mxu1 %v3223_v14 }
 0x314   :  { %v2283_v7 = vmax.f32 %v2267_v37, 0.0 }
 0x315   :  { %v2314_v23 = vpack.c.bf16 %v2285_v5, %v2284_v19 }
 0x316   :  { %v2313_v29 = vpack.c.bf16 %v2283_v7, %v2282_v49  ;;  %v3037_v33 = vpop.f32.mrb[8].mxu0  ;;  %3078 = vmatpush3.bf16.msra.mxu1 %v3223_v14 }
 0x317   :  { %v2272_v47 = vadd.f32 %v3037_v33, %v5071_v55  ;;  %v2224_v50 = vpop.f32.mrb[9].mxu0  ;;  %3079 = vmatprep.subr.bf16.mxu1 %v3224_v17 }
 0x318   :  { %v2270_v31 = vadd.f32 %v5071_v55, %v2224_v50  ;;  %v3038_v18 = vpop.f32.mrb[10].mxu0  ;;  %3063 = vmatprep.mubr.bf16.mxu1 %v2313_v29 }
 0x319   :  { %v2273_v57 = vadd.f32 %v3038_v18, %v5071_v55  ;;  %v2227_v54 = vpop.f32.mrb[11].mxu0  ;;  %3064 = vmatmul.mubr.bf16.gmra.mrb[4].mxu1 %v2314_v23  ;;  %v2288_v53 = vmax.f32 %v2272_v47, 0.0 }
 0x31a   :  { %v2271_v11 = vadd.f32 %v5071_v55, %v2227_v54  ;;  %3080 = vmatpush3.bf16.msra.mxu1 %v3224_v17  ;;  %v2286_v36 = vmax.f32 %v2270_v31, 0.0 }
 0x31b   :  { %v2289_v62 = vmax.f32 %v2273_v57, 0.0  ;;  %3081 = vmatprep.subr.bf16.mxu1 %v3225_v38 }
 0x31c   :  { %v2287_v63 = vmax.f32 %v2271_v11, 0.0 }
 0x31d   :  { %v2316_v61 = vpack.c.bf16 %v2289_v62, %v2288_v53 }
 0x31e   :  { %v2315_v1 = vpack.c.bf16 %v2287_v63, %v2286_v36  ;;  %v3041_v13 = vpop.f32.mrb[12].mxu0  ;;  %3082 = vmatpush3.bf16.msra.mxu1 %v3225_v38 }
 0x31f   :  { %v2276_v32 = vadd.f32 %v3041_v13, %v5071_v55  ;;  %v2240_v9 = vpop.f32.mrb[13].mxu0  ;;  %3083 = vmatprep.subr.bf16.mxu1 %v3226_v30 }
 0x320   :  { %v2274_v52 = vadd.f32 %v5071_v55, %v2240_v9  ;;  %v3042_v44 = vpop.f32.mrb[14].mxu0  ;;  %3067 = vmatprep.mubr.bf16.mxu1 %v2315_v1 }
 0x321   :  { %v2277_v43 = vadd.f32 %v3042_v44, %v5071_v55  ;;  %v2243_v24 = vpop.f32.mrb[15].mxu0  ;;  %3068 = vmatmul.mubr.bf16.gmra.mrb[8].mxu1 %v2316_v61  ;;  %v2292_v8 = vmax.f32 %v2276_v32, 0.0 }
 0x322   :  { %v2275_v48 = vadd.f32 %v5071_v55, %v2243_v24  ;;  %3084 = vmatpush3.bf16.msra.mxu1 %v3226_v30  ;;  %v2290_v26 = vmax.f32 %v2274_v52, 0.0  ;;  %v2897_v55 = vld [vmem:[%s5174_s9] ss:$0 sm:$0xff] }
 0x323   :  { %v2293_v2 = vmax.f32 %v2277_v43, 0.0  ;;  %3085 = vmatprep.subr.bf16.mxu1 %v3227_v46 }
 0x324   :  { %v2291_v56 = vmax.f32 %v2275_v48, 0.0 }
 0x325   :  { %v2318_v60 = vpack.c.bf16 %v2293_v2, %v2292_v8  ;;  %v3305_v2 = vmov 0.0  }
 0x326   :  { %v2317_v20 = vpack.c.bf16 %v2291_v56, %v2290_v26  ;;  %3086 = vmatpush3.bf16.msra.mxu1 %v3227_v46  ;;  %2762 = vst [vmem:[%s5175_s12 + $0x8] sm:$0xff] %v3305_v2  ;;  %2763 = vst [vmem:[%s5175_s12 + $0x10] sm:$0xff] %v3305_v2  ;;  %v2662_v26 = vlaneseq }
 0x327   :  { %3087 = vmatprep.subr.bf16.mxu1 %v3228_v15  ;;  %2764 = vst [vmem:[%s5175_s12 + $0x18] sm:$0xff] %v3305_v2  ;;  %2765 = vst [vmem:[%s5175_s12 + $0x20] sm:$0xff] %v3305_v2 }
 0x328   :  { %3071 = vmatprep.mubr.bf16.mxu1 %v2317_v20  ;;  %2766 = vst [vmem:[%s5175_s12 + $0x28] sm:$0xff] %v3305_v2  ;;  %2767 = vst [vmem:[%s5175_s12 + $0x30] sm:$0xff] %v3305_v2  ;;  %v2663_v56 = vshrl.u32 %v2662_v26, 7 }
 0x329   :  { %3072 = vmatmul.mubr.bf16.gmra.mrb[12].mxu1 %v2318_v60  ;;  %2768 = vst [vmem:[%s5175_s12 + $0x38] sm:$0xff] %v3305_v2  ;;  %2769 = vst [vmem:[%s5175_s12 + $0x40] sm:$0xff] %v3305_v2  ;;  %v2906_v60 = vld [vmem:[%s5176_s11] ss:$0 sm:$0xff] }
 0x32a   :  { %3088 = vmatpush3.bf16.msra.mxu1 %v3228_v15  ;;  %2770 = vst [vmem:[%s5175_s12 + $0x48] sm:$0xff] %v3305_v2  ;;  %2771 = vst [vmem:[%s5175_s12 + $0x50] sm:$0xff] %v3305_v2  ;;  %vm2697_vm8 = vcmp.lt.s32.totalorder %v2663_v56, 2 }
 0x32b   :  { %3089 = vmatprep.subr.bf16.mxu1 %v3229_v45  ;;  %2772 = vst [vmem:[%s5175_s12 + $0x58] sm:$0xff] %v3305_v2  ;;  %2773 = vst [vmem:[%s5175_s12 + $0x60] sm:$0xff] %v3305_v2 }
 0x32c   :  { %2774 = vst [vmem:[%s5175_s12 + $0x68] sm:$0xff] %v3305_v2  ;;  %2775 = vst [vmem:[%s5175_s12 + $0x70] sm:$0xff] %v3305_v2 }
 0x32d   :  { %2776 = vst [vmem:[%s5175_s12 + $0x78] sm:$0xff] %v3305_v2 }
 0x32e   :  { %3090 = vmatpush3.bf16.msra.mxu1 %v3229_v45 }
 0x3e4   :  { %v3061_v25 = vpop.f32.mrb[0].mxu1 }
 0x3e5   :  { %v2416_v35 = vadd.f32 %v3061_v25, %v2897_v55  ;;  %v2407_v28 = vpop.f32.mrb[1].mxu1 }
 0x3e6   :  { %v2408_v27 = vadd.f32 %v2897_v55, %v2407_v28  ;;  %v3062_v58 = vpop.f32.mrb[2].mxu1 }
 0x3e7   :  { %v2419_v39 = vadd.f32 %v3062_v58, %v2897_v55  ;;  %v2410_v59 = vpop.f32.mrb[3].mxu1  ;;  %v2472_v40 = vmax.f32 %v2416_v35, 0.0 }
 0x3e8   :  { %v2411_v51 = vadd.f32 %v2897_v55, %v2410_v59  ;;  %v2470_v42 = vmax.f32 %v2408_v27, 0.0 }
 0x3e9   :  { %v2473_v41 = vmax.f32 %v2419_v39, 0.0 }
 0x3ea   :  { %v2471_v34 = vmax.f32 %v2411_v51, 0.0 }
 0x3eb   :  { %v2504_v3 = vpack.c.bf16 %v2473_v41, %v2472_v40 }
 0x3ec   :  { %v2503_v0 = vpack.c.bf16 %v2471_v34, %v2470_v42  ;;  %v3065_v21 = vpop.f32.mrb[4].mxu1 }
 0x3ed   :  { %v2432_v6 = vadd.f32 %v3065_v21, %v2897_v55  ;;  %v2423_v4 = vpop.f32.mrb[5].mxu1 }
 0x3ee   :  { %v2424_v14 = vadd.f32 %v2897_v55, %v2423_v4  ;;  %v3066_v10 = vpop.f32.mrb[6].mxu1  ;;  %3091 = vmatprep.mubr.bf16.mxu1 %v2503_v0 }
 0x3ef   :  { %v2435_v12 = vadd.f32 %v3066_v10, %v2897_v55  ;;  %v2426_v16 = vpop.f32.mrb[7].mxu1  ;;  %3092 = vmatmul.mubr.bf16.vlgmr.msra.gmra.mrb[16].mxu1 %v2504_v3  ;;  %v2476_v37 = vmax.f32 %v2432_v6, 0.0 }
 0x3f0   :  { %v2427_v22 = vadd.f32 %v2897_v55, %v2426_v16  ;;  %v2474_v5 = vmax.f32 %v2424_v14, 0.0 }
 0x3f1   :  { %v2477_v19 = vmax.f32 %v2435_v12, 0.0 }
 0x3f2   :  { %v2475_v17 = vmax.f32 %v2427_v22, 0.0 }
 0x3f3   :  { %v2506_v49 = vpack.c.bf16 %v2477_v19, %v2476_v37 }
 0x3f4   :  { %v2505_v7 = vpack.c.bf16 %v2475_v17, %v2474_v5  ;;  %v3069_v23 = vpop.f32.mrb[8].mxu1 }
 0x3f5   :  { %v2448_v29 = vadd.f32 %v3069_v23, %v2897_v55  ;;  %v2439_v33 = vpop.f32.mrb[9].mxu1 }
 0x3f6   :  { %v2440_v47 = vadd.f32 %v2897_v55, %v2439_v33  ;;  %v3070_v50 = vpop.f32.mrb[10].mxu1  ;;  %3095 = vmatprep.mubr.bf16.mxu1 %v2505_v7 }
 0x3f7   :  { %v2451_v38 = vadd.f32 %v3070_v50, %v2897_v55  ;;  %v2442_v31 = vpop.f32.mrb[11].mxu1  ;;  %3096 = vmatmul.mubr.bf16.gmra.mrb[20].mxu1 %v2506_v49  ;;  %v2480_v57 = vmax.f32 %v2448_v29, 0.0 }
 0x3f8   :  { %v2443_v18 = vadd.f32 %v2897_v55, %v2442_v31  ;;  %v2478_v11 = vmax.f32 %v2440_v47, 0.0 }
 0x3f9   :  { %v2481_v54 = vmax.f32 %v2451_v38, 0.0 }
 0x3fa   :  { %v2479_v53 = vmax.f32 %v2443_v18, 0.0 }
 0x3fb   :  { %v2508_v62 = vpack.c.bf16 %v2481_v54, %v2480_v57 }
 0x3fc   :  { %v2507_v30 = vpack.c.bf16 %v2479_v53, %v2478_v11  ;;  %v3073_v36 = vpop.f32.mrb[12].mxu1 }
 0x3fd   :  { %v2464_v63 = vadd.f32 %v3073_v36, %v2897_v55  ;;  %v2455_v61 = vpop.f32.mrb[13].mxu1 }
 0x3fe   :  { %v2456_v1 = vadd.f32 %v2897_v55, %v2455_v61  ;;  %v3074_v13 = vpop.f32.mrb[14].mxu1  ;;  %3099 = vmatprep.mubr.bf16.mxu1 %v2507_v30 }
 0x3ff   :  { %v2467_v32 = vadd.f32 %v3074_v13, %v2897_v55  ;;  %v2458_v9 = vpop.f32.mrb[15].mxu1  ;;  %3100 = vmatmul.mubr.bf16.gmra.mrb[24].mxu1 %v2508_v62  ;;  %v2484_v52 = vmax.f32 %v2464_v63, 0.0 }
 0x400   :  { %v2459_v46 = vadd.f32 %v2897_v55, %v2458_v9  ;;  %v2482_v43 = vmax.f32 %v2456_v1, 0.0 }
 0x401   :  { %v2485_v44 = vmax.f32 %v2467_v32, 0.0 }
 0x402   :  { %v2483_v24 = vmax.f32 %v2459_v46, 0.0 }
 0x403   :  { %v2510_v48 = vpack.c.bf16 %v2485_v44, %v2484_v52 }
 0x404   :  { %v2509_v8 = vpack.c.bf16 %v2483_v24, %v2482_v43 }
 0x406   :  { %3103 = vmatprep.mubr.bf16.mxu1 %v2509_v8 }
 0x407   :  { %3104 = vmatmul.mubr.bf16.gmra.mrb[28].mxu1 %v2510_v48 }
 0x4c2   :  { %v3093_v20 = vpop.f32.mrb[16].mxu1 }
 0x4c3   :  { %v2599_v15 = vpop.f32.mrb[17].mxu1 }
 0x4c4   :  { %v2600_v45 = vadd.f32 %v2906_v60, %v2599_v15  ;;  %v3094_v55 = vpop.f32.mrb[18].mxu1 }
 0x4c5   :  { %v2602_v25 = vpop.f32.mrb[19].mxu1 }
 0x4c6   :  { %v2745_v35 = vsel %vm2697_vm8, %v2600_v45, 0.0 }
 0x4c7   :  { %2761 = vst [vmem:[%s5175_s12] sm:$0xff] %v2745_v35 }
 0x4ca   :  { %v3097_v28 = vpop.f32.mrb[20].mxu1 }
 0x4cb   :  { %v2615_v27 = vpop.f32.mrb[21].mxu1 }
 0x4cc   :  { %v3098_v58 = vpop.f32.mrb[22].mxu1 }
 0x4cd   :  { %v2618_v39 = vpop.f32.mrb[23].mxu1 }
 0x4d2   :  { %v3101_v59 = vpop.f32.mrb[24].mxu1 }
 0x4d3   :  { %v2631_v51 = vpop.f32.mrb[25].mxu1 }
 0x4d4   :  { %v3102_v40 = vpop.f32.mrb[26].mxu1 }
 0x4d5   :  { %v2634_v41 = vpop.f32.mrb[27].mxu1 }
 0x4da   :  { %v3105_v42 = vpop.f32.mrb[28].mxu1 }
 0x4db   :  { %v2647_v34 = vpop.f32.mrb[29].mxu1 }
 0x4dc   :  { %v3106_v3 = vpop.f32.mrb[30].mxu1 }
 0x4dd   :  { %v2650_v0 = vpop.f32.mrb[31].mxu1 }

</bundles_post_ra>
